<compile_context>
chip_gen: v5e
topology: v5e:2x2
jax: 0.10.0
libtpu: 0.0.40
codegen_flags: <defaults>
</compile_context>

<pallas_src>
import functools

import numpy as np
import jax
import jax.numpy as jnp
from jax.experimental import pallas as pl
from jax.experimental.pallas import tpu as pltpu  # noqa: F401  (imported per template)

# ----------------------------- config ---------------------------------------
INPUT_DIM = 4      # input_dim
GNN_DIM   = 48     # gnn_dim (hidden_dim of Encoder_Pos_Embed), divisible by 6
ENC_DIM   = 64     # enc_dim
ENC_DEPTH = 2      # enc_depth
ENC_HEADS = 4      # enc_num_heads
BATCH     = 2
SEQ       = 8      # num_supernodes per sample
N_TOTAL   = BATCH * SEQ
# TODO(synk): verify LayerNorm eps of the reference blocks (torch default 1e-5,
#             UPT/kappamodules transformer blocks typically use 1e-6).
LN_EPS    = 1e-6

_FUSED_KEYS = ("w_ang", "w_feat", "w_sin", "w_cos", "b_pre",
               "vec_slab", "wqkv", "wproj", "wfc1", "wfc2")


# ---------------------------------------------------------------------------
# Single fused kernel: (folded pos-embed + enc_proj) + ENC_DEPTH PrenormBlocks
# ---------------------------------------------------------------------------
def _encoder_fused_kernel(
        feat_ref, pos_ref, bidx_r_ref, bidx_c_ref,
        w_ang_ref, w_feat_ref, w_sin_ref, w_cos_ref, b_pre_ref,
        vec_ref, wqkv_ref, wproj_ref, wfc1_ref, wfc2_ref,
        out_ref, *, depth, num_heads):
    f32 = jnp.float32
    E = out_ref.shape[-1]
    hd = E // num_heads

    def layernorm(v, g, b):
        mu = jnp.mean(v, axis=-1, keepdims=True)
        var = jnp.mean((v - mu) ** 2, axis=-1, keepdims=True)
        return (v - mu) * jax.lax.rsqrt(var + LN_EPS) * g + b

    # ---------------- pos-embed + enc_proj (all folding done offline) --------
    # ang columns: [cp1 angles (24) | cp2 angles (24) | time angles (24)]
    ang = jnp.dot(pos_ref[...], w_ang_ref[...], preferred_element_type=f32)   # (N, 72)
    x = (jnp.dot(feat_ref[...], w_feat_ref[...], preferred_element_type=f32)
         + jnp.dot(jnp.sin(ang), w_sin_ref[...], preferred_element_type=f32)
         + jnp.dot(jnp.cos(ang), w_cos_ref[...], preferred_element_type=f32)
         + b_pre_ref[...])                                                     # (N, E)

    # -------- block-diagonal per-sample attention bias, built in-kernel ------
    mask = jnp.where(bidx_r_ref[...] == bidx_c_ref[...],
                     f32(0.0), f32(-1e30))                                     # (N, N)

    # ---------------- PrenormBlocks ----------------
    for d in range(depth):
        # packed vector params: rows 0..3 = LN gamma/beta, rows 4..7 = biases
        ln1_g = vec_ref[d, 0:1, 0:E]
        ln1_b = vec_ref[d, 1:2, 0:E]
        ln2_g = vec_ref[d, 2:3, 0:E]
        ln2_b = vec_ref[d, 3:4, 0:E]
        bqkv  = vec_ref[d, 4:5, 0:3 * E]
        bproj = vec_ref[d, 5:6, 0:E]
        bfc1  = vec_ref[d, 6:7, 0:4 * E]
        bfc2  = vec_ref[d, 7:8, 0:E]

        # --- pre-norm MHSA: fused QKV, per-head softmax, fused output proj ---
        h = layernorm(x, ln1_g, ln1_b)
        # attention scale is pre-folded into the Q columns of wqkv/bqkv
        qkv = jnp.dot(h, wqkv_ref[d], preferred_element_type=f32) + bqkv       # (N, 3E)
        q = qkv[:, 0:E]
        k = qkv[:, E:2 * E]
        v = qkv[:, 2 * E:3 * E]

        heads = []
        for hi in range(num_heads):
            sl = slice(hi * hd, (hi + 1) * hd)
            qh, kh, vh = q[:, sl], k[:, sl], v[:, sl]
            s = jax.lax.dot_general(qh, kh, (((1,), (1,)), ((), ())),
                                    preferred_element_type=f32) + mask         # (N, N)
            s = s - jnp.max(s, axis=-1, keepdims=True)
            p = jnp.exp(s)
            p = p / jnp.sum(p, axis=-1, keepdims=True)
            heads.append(jnp.dot(p, vh, preferred_element_type=f32))           # (N, hd)
        o = jnp.concatenate(heads, axis=-1)                                    # (N, E)
        x = x + jnp.dot(o, wproj_ref[d], preferred_element_type=f32) + bproj

        # --- pre-norm MLP ---
        h2 = layernorm(x, ln2_g, ln2_b)
        m = jnp.dot(h2, wfc1_ref[d], preferred_element_type=f32) + bfc1
        # TODO(synk): torch nn.GELU default is the exact erf form; tanh approx used here.
        m = jax.nn.gelu(m, approximate=True)
        x = x + jnp.dot(m, wfc2_ref[d], preferred_element_type=f32) + bfc2

    out_ref[...] = x


# ---------------------------------------------------------------------------
# Parameter initialization in the module's "natural" layout (deterministic)
# ---------------------------------------------------------------------------
def _lin_init(key, din, dout):
    kw, kb = jax.random.split(key)
    w = jax.random.normal(kw, (din, dout), jnp.float32) * 0.02
    b = jax.random.normal(kb, (1, dout), jnp.float32) * 0.02
    return w, b


def _block_init(key, dim):
    ks = jax.random.split(key, 4)
    wqkv, bqkv = _lin_init(ks[0], dim, 3 * dim)
    wproj, bproj = _lin_init(ks[1], dim, dim)
    wfc1, bfc1 = _lin_init(ks[2], dim, 4 * dim)
    wfc2, bfc2 = _lin_init(ks[3], 4 * dim, dim)
    return dict(
        ln1_g=jnp.ones((1, dim), jnp.float32), ln1_b=jnp.zeros((1, dim), jnp.float32),
        wqkv=wqkv, bqkv=bqkv, wproj=wproj, bproj=bproj,
        ln2_g=jnp.ones((1, dim), jnp.float32), ln2_b=jnp.zeros((1, dim), jnp.float32),
        wfc1=wfc1, bfc1=bfc1, wfc2=wfc2, bfc2=bfc2)


def init_params(key):
    ks = jax.random.split(key, 3 + ENC_DEPTH)
    w_in, b_in = _lin_init(ks[0], INPUT_DIM, GNN_DIM)          # input_proj
    w_pm, b_pm = _lin_init(ks[1], 2 * GNN_DIM, GNN_DIM)        # pos_mlp
    w_ep, b_ep = _lin_init(ks[2], GNN_DIM, ENC_DIM)            # enc_proj

    # ChannelPositionalEncodingSinCos(d_model=GNN_DIM, pos_dim=3): sincos freqs
    dim_per = GNN_DIM // 3
    omega_pos = 1.0 / (10000.0 ** (jnp.arange(0, dim_per, 2, dtype=jnp.float32)
                                   / dim_per))                         # (GNN_DIM//6,)
    # ContinuousSincosEmbed(dim=GNN_DIM, ndim=1)
    omega_time = (1.0 / (10000.0 ** (jnp.arange(0, GNN_DIM, 2, dtype=jnp.float32)
                                     / GNN_DIM))).reshape(1, -1)       # (1, GNN_DIM//2)

    blocks = [_block_init(ks[3 + i], ENC_DIM) for i in range(ENC_DEPTH)]
    return dict(w_in=w_in, b_in=b_in, w_posmlp=w_pm, b_posmlp=b_pm,
                enc_proj_w=w_ep, enc_proj_b=b_ep,
                omega_pos=omega_pos, omega_time=omega_time, blocks=blocks)


# ---------------------------------------------------------------------------
# Offline (host-side, one-time) algebraic folding and weight packing so the
# kernel only sees a handful of lane-dense slabs.
# ---------------------------------------------------------------------------
def prepare_fused_params(params):
    nh = ENC_HEADS
    hd = ENC_DIM // nh
    gnn = GNN_DIM
    nf = int(params["omega_pos"].shape[0])                 # freqs per coordinate (8)
    n_ang = 3 * nf                                         # 24 angles per coord set
    n_time = gnn // 2                                      # 24 time angles

    w_ep = np.asarray(params["enc_proj_w"], np.float32)    # (48, 64)
    b_ep = np.asarray(params["enc_proj_b"], np.float32)    # (1, 64)
    omega_pos = np.asarray(params["omega_pos"], np.float32)
    omega_time = np.asarray(params["omega_time"], np.float32).reshape(-1)

    # angle projection: input_pos (N,7) @ w_ang (7,72)
    # cols [0:24]=cp1 angles, [24:48]=cp2 angles, [48:72]=time angles
    w_ang = np.zeros((7, 2 * n_ang + n_time), np.float32)
    for d in range(3):
        w_ang[d, d * nf:(d + 1) * nf] = omega_pos                          # cp1
        w_ang[3 + d, n_ang + d * nf:n_ang + (d + 1) * nf] = omega_pos      # cp2
    w_ang[6, 2 * n_ang:] = omega_time                                      # time

    # pos_mlp rows reordered (interleaved per-axis [sin|cos] -> grouped sin/cos),
    # then folded through enc_proj.
    idx_sin = np.concatenate([np.arange(d * 2 * nf, d * 2 * nf + nf) for d in range(3)])
    idx_cos = idx_sin + nf
    w_pm = np.asarray(params["w_posmlp"], np.float32)       # (2*GNN_DIM, GNN_DIM)
    wp_s1 = w_pm[idx_sin] @ w_ep
    wp_c1 = w_pm[idx_cos] @ w_ep
    wp_s2 = w_pm[idx_sin + gnn] @ w_ep
    wp_c2 = w_pm[idx_cos + gnn] @ w_ep

    # time embed cat(sin,cos) @ w_ep == sin @ w_ep[:24] + cos @ w_ep[24:]
    # TODO(synk): verify ContinuousSincosEmbed channel ordering (grouped sin|cos
    #             assumed; an interleaved reference layout would need a row perm).
    w_t_sin = w_ep[:n_time]
    w_t_cos = w_ep[n_time:]

    w_sin = np.concatenate([wp_s1, wp_s2, w_t_sin], axis=0)  # (72, 64)
    w_cos = np.concatenate([wp_c1, wp_c2, w_t_cos], axis=0)  # (72, 64)
    w_feat = np.asarray(params["w_in"], np.float32) @ w_ep    # (4, 64)
    b_pre = ((np.asarray(params["b_in"], np.float32)
              + np.asarray(params["b_posmlp"], np.float32)) @ w_ep + b_ep)  # (1, 64)

    # ---- per-block packing ----
    scale = float(hd) ** -0.5
    wqkv_l, wproj_l, wfc1_l, wfc2_l, vec_l = [], [], [], [], []
    for blk in params["blocks"]:
        wqkv = np.asarray(blk["wqkv"], np.float32).copy()    # (64, 192)
        bqkv = np.asarray(blk["bqkv"], np.float32).copy()    # (1, 192)
        # fold attention scale into the Q columns
        wqkv[:, :ENC_DIM] *= scale
        bqkv[:, :ENC_DIM] *= scale
        wqkv_l.append(wqkv)
        wproj_l.append(np.asarray(blk["wproj"], np.float32))
        wfc1_l.append(np.asarray(blk["wfc1"], np.float32))
        wfc2_l.append(np.asarray(blk["wfc2"], np.float32))

        vec = np.zeros((8, 4 * ENC_DIM), np.float32)          # (8, 256) lane-dense slab
        vec[0, :ENC_DIM] = np.asarray(blk["ln1_g"]).reshape(-1)
        vec[1, :ENC_DIM] = np.asarray(blk["ln1_b"]).reshape(-1)
        vec[2, :ENC_DIM] = np.asarray(blk["ln2_g"]).reshape(-1)
        vec[3, :ENC_DIM] = np.asarray(blk["ln2_b"]).reshape(-1)
        vec[4, :3 * ENC_DIM] = bqkv.reshape(-1)
        vec[5, :ENC_DIM] = np.asarray(blk["bproj"]).reshape(-1)
        vec[6, :4 * ENC_DIM] = np.asarray(blk["bfc1"]).reshape(-1)
        vec[7, :ENC_DIM] = np.asarray(blk["bfc2"]).reshape(-1)
        vec_l.append(vec)

    return dict(
        w_ang=jnp.asarray(w_ang), w_feat=jnp.asarray(w_feat),
        w_sin=jnp.asarray(w_sin), w_cos=jnp.asarray(w_cos),
        b_pre=jnp.asarray(b_pre),
        vec_slab=jnp.asarray(np.stack(vec_l)),               # (D, 8, 256)
        wqkv=jnp.asarray(np.stack(wqkv_l)),                  # (D, 64, 192)
        wproj=jnp.asarray(np.stack(wproj_l)),                # (D, 64, 64)
        wfc1=jnp.asarray(np.stack(wfc1_l)),                  # (D, 64, 256)
        wfc2=jnp.asarray(np.stack(wfc2_l)),                  # (D, 256, 64)
    )


# ---------------------------------------------------------------------------
# Full Encoder forward: one fused pallas_call, fully jitted, no host syncs.
# ---------------------------------------------------------------------------
@functools.partial(jax.jit, static_argnames=("batch_size",))
def encoder_forward(fused_params, input_feat, input_pos, batch_idx, *, batch_size):
    assert input_feat.ndim == 2 and input_pos.ndim == 2 and batch_idx.ndim == 1
    assert input_feat.shape[0] == input_pos.shape[0]
    n = input_feat.shape[0]

    # Tiny per-token batch-id vectors; the O(N^2) block-diagonal bias is built
    # inside the kernel (no quadratic HBM->VMEM DMA).
    bidx = batch_idx.astype(jnp.float32)
    bidx_r = bidx.reshape(n, 1)
    bidx_c = bidx.reshape(1, n)

    depth = fused_params["wqkv"].shape[0]
    kernel = functools.partial(_encoder_fused_kernel,
                               depth=depth, num_heads=ENC_HEADS)

    out = pl.pallas_call(
        kernel,
        out_shape=jax.ShapeDtypeStruct((n, ENC_DIM), jnp.float32),
    )(input_feat, input_pos, bidx_r, bidx_c,
      *[fused_params[k] for k in _FUSED_KEYS])

    # '(batch num_supernodes) dim -> batch num_supernodes dim'
    return out.reshape(batch_size, n // batch_size, ENC_DIM)


if __name__ == "__main__":
    key = jax.random.PRNGKey(0)
    k_param, k_feat, k_pos = jax.random.split(key, 3)

    params = init_params(k_param)
    fused = prepare_fused_params(params)

    input_feat = jax.random.normal(k_feat, (N_TOTAL, INPUT_DIM), jnp.float32)
    input_pos = jax.random.uniform(k_pos, (N_TOTAL, 7), jnp.float32)
    batch_idx = jnp.repeat(jnp.arange(BATCH, dtype=jnp.int32), SEQ)

    out = encoder_forward(fused, input_feat, input_pos, batch_idx, batch_size=BATCH)
    out = jax.block_until_ready(out)
    assert out.shape == (BATCH, SEQ, ENC_DIM), out.shape
    assert bool(jnp.all(jnp.isfinite(out)))
    print("KERNEL_OK")
</pallas_src>

<mosaic_0001>
module attributes {stable_mosaic.version = 11 : i64} {
  func.func @_encoder_fused_kernel(%arg0: memref<16x4xf32, #tpu.memory_space<vmem>>, %arg1: memref<16x7xf32, #tpu.memory_space<vmem>>, %arg2: memref<16x1xf32, #tpu.memory_space<vmem>>, %arg3: memref<1x16xf32, #tpu.memory_space<vmem>>, %arg4: memref<7x72xf32, #tpu.memory_space<vmem>>, %arg5: memref<4x64xf32, #tpu.memory_space<vmem>>, %arg6: memref<72x64xf32, #tpu.memory_space<vmem>>, %arg7: memref<72x64xf32, #tpu.memory_space<vmem>>, %arg8: memref<1x64xf32, #tpu.memory_space<vmem>>, %arg9: memref<2x8x256xf32, #tpu.memory_space<vmem>>, %arg10: memref<2x64x192xf32, #tpu.memory_space<vmem>>, %arg11: memref<2x64x64xf32, #tpu.memory_space<vmem>>, %arg12: memref<2x64x256xf32, #tpu.memory_space<vmem>>, %arg13: memref<2x256x64xf32, #tpu.memory_space<vmem>>, %arg14: memref<16x64xf32, #tpu.memory_space<vmem>>) attributes {dimension_semantics = [], scalar_prefetch = 0 : i64, scratch_operands = 0 : i64, tpu.core_type = #tpu.core_type<tc>} {
    %c0 = arith.constant 0 : index
    %c0_0 = arith.constant 0 : index
    %0 = vector.load %arg1[%c0, %c0_0] : memref<16x7xf32, #tpu.memory_space<vmem>>, vector<16x7xf32>
    %c0_1 = arith.constant 0 : index
    %c0_2 = arith.constant 0 : index
    %1 = vector.load %arg4[%c0_1, %c0_2] : memref<7x72xf32, #tpu.memory_space<vmem>>, vector<7x72xf32>
    %cst = arith.constant dense<0.000000e+00> : vector<16x72xf32>
    %2 = tpu.matmul %0, %1, %cst {dimension_numbers = #tpu.dot_dimension_numbers<[1], [0], [0], [1], [0, 0, 1, 1], [], []>} : vector<16x7xf32>, vector<7x72xf32>, vector<16x72xf32> -> vector<16x72xf32>
    %c0_3 = arith.constant 0 : index
    %c0_4 = arith.constant 0 : index
    %3 = vector.load %arg0[%c0_3, %c0_4] : memref<16x4xf32, #tpu.memory_space<vmem>>, vector<16x4xf32>
    %c0_5 = arith.constant 0 : index
    %c0_6 = arith.constant 0 : index
    %4 = vector.load %arg5[%c0_5, %c0_6] : memref<4x64xf32, #tpu.memory_space<vmem>>, vector<4x64xf32>
    %cst_7 = arith.constant dense<0.000000e+00> : vector<16x64xf32>
    %5 = tpu.matmul %3, %4, %cst_7 {dimension_numbers = #tpu.dot_dimension_numbers<[1], [0], [0], [1], [0, 0, 1, 1], [], []>} : vector<16x4xf32>, vector<4x64xf32>, vector<16x64xf32> -> vector<16x64xf32>
    %6 = math.sin %2 : vector<16x72xf32>
    %c0_8 = arith.constant 0 : index
    %c0_9 = arith.constant 0 : index
    %7 = vector.load %arg6[%c0_8, %c0_9] : memref<72x64xf32, #tpu.memory_space<vmem>>, vector<72x64xf32>
    %cst_10 = arith.constant dense<0.000000e+00> : vector<16x64xf32>
    %8 = tpu.matmul %6, %7, %cst_10 {dimension_numbers = #tpu.dot_dimension_numbers<[1], [0], [0], [1], [0, 0, 1, 1], [], []>} : vector<16x72xf32>, vector<72x64xf32>, vector<16x64xf32> -> vector<16x64xf32>
    %9 = arith.addf %5, %8 : vector<16x64xf32>
    %10 = math.cos %2 : vector<16x72xf32>
    %c0_11 = arith.constant 0 : index
    %c0_12 = arith.constant 0 : index
    %11 = vector.load %arg7[%c0_11, %c0_12] : memref<72x64xf32, #tpu.memory_space<vmem>>, vector<72x64xf32>
    %cst_13 = arith.constant dense<0.000000e+00> : vector<16x64xf32>
    %12 = tpu.matmul %10, %11, %cst_13 {dimension_numbers = #tpu.dot_dimension_numbers<[1], [0], [0], [1], [0, 0, 1, 1], [], []>} : vector<16x72xf32>, vector<72x64xf32>, vector<16x64xf32> -> vector<16x64xf32>
    %13 = arith.addf %9, %12 : vector<16x64xf32>
    %c0_14 = arith.constant 0 : index
    %c0_15 = arith.constant 0 : index
    %14 = vector.load %arg8[%c0_14, %c0_15] : memref<1x64xf32, #tpu.memory_space<vmem>>, vector<1x64xf32>
    %15 = vector.broadcast %14 : vector<1x64xf32> to vector<16x64xf32>
    %16 = arith.addf %13, %15 : vector<16x64xf32>
    %c0_16 = arith.constant 0 : index
    %c0_17 = arith.constant 0 : index
    %17 = vector.load %arg2[%c0_16, %c0_17] : memref<16x1xf32, #tpu.memory_space<vmem>>, vector<16x1xf32>
    %c0_18 = arith.constant 0 : index
    %c0_19 = arith.constant 0 : index
    %18 = vector.load %arg3[%c0_18, %c0_19] : memref<1x16xf32, #tpu.memory_space<vmem>>, vector<1x16xf32>
    %19 = vector.broadcast %17 : vector<16x1xf32> to vector<16x16xf32>
    %20 = vector.broadcast %18 : vector<1x16xf32> to vector<16x16xf32>
    %21 = arith.cmpf oeq, %19, %20 : vector<16x16xf32>
    %cst_20 = arith.constant 0.000000e+00 : f32
    %cst_21 = arith.constant -1.000000e+30 : f32
    %22 = vector.broadcast %cst_20 : f32 to vector<16x16xf32>
    %23 = vector.broadcast %cst_21 : f32 to vector<16x16xf32>
    %24 = arith.select %21, %22, %23 : vector<16x16xi1>, vector<16x16xf32>
    %c0_22 = arith.constant 0 : index
    %c0_23 = arith.constant 0 : index
    %c0_24 = arith.constant 0 : index
    %25 = vector.load %arg9[%c0_22, %c0_23, %c0_24] : memref<2x8x256xf32, #tpu.memory_space<vmem>>, vector<1x1x64xf32>
    %26 = vector.shape_cast %25 : vector<1x1x64xf32> to vector<1x64xf32>
    %c0_25 = arith.constant 0 : index
    %c1 = arith.constant 1 : index
    %c0_26 = arith.constant 0 : index
    %27 = vector.load %arg9[%c0_25, %c1, %c0_26] : memref<2x8x256xf32, #tpu.memory_space<vmem>>, vector<1x1x64xf32>
    %28 = vector.shape_cast %27 : vector<1x1x64xf32> to vector<1x64xf32>
    %c0_27 = arith.constant 0 : index
    %c2 = arith.constant 2 : index
    %c0_28 = arith.constant 0 : index
    %29 = vector.load %arg9[%c0_27, %c2, %c0_28] : memref<2x8x256xf32, #tpu.memory_space<vmem>>, vector<1x1x64xf32>
    %30 = vector.shape_cast %29 : vector<1x1x64xf32> to vector<1x64xf32>
    %c0_29 = arith.constant 0 : index
    %c3 = arith.constant 3 : index
    %c0_30 = arith.constant 0 : index
    %31 = vector.load %arg9[%c0_29, %c3, %c0_30] : memref<2x8x256xf32, #tpu.memory_space<vmem>>, vector<1x1x64xf32>
    %32 = vector.shape_cast %31 : vector<1x1x64xf32> to vector<1x64xf32>
    %c0_31 = arith.constant 0 : index
    %c4 = arith.constant 4 : index
    %c0_32 = arith.constant 0 : index
    %33 = vector.load %arg9[%c0_31, %c4, %c0_32] : memref<2x8x256xf32, #tpu.memory_space<vmem>>, vector<1x1x192xf32>
    %34 = vector.shape_cast %33 : vector<1x1x192xf32> to vector<1x192xf32>
    %c0_33 = arith.constant 0 : index
    %c5 = arith.constant 5 : index
    %c0_34 = arith.constant 0 : index
    %35 = vector.load %arg9[%c0_33, %c5, %c0_34] : memref<2x8x256xf32, #tpu.memory_space<vmem>>, vector<1x1x64xf32>
    %36 = vector.shape_cast %35 : vector<1x1x64xf32> to vector<1x64xf32>
    %c0_35 = arith.constant 0 : index
    %c6 = arith.constant 6 : index
    %c0_36 = arith.constant 0 : index
    %37 = vector.load %arg9[%c0_35, %c6, %c0_36] : memref<2x8x256xf32, #tpu.memory_space<vmem>>, vector<1x1x256xf32>
    %38 = vector.shape_cast %37 : vector<1x1x256xf32> to vector<1x256xf32>
    %c0_37 = arith.constant 0 : index
    %c7 = arith.constant 7 : index
    %c0_38 = arith.constant 0 : index
    %39 = vector.load %arg9[%c0_37, %c7, %c0_38] : memref<2x8x256xf32, #tpu.memory_space<vmem>>, vector<1x1x64xf32>
    %40 = vector.shape_cast %39 : vector<1x1x64xf32> to vector<1x64xf32>
    %cst_39 = arith.constant dense<0.000000e+00> : vector<16xf32>
    %41 = vector.multi_reduction <add>, %16, %cst_39 [1] : vector<16x64xf32> to vector<16xf32>
    %42 = vector.shape_cast %41 : vector<16xf32> to vector<16x1xf32>
    %cst_40 = arith.constant 6.400000e+01 : f32
    %43 = vector.broadcast %cst_40 : f32 to vector<16x1xf32>
    %44 = arith.divf %42, %43 : vector<16x1xf32>
    %45 = vector.broadcast %44 : vector<16x1xf32> to vector<16x64xf32>
    %46 = arith.subf %16, %45 : vector<16x64xf32>
    %47 = arith.mulf %46, %46 : vector<16x64xf32>
    %cst_41 = arith.constant dense<0.000000e+00> : vector<16xf32>
    %48 = vector.multi_reduction <add>, %47, %cst_41 [1] : vector<16x64xf32> to vector<16xf32>
    %49 = vector.shape_cast %48 : vector<16xf32> to vector<16x1xf32>
    %cst_42 = arith.constant 6.400000e+01 : f32
    %50 = vector.broadcast %cst_42 : f32 to vector<16x1xf32>
    %51 = arith.divf %49, %50 : vector<16x1xf32>
    %52 = vector.broadcast %44 : vector<16x1xf32> to vector<16x64xf32>
    %53 = arith.subf %16, %52 : vector<16x64xf32>
    %cst_43 = arith.constant 9.99999997E-7 : f32
    %54 = vector.broadcast %cst_43 : f32 to vector<16x1xf32>
    %55 = arith.addf %51, %54 : vector<16x1xf32>
    %56 = math.rsqrt %55 : vector<16x1xf32>
    %57 = vector.broadcast %56 : vector<16x1xf32> to vector<16x64xf32>
    %58 = arith.mulf %53, %57 : vector<16x64xf32>
    %59 = vector.broadcast %26 : vector<1x64xf32> to vector<16x64xf32>
    %60 = arith.mulf %58, %59 : vector<16x64xf32>
    %61 = vector.broadcast %28 : vector<1x64xf32> to vector<16x64xf32>
    %62 = arith.addf %60, %61 : vector<16x64xf32>
    %c0_44 = arith.constant 0 : index
    %c0_45 = arith.constant 0 : index
    %c0_46 = arith.constant 0 : index
    %63 = vector.load %arg10[%c0_44, %c0_45, %c0_46] : memref<2x64x192xf32, #tpu.memory_space<vmem>>, vector<1x64x192xf32>
    %64 = vector.shape_cast %63 : vector<1x64x192xf32> to vector<64x192xf32>
    %cst_47 = arith.constant dense<0.000000e+00> : vector<16x192xf32>
    %65 = tpu.matmul %62, %64, %cst_47 {dimension_numbers = #tpu.dot_dimension_numbers<[1], [0], [0], [1], [0, 0, 1, 1], [], []>} : vector<16x64xf32>, vector<64x192xf32>, vector<16x192xf32> -> vector<16x192xf32>
    %66 = vector.broadcast %34 : vector<1x192xf32> to vector<16x192xf32>
    %67 = arith.addf %65, %66 : vector<16x192xf32>
    %68 = vector.extract_strided_slice %67 {offsets = [0, 0], sizes = [16, 64], strides = [1, 1]} : vector<16x192xf32> to vector<16x64xf32>
    %69 = vector.extract_strided_slice %67 {offsets = [0, 64], sizes = [16, 64], strides = [1, 1]} : vector<16x192xf32> to vector<16x64xf32>
    %70 = vector.extract_strided_slice %67 {offsets = [0, 128], sizes = [16, 64], strides = [1, 1]} : vector<16x192xf32> to vector<16x64xf32>
    %71 = vector.extract_strided_slice %68 {offsets = [0, 0], sizes = [16, 16], strides = [1, 1]} : vector<16x64xf32> to vector<16x16xf32>
    %72 = vector.extract_strided_slice %69 {offsets = [0, 0], sizes = [16, 16], strides = [1, 1]} : vector<16x64xf32> to vector<16x16xf32>
    %73 = vector.extract_strided_slice %70 {offsets = [0, 0], sizes = [16, 16], strides = [1, 1]} : vector<16x64xf32> to vector<16x16xf32>
    %cst_48 = arith.constant dense<0.000000e+00> : vector<16x16xf32>
    %74 = tpu.matmul %71, %72, %cst_48 {dimension_numbers = #tpu.dot_dimension_numbers<[1], [1], [0], [0], [0, 0, 1, 0], [], []>} : vector<16x16xf32>, vector<16x16xf32>, vector<16x16xf32> -> vector<16x16xf32>
    %75 = arith.addf %74, %24 : vector<16x16xf32>
    %cst_49 = arith.constant dense<0xFF800000> : vector<16xf32>
    %76 = vector.multi_reduction <maximumf>, %75, %cst_49 [1] : vector<16x16xf32> to vector<16xf32>
    %77 = vector.shape_cast %76 : vector<16xf32> to vector<16x1xf32>
    %78 = vector.broadcast %77 : vector<16x1xf32> to vector<16x16xf32>
    %79 = arith.subf %75, %78 : vector<16x16xf32>
    %80 = math.exp %79 : vector<16x16xf32>
    %cst_50 = arith.constant dense<0.000000e+00> : vector<16xf32>
    %81 = vector.multi_reduction <add>, %80, %cst_50 [1] : vector<16x16xf32> to vector<16xf32>
    %82 = vector.shape_cast %81 : vector<16xf32> to vector<16x1xf32>
    %83 = vector.broadcast %82 : vector<16x1xf32> to vector<16x16xf32>
    %84 = arith.divf %80, %83 : vector<16x16xf32>
    %cst_51 = arith.constant dense<0.000000e+00> : vector<16x16xf32>
    %85 = tpu.matmul %84, %73, %cst_51 {dimension_numbers = #tpu.dot_dimension_numbers<[1], [0], [0], [1], [0, 0, 1, 1], [], []>} : vector<16x16xf32>, vector<16x16xf32>, vector<16x16xf32> -> vector<16x16xf32>
    %86 = vector.extract_strided_slice %68 {offsets = [0, 16], sizes = [16, 16], strides = [1, 1]} : vector<16x64xf32> to vector<16x16xf32>
    %87 = vector.extract_strided_slice %69 {offsets = [0, 16], sizes = [16, 16], strides = [1, 1]} : vector<16x64xf32> to vector<16x16xf32>
    %88 = vector.extract_strided_slice %70 {offsets = [0, 16], sizes = [16, 16], strides = [1, 1]} : vector<16x64xf32> to vector<16x16xf32>
    %cst_52 = arith.constant dense<0.000000e+00> : vector<16x16xf32>
    %89 = tpu.matmul %86, %87, %cst_52 {dimension_numbers = #tpu.dot_dimension_numbers<[1], [1], [0], [0], [0, 0, 1, 0], [], []>} : vector<16x16xf32>, vector<16x16xf32>, vector<16x16xf32> -> vector<16x16xf32>
    %90 = arith.addf %89, %24 : vector<16x16xf32>
    %cst_53 = arith.constant dense<0xFF800000> : vector<16xf32>
    %91 = vector.multi_reduction <maximumf>, %90, %cst_53 [1] : vector<16x16xf32> to vector<16xf32>
    %92 = vector.shape_cast %91 : vector<16xf32> to vector<16x1xf32>
    %93 = vector.broadcast %92 : vector<16x1xf32> to vector<16x16xf32>
    %94 = arith.subf %90, %93 : vector<16x16xf32>
    %95 = math.exp %94 : vector<16x16xf32>
    %cst_54 = arith.constant dense<0.000000e+00> : vector<16xf32>
    %96 = vector.multi_reduction <add>, %95, %cst_54 [1] : vector<16x16xf32> to vector<16xf32>
    %97 = vector.shape_cast %96 : vector<16xf32> to vector<16x1xf32>
    %98 = vector.broadcast %97 : vector<16x1xf32> to vector<16x16xf32>
    %99 = arith.divf %95, %98 : vector<16x16xf32>
    %cst_55 = arith.constant dense<0.000000e+00> : vector<16x16xf32>
    %100 = tpu.matmul %99, %88, %cst_55 {dimension_numbers = #tpu.dot_dimension_numbers<[1], [0], [0], [1], [0, 0, 1, 1], [], []>} : vector<16x16xf32>, vector<16x16xf32>, vector<16x16xf32> -> vector<16x16xf32>
    %101 = vector.extract_strided_slice %68 {offsets = [0, 32], sizes = [16, 16], strides = [1, 1]} : vector<16x64xf32> to vector<16x16xf32>
    %102 = vector.extract_strided_slice %69 {offsets = [0, 32], sizes = [16, 16], strides = [1, 1]} : vector<16x64xf32> to vector<16x16xf32>
    %103 = vector.extract_strided_slice %70 {offsets = [0, 32], sizes = [16, 16], strides = [1, 1]} : vector<16x64xf32> to vector<16x16xf32>
    %cst_56 = arith.constant dense<0.000000e+00> : vector<16x16xf32>
    %104 = tpu.matmul %101, %102, %cst_56 {dimension_numbers = #tpu.dot_dimension_numbers<[1], [1], [0], [0], [0, 0, 1, 0], [], []>} : vector<16x16xf32>, vector<16x16xf32>, vector<16x16xf32> -> vector<16x16xf32>
    %105 = arith.addf %104, %24 : vector<16x16xf32>
    %cst_57 = arith.constant dense<0xFF800000> : vector<16xf32>
    %106 = vector.multi_reduction <maximumf>, %105, %cst_57 [1] : vector<16x16xf32> to vector<16xf32>
    %107 = vector.shape_cast %106 : vector<16xf32> to vector<16x1xf32>
    %108 = vector.broadcast %107 : vector<16x1xf32> to vector<16x16xf32>
    %109 = arith.subf %105, %108 : vector<16x16xf32>
    %110 = math.exp %109 : vector<16x16xf32>
    %cst_58 = arith.constant dense<0.000000e+00> : vector<16xf32>
    %111 = vector.multi_reduction <add>, %110, %cst_58 [1] : vector<16x16xf32> to vector<16xf32>
    %112 = vector.shape_cast %111 : vector<16xf32> to vector<16x1xf32>
    %113 = vector.broadcast %112 : vector<16x1xf32> to vector<16x16xf32>
    %114 = arith.divf %110, %113 : vector<16x16xf32>
    %cst_59 = arith.constant dense<0.000000e+00> : vector<16x16xf32>
    %115 = tpu.matmul %114, %103, %cst_59 {dimension_numbers = #tpu.dot_dimension_numbers<[1], [0], [0], [1], [0, 0, 1, 1], [], []>} : vector<16x16xf32>, vector<16x16xf32>, vector<16x16xf32> -> vector<16x16xf32>
    %116 = vector.extract_strided_slice %68 {offsets = [0, 48], sizes = [16, 16], strides = [1, 1]} : vector<16x64xf32> to vector<16x16xf32>
    %117 = vector.extract_strided_slice %69 {offsets = [0, 48], sizes = [16, 16], strides = [1, 1]} : vector<16x64xf32> to vector<16x16xf32>
    %118 = vector.extract_strided_slice %70 {offsets = [0, 48], sizes = [16, 16], strides = [1, 1]} : vector<16x64xf32> to vector<16x16xf32>
    %cst_60 = arith.constant dense<0.000000e+00> : vector<16x16xf32>
    %119 = tpu.matmul %116, %117, %cst_60 {dimension_numbers = #tpu.dot_dimension_numbers<[1], [1], [0], [0], [0, 0, 1, 0], [], []>} : vector<16x16xf32>, vector<16x16xf32>, vector<16x16xf32> -> vector<16x16xf32>
    %120 = arith.addf %119, %24 : vector<16x16xf32>
    %cst_61 = arith.constant dense<0xFF800000> : vector<16xf32>
    %121 = vector.multi_reduction <maximumf>, %120, %cst_61 [1] : vector<16x16xf32> to vector<16xf32>
    %122 = vector.shape_cast %121 : vector<16xf32> to vector<16x1xf32>
    %123 = vector.broadcast %122 : vector<16x1xf32> to vector<16x16xf32>
    %124 = arith.subf %120, %123 : vector<16x16xf32>
    %125 = math.exp %124 : vector<16x16xf32>
    %cst_62 = arith.constant dense<0.000000e+00> : vector<16xf32>
    %126 = vector.multi_reduction <add>, %125, %cst_62 [1] : vector<16x16xf32> to vector<16xf32>
    %127 = vector.shape_cast %126 : vector<16xf32> to vector<16x1xf32>
    %128 = vector.broadcast %127 : vector<16x1xf32> to vector<16x16xf32>
    %129 = arith.divf %125, %128 : vector<16x16xf32>
    %cst_63 = arith.constant dense<0.000000e+00> : vector<16x16xf32>
    %130 = tpu.matmul %129, %118, %cst_63 {dimension_numbers = #tpu.dot_dimension_numbers<[1], [0], [0], [1], [0, 0, 1, 1], [], []>} : vector<16x16xf32>, vector<16x16xf32>, vector<16x16xf32> -> vector<16x16xf32>
    %131 = tpu.concatenate %85, %100, %115, %130 in 1 : vector<16x16xf32>, vector<16x16xf32>, vector<16x16xf32>, vector<16x16xf32> -> vector<16x64xf32>
    %c0_64 = arith.constant 0 : index
    %c0_65 = arith.constant 0 : index
    %c0_66 = arith.constant 0 : index
    %132 = vector.load %arg11[%c0_64, %c0_65, %c0_66] : memref<2x64x64xf32, #tpu.memory_space<vmem>>, vector<1x64x64xf32>
    %133 = vector.shape_cast %132 : vector<1x64x64xf32> to vector<64x64xf32>
    %cst_67 = arith.constant dense<0.000000e+00> : vector<16x64xf32>
    %134 = tpu.matmul %131, %133, %cst_67 {dimension_numbers = #tpu.dot_dimension_numbers<[1], [0], [0], [1], [0, 0, 1, 1], [], []>} : vector<16x64xf32>, vector<64x64xf32>, vector<16x64xf32> -> vector<16x64xf32>
    %135 = arith.addf %16, %134 : vector<16x64xf32>
    %136 = vector.broadcast %36 : vector<1x64xf32> to vector<16x64xf32>
    %137 = arith.addf %135, %136 : vector<16x64xf32>
    %cst_68 = arith.constant dense<0.000000e+00> : vector<16xf32>
    %138 = vector.multi_reduction <add>, %137, %cst_68 [1] : vector<16x64xf32> to vector<16xf32>
    %139 = vector.shape_cast %138 : vector<16xf32> to vector<16x1xf32>
    %cst_69 = arith.constant 6.400000e+01 : f32
    %140 = vector.broadcast %cst_69 : f32 to vector<16x1xf32>
    %141 = arith.divf %139, %140 : vector<16x1xf32>
    %142 = vector.broadcast %141 : vector<16x1xf32> to vector<16x64xf32>
    %143 = arith.subf %137, %142 : vector<16x64xf32>
    %144 = arith.mulf %143, %143 : vector<16x64xf32>
    %cst_70 = arith.constant dense<0.000000e+00> : vector<16xf32>
    %145 = vector.multi_reduction <add>, %144, %cst_70 [1] : vector<16x64xf32> to vector<16xf32>
    %146 = vector.shape_cast %145 : vector<16xf32> to vector<16x1xf32>
    %cst_71 = arith.constant 6.400000e+01 : f32
    %147 = vector.broadcast %cst_71 : f32 to vector<16x1xf32>
    %148 = arith.divf %146, %147 : vector<16x1xf32>
    %149 = vector.broadcast %141 : vector<16x1xf32> to vector<16x64xf32>
    %150 = arith.subf %137, %149 : vector<16x64xf32>
    %cst_72 = arith.constant 9.99999997E-7 : f32
    %151 = vector.broadcast %cst_72 : f32 to vector<16x1xf32>
    %152 = arith.addf %148, %151 : vector<16x1xf32>
    %153 = math.rsqrt %152 : vector<16x1xf32>
    %154 = vector.broadcast %153 : vector<16x1xf32> to vector<16x64xf32>
    %155 = arith.mulf %150, %154 : vector<16x64xf32>
    %156 = vector.broadcast %30 : vector<1x64xf32> to vector<16x64xf32>
    %157 = arith.mulf %155, %156 : vector<16x64xf32>
    %158 = vector.broadcast %32 : vector<1x64xf32> to vector<16x64xf32>
    %159 = arith.addf %157, %158 : vector<16x64xf32>
    %c0_73 = arith.constant 0 : index
    %c0_74 = arith.constant 0 : index
    %c0_75 = arith.constant 0 : index
    %160 = vector.load %arg12[%c0_73, %c0_74, %c0_75] : memref<2x64x256xf32, #tpu.memory_space<vmem>>, vector<1x64x256xf32>
    %161 = vector.shape_cast %160 : vector<1x64x256xf32> to vector<64x256xf32>
    %cst_76 = arith.constant dense<0.000000e+00> : vector<16x256xf32>
    %162 = tpu.matmul %159, %161, %cst_76 {dimension_numbers = #tpu.dot_dimension_numbers<[1], [0], [0], [1], [0, 0, 1, 1], [], []>} : vector<16x64xf32>, vector<64x256xf32>, vector<16x256xf32> -> vector<16x256xf32>
    %163 = vector.broadcast %38 : vector<1x256xf32> to vector<16x256xf32>
    %164 = arith.addf %162, %163 : vector<16x256xf32>
    %165 = arith.mulf %164, %164 : vector<16x256xf32>
    %166 = arith.mulf %164, %165 : vector<16x256xf32>
    %cst_77 = arith.constant 4.471500e-02 : f32
    %167 = vector.broadcast %cst_77 : f32 to vector<16x256xf32>
    %168 = arith.mulf %167, %166 : vector<16x256xf32>
    %169 = arith.addf %164, %168 : vector<16x256xf32>
    %cst_78 = arith.constant 0.797884583 : f32
    %170 = vector.broadcast %cst_78 : f32 to vector<16x256xf32>
    %171 = arith.mulf %170, %169 : vector<16x256xf32>
    %172 = math.tanh %171 : vector<16x256xf32>
    %cst_79 = arith.constant 1.000000e+00 : f32
    %173 = vector.broadcast %cst_79 : f32 to vector<16x256xf32>
    %174 = arith.addf %173, %172 : vector<16x256xf32>
    %cst_80 = arith.constant 5.000000e-01 : f32
    %175 = vector.broadcast %cst_80 : f32 to vector<16x256xf32>
    %176 = arith.mulf %175, %174 : vector<16x256xf32>
    %177 = arith.mulf %164, %176 : vector<16x256xf32>
    %c0_81 = arith.constant 0 : index
    %c0_82 = arith.constant 0 : index
    %c0_83 = arith.constant 0 : index
    %178 = vector.load %arg13[%c0_81, %c0_82, %c0_83] : memref<2x256x64xf32, #tpu.memory_space<vmem>>, vector<1x256x64xf32>
    %179 = vector.shape_cast %178 : vector<1x256x64xf32> to vector<256x64xf32>
    %cst_84 = arith.constant dense<0.000000e+00> : vector<16x64xf32>
    %180 = tpu.matmul %177, %179, %cst_84 {dimension_numbers = #tpu.dot_dimension_numbers<[1], [0], [0], [1], [0, 0, 1, 1], [], []>} : vector<16x256xf32>, vector<256x64xf32>, vector<16x64xf32> -> vector<16x64xf32>
    %181 = arith.addf %137, %180 : vector<16x64xf32>
    %182 = vector.broadcast %40 : vector<1x64xf32> to vector<16x64xf32>
    %183 = arith.addf %181, %182 : vector<16x64xf32>
    %c1_85 = arith.constant 1 : index
    %c0_86 = arith.constant 0 : index
    %c0_87 = arith.constant 0 : index
    %184 = vector.load %arg9[%c1_85, %c0_86, %c0_87] : memref<2x8x256xf32, #tpu.memory_space<vmem>>, vector<1x1x64xf32>
    %185 = vector.shape_cast %184 : vector<1x1x64xf32> to vector<1x64xf32>
    %c1_88 = arith.constant 1 : index
    %c1_89 = arith.constant 1 : index
    %c0_90 = arith.constant 0 : index
    %186 = vector.load %arg9[%c1_88, %c1_89, %c0_90] : memref<2x8x256xf32, #tpu.memory_space<vmem>>, vector<1x1x64xf32>
    %187 = vector.shape_cast %186 : vector<1x1x64xf32> to vector<1x64xf32>
    %c1_91 = arith.constant 1 : index
    %c2_92 = arith.constant 2 : index
    %c0_93 = arith.constant 0 : index
    %188 = vector.load %arg9[%c1_91, %c2_92, %c0_93] : memref<2x8x256xf32, #tpu.memory_space<vmem>>, vector<1x1x64xf32>
    %189 = vector.shape_cast %188 : vector<1x1x64xf32> to vector<1x64xf32>
    %c1_94 = arith.constant 1 : index
    %c3_95 = arith.constant 3 : index
    %c0_96 = arith.constant 0 : index
    %190 = vector.load %arg9[%c1_94, %c3_95, %c0_96] : memref<2x8x256xf32, #tpu.memory_space<vmem>>, vector<1x1x64xf32>
    %191 = vector.shape_cast %190 : vector<1x1x64xf32> to vector<1x64xf32>
    %c1_97 = arith.constant 1 : index
    %c4_98 = arith.constant 4 : index
    %c0_99 = arith.constant 0 : index
    %192 = vector.load %arg9[%c1_97, %c4_98, %c0_99] : memref<2x8x256xf32, #tpu.memory_space<vmem>>, vector<1x1x192xf32>
    %193 = vector.shape_cast %192 : vector<1x1x192xf32> to vector<1x192xf32>
    %c1_100 = arith.constant 1 : index
    %c5_101 = arith.constant 5 : index
    %c0_102 = arith.constant 0 : index
    %194 = vector.load %arg9[%c1_100, %c5_101, %c0_102] : memref<2x8x256xf32, #tpu.memory_space<vmem>>, vector<1x1x64xf32>
    %195 = vector.shape_cast %194 : vector<1x1x64xf32> to vector<1x64xf32>
    %c1_103 = arith.constant 1 : index
    %c6_104 = arith.constant 6 : index
    %c0_105 = arith.constant 0 : index
    %196 = vector.load %arg9[%c1_103, %c6_104, %c0_105] : memref<2x8x256xf32, #tpu.memory_space<vmem>>, vector<1x1x256xf32>
    %197 = vector.shape_cast %196 : vector<1x1x256xf32> to vector<1x256xf32>
    %c1_106 = arith.constant 1 : index
    %c7_107 = arith.constant 7 : index
    %c0_108 = arith.constant 0 : index
    %198 = vector.load %arg9[%c1_106, %c7_107, %c0_108] : memref<2x8x256xf32, #tpu.memory_space<vmem>>, vector<1x1x64xf32>
    %199 = vector.shape_cast %198 : vector<1x1x64xf32> to vector<1x64xf32>
    %cst_109 = arith.constant dense<0.000000e+00> : vector<16xf32>
    %200 = vector.multi_reduction <add>, %183, %cst_109 [1] : vector<16x64xf32> to vector<16xf32>
    %201 = vector.shape_cast %200 : vector<16xf32> to vector<16x1xf32>
    %cst_110 = arith.constant 6.400000e+01 : f32
    %202 = vector.broadcast %cst_110 : f32 to vector<16x1xf32>
    %203 = arith.divf %201, %202 : vector<16x1xf32>
    %204 = vector.broadcast %203 : vector<16x1xf32> to vector<16x64xf32>
    %205 = arith.subf %183, %204 : vector<16x64xf32>
    %206 = arith.mulf %205, %205 : vector<16x64xf32>
    %cst_111 = arith.constant dense<0.000000e+00> : vector<16xf32>
    %207 = vector.multi_reduction <add>, %206, %cst_111 [1] : vector<16x64xf32> to vector<16xf32>
    %208 = vector.shape_cast %207 : vector<16xf32> to vector<16x1xf32>
    %cst_112 = arith.constant 6.400000e+01 : f32
    %209 = vector.broadcast %cst_112 : f32 to vector<16x1xf32>
    %210 = arith.divf %208, %209 : vector<16x1xf32>
    %211 = vector.broadcast %203 : vector<16x1xf32> to vector<16x64xf32>
    %212 = arith.subf %183, %211 : vector<16x64xf32>
    %cst_113 = arith.constant 9.99999997E-7 : f32
    %213 = vector.broadcast %cst_113 : f32 to vector<16x1xf32>
    %214 = arith.addf %210, %213 : vector<16x1xf32>
    %215 = math.rsqrt %214 : vector<16x1xf32>
    %216 = vector.broadcast %215 : vector<16x1xf32> to vector<16x64xf32>
    %217 = arith.mulf %212, %216 : vector<16x64xf32>
    %218 = vector.broadcast %185 : vector<1x64xf32> to vector<16x64xf32>
    %219 = arith.mulf %217, %218 : vector<16x64xf32>
    %220 = vector.broadcast %187 : vector<1x64xf32> to vector<16x64xf32>
    %221 = arith.addf %219, %220 : vector<16x64xf32>
    %c1_114 = arith.constant 1 : index
    %c0_115 = arith.constant 0 : index
    %c0_116 = arith.constant 0 : index
    %222 = vector.load %arg10[%c1_114, %c0_115, %c0_116] : memref<2x64x192xf32, #tpu.memory_space<vmem>>, vector<1x64x192xf32>
    %223 = vector.shape_cast %222 : vector<1x64x192xf32> to vector<64x192xf32>
    %cst_117 = arith.constant dense<0.000000e+00> : vector<16x192xf32>
    %224 = tpu.matmul %221, %223, %cst_117 {dimension_numbers = #tpu.dot_dimension_numbers<[1], [0], [0], [1], [0, 0, 1, 1], [], []>} : vector<16x64xf32>, vector<64x192xf32>, vector<16x192xf32> -> vector<16x192xf32>
    %225 = vector.broadcast %193 : vector<1x192xf32> to vector<16x192xf32>
    %226 = arith.addf %224, %225 : vector<16x192xf32>
    %227 = vector.extract_strided_slice %226 {offsets = [0, 0], sizes = [16, 64], strides = [1, 1]} : vector<16x192xf32> to vector<16x64xf32>
    %228 = vector.extract_strided_slice %226 {offsets = [0, 64], sizes = [16, 64], strides = [1, 1]} : vector<16x192xf32> to vector<16x64xf32>
    %229 = vector.extract_strided_slice %226 {offsets = [0, 128], sizes = [16, 64], strides = [1, 1]} : vector<16x192xf32> to vector<16x64xf32>
    %230 = vector.extract_strided_slice %227 {offsets = [0, 0], sizes = [16, 16], strides = [1, 1]} : vector<16x64xf32> to vector<16x16xf32>
    %231 = vector.extract_strided_slice %228 {offsets = [0, 0], sizes = [16, 16], strides = [1, 1]} : vector<16x64xf32> to vector<16x16xf32>
    %232 = vector.extract_strided_slice %229 {offsets = [0, 0], sizes = [16, 16], strides = [1, 1]} : vector<16x64xf32> to vector<16x16xf32>
    %cst_118 = arith.constant dense<0.000000e+00> : vector<16x16xf32>
    %233 = tpu.matmul %230, %231, %cst_118 {dimension_numbers = #tpu.dot_dimension_numbers<[1], [1], [0], [0], [0, 0, 1, 0], [], []>} : vector<16x16xf32>, vector<16x16xf32>, vector<16x16xf32> -> vector<16x16xf32>
    %234 = arith.addf %233, %24 : vector<16x16xf32>
    %cst_119 = arith.constant dense<0xFF800000> : vector<16xf32>
    %235 = vector.multi_reduction <maximumf>, %234, %cst_119 [1] : vector<16x16xf32> to vector<16xf32>
    %236 = vector.shape_cast %235 : vector<16xf32> to vector<16x1xf32>
    %237 = vector.broadcast %236 : vector<16x1xf32> to vector<16x16xf32>
    %238 = arith.subf %234, %237 : vector<16x16xf32>
    %239 = math.exp %238 : vector<16x16xf32>
    %cst_120 = arith.constant dense<0.000000e+00> : vector<16xf32>
    %240 = vector.multi_reduction <add>, %239, %cst_120 [1] : vector<16x16xf32> to vector<16xf32>
    %241 = vector.shape_cast %240 : vector<16xf32> to vector<16x1xf32>
    %242 = vector.broadcast %241 : vector<16x1xf32> to vector<16x16xf32>
    %243 = arith.divf %239, %242 : vector<16x16xf32>
    %cst_121 = arith.constant dense<0.000000e+00> : vector<16x16xf32>
    %244 = tpu.matmul %243, %232, %cst_121 {dimension_numbers = #tpu.dot_dimension_numbers<[1], [0], [0], [1], [0, 0, 1, 1], [], []>} : vector<16x16xf32>, vector<16x16xf32>, vector<16x16xf32> -> vector<16x16xf32>
    %245 = vector.extract_strided_slice %227 {offsets = [0, 16], sizes = [16, 16], strides = [1, 1]} : vector<16x64xf32> to vector<16x16xf32>
    %246 = vector.extract_strided_slice %228 {offsets = [0, 16], sizes = [16, 16], strides = [1, 1]} : vector<16x64xf32> to vector<16x16xf32>
    %247 = vector.extract_strided_slice %229 {offsets = [0, 16], sizes = [16, 16], strides = [1, 1]} : vector<16x64xf32> to vector<16x16xf32>
    %cst_122 = arith.constant dense<0.000000e+00> : vector<16x16xf32>
    %248 = tpu.matmul %245, %246, %cst_122 {dimension_numbers = #tpu.dot_dimension_numbers<[1], [1], [0], [0], [0, 0, 1, 0], [], []>} : vector<16x16xf32>, vector<16x16xf32>, vector<16x16xf32> -> vector<16x16xf32>
    %249 = arith.addf %248, %24 : vector<16x16xf32>
    %cst_123 = arith.constant dense<0xFF800000> : vector<16xf32>
    %250 = vector.multi_reduction <maximumf>, %249, %cst_123 [1] : vector<16x16xf32> to vector<16xf32>
    %251 = vector.shape_cast %250 : vector<16xf32> to vector<16x1xf32>
    %252 = vector.broadcast %251 : vector<16x1xf32> to vector<16x16xf32>
    %253 = arith.subf %249, %252 : vector<16x16xf32>
    %254 = math.exp %253 : vector<16x16xf32>
    %cst_124 = arith.constant dense<0.000000e+00> : vector<16xf32>
    %255 = vector.multi_reduction <add>, %254, %cst_124 [1] : vector<16x16xf32> to vector<16xf32>
    %256 = vector.shape_cast %255 : vector<16xf32> to vector<16x1xf32>
    %257 = vector.broadcast %256 : vector<16x1xf32> to vector<16x16xf32>
    %258 = arith.divf %254, %257 : vector<16x16xf32>
    %cst_125 = arith.constant dense<0.000000e+00> : vector<16x16xf32>
    %259 = tpu.matmul %258, %247, %cst_125 {dimension_numbers = #tpu.dot_dimension_numbers<[1], [0], [0], [1], [0, 0, 1, 1], [], []>} : vector<16x16xf32>, vector<16x16xf32>, vector<16x16xf32> -> vector<16x16xf32>
    %260 = vector.extract_strided_slice %227 {offsets = [0, 32], sizes = [16, 16], strides = [1, 1]} : vector<16x64xf32> to vector<16x16xf32>
    %261 = vector.extract_strided_slice %228 {offsets = [0, 32], sizes = [16, 16], strides = [1, 1]} : vector<16x64xf32> to vector<16x16xf32>
    %262 = vector.extract_strided_slice %229 {offsets = [0, 32], sizes = [16, 16], strides = [1, 1]} : vector<16x64xf32> to vector<16x16xf32>
    %cst_126 = arith.constant dense<0.000000e+00> : vector<16x16xf32>
    %263 = tpu.matmul %260, %261, %cst_126 {dimension_numbers = #tpu.dot_dimension_numbers<[1], [1], [0], [0], [0, 0, 1, 0], [], []>} : vector<16x16xf32>, vector<16x16xf32>, vector<16x16xf32> -> vector<16x16xf32>
    %264 = arith.addf %263, %24 : vector<16x16xf32>
    %cst_127 = arith.constant dense<0xFF800000> : vector<16xf32>
    %265 = vector.multi_reduction <maximumf>, %264, %cst_127 [1] : vector<16x16xf32> to vector<16xf32>
    %266 = vector.shape_cast %265 : vector<16xf32> to vector<16x1xf32>
    %267 = vector.broadcast %266 : vector<16x1xf32> to vector<16x16xf32>
    %268 = arith.subf %264, %267 : vector<16x16xf32>
    %269 = math.exp %268 : vector<16x16xf32>
    %cst_128 = arith.constant dense<0.000000e+00> : vector<16xf32>
    %270 = vector.multi_reduction <add>, %269, %cst_128 [1] : vector<16x16xf32> to vector<16xf32>
    %271 = vector.shape_cast %270 : vector<16xf32> to vector<16x1xf32>
    %272 = vector.broadcast %271 : vector<16x1xf32> to vector<16x16xf32>
    %273 = arith.divf %269, %272 : vector<16x16xf32>
    %cst_129 = arith.constant dense<0.000000e+00> : vector<16x16xf32>
    %274 = tpu.matmul %273, %262, %cst_129 {dimension_numbers = #tpu.dot_dimension_numbers<[1], [0], [0], [1], [0, 0, 1, 1], [], []>} : vector<16x16xf32>, vector<16x16xf32>, vector<16x16xf32> -> vector<16x16xf32>
    %275 = vector.extract_strided_slice %227 {offsets = [0, 48], sizes = [16, 16], strides = [1, 1]} : vector<16x64xf32> to vector<16x16xf32>
    %276 = vector.extract_strided_slice %228 {offsets = [0, 48], sizes = [16, 16], strides = [1, 1]} : vector<16x64xf32> to vector<16x16xf32>
    %277 = vector.extract_strided_slice %229 {offsets = [0, 48], sizes = [16, 16], strides = [1, 1]} : vector<16x64xf32> to vector<16x16xf32>
    %cst_130 = arith.constant dense<0.000000e+00> : vector<16x16xf32>
    %278 = tpu.matmul %275, %276, %cst_130 {dimension_numbers = #tpu.dot_dimension_numbers<[1], [1], [0], [0], [0, 0, 1, 0], [], []>} : vector<16x16xf32>, vector<16x16xf32>, vector<16x16xf32> -> vector<16x16xf32>
    %279 = arith.addf %278, %24 : vector<16x16xf32>
    %cst_131 = arith.constant dense<0xFF800000> : vector<16xf32>
    %280 = vector.multi_reduction <maximumf>, %279, %cst_131 [1] : vector<16x16xf32> to vector<16xf32>
    %281 = vector.shape_cast %280 : vector<16xf32> to vector<16x1xf32>
    %282 = vector.broadcast %281 : vector<16x1xf32> to vector<16x16xf32>
    %283 = arith.subf %279, %282 : vector<16x16xf32>
    %284 = math.exp %283 : vector<16x16xf32>
    %cst_132 = arith.constant dense<0.000000e+00> : vector<16xf32>
    %285 = vector.multi_reduction <add>, %284, %cst_132 [1] : vector<16x16xf32> to vector<16xf32>
    %286 = vector.shape_cast %285 : vector<16xf32> to vector<16x1xf32>
    %287 = vector.broadcast %286 : vector<16x1xf32> to vector<16x16xf32>
    %288 = arith.divf %284, %287 : vector<16x16xf32>
    %cst_133 = arith.constant dense<0.000000e+00> : vector<16x16xf32>
    %289 = tpu.matmul %288, %277, %cst_133 {dimension_numbers = #tpu.dot_dimension_numbers<[1], [0], [0], [1], [0, 0, 1, 1], [], []>} : vector<16x16xf32>, vector<16x16xf32>, vector<16x16xf32> -> vector<16x16xf32>
    %290 = tpu.concatenate %244, %259, %274, %289 in 1 : vector<16x16xf32>, vector<16x16xf32>, vector<16x16xf32>, vector<16x16xf32> -> vector<16x64xf32>
    %c1_134 = arith.constant 1 : index
    %c0_135 = arith.constant 0 : index
    %c0_136 = arith.constant 0 : index
    %291 = vector.load %arg11[%c1_134, %c0_135, %c0_136] : memref<2x64x64xf32, #tpu.memory_space<vmem>>, vector<1x64x64xf32>
    %292 = vector.shape_cast %291 : vector<1x64x64xf32> to vector<64x64xf32>
    %cst_137 = arith.constant dense<0.000000e+00> : vector<16x64xf32>
    %293 = tpu.matmul %290, %292, %cst_137 {dimension_numbers = #tpu.dot_dimension_numbers<[1], [0], [0], [1], [0, 0, 1, 1], [], []>} : vector<16x64xf32>, vector<64x64xf32>, vector<16x64xf32> -> vector<16x64xf32>
    %294 = arith.addf %183, %293 : vector<16x64xf32>
    %295 = vector.broadcast %195 : vector<1x64xf32> to vector<16x64xf32>
    %296 = arith.addf %294, %295 : vector<16x64xf32>
    %cst_138 = arith.constant dense<0.000000e+00> : vector<16xf32>
    %297 = vector.multi_reduction <add>, %296, %cst_138 [1] : vector<16x64xf32> to vector<16xf32>
    %298 = vector.shape_cast %297 : vector<16xf32> to vector<16x1xf32>
    %cst_139 = arith.constant 6.400000e+01 : f32
    %299 = vector.broadcast %cst_139 : f32 to vector<16x1xf32>
    %300 = arith.divf %298, %299 : vector<16x1xf32>
    %301 = vector.broadcast %300 : vector<16x1xf32> to vector<16x64xf32>
    %302 = arith.subf %296, %301 : vector<16x64xf32>
    %303 = arith.mulf %302, %302 : vector<16x64xf32>
    %cst_140 = arith.constant dense<0.000000e+00> : vector<16xf32>
    %304 = vector.multi_reduction <add>, %303, %cst_140 [1] : vector<16x64xf32> to vector<16xf32>
    %305 = vector.shape_cast %304 : vector<16xf32> to vector<16x1xf32>
    %cst_141 = arith.constant 6.400000e+01 : f32
    %306 = vector.broadcast %cst_141 : f32 to vector<16x1xf32>
    %307 = arith.divf %305, %306 : vector<16x1xf32>
    %308 = vector.broadcast %300 : vector<16x1xf32> to vector<16x64xf32>
    %309 = arith.subf %296, %308 : vector<16x64xf32>
    %cst_142 = arith.constant 9.99999997E-7 : f32
    %310 = vector.broadcast %cst_142 : f32 to vector<16x1xf32>
    %311 = arith.addf %307, %310 : vector<16x1xf32>
    %312 = math.rsqrt %311 : vector<16x1xf32>
    %313 = vector.broadcast %312 : vector<16x1xf32> to vector<16x64xf32>
    %314 = arith.mulf %309, %313 : vector<16x64xf32>
    %315 = vector.broadcast %189 : vector<1x64xf32> to vector<16x64xf32>
    %316 = arith.mulf %314, %315 : vector<16x64xf32>
    %317 = vector.broadcast %191 : vector<1x64xf32> to vector<16x64xf32>
    %318 = arith.addf %316, %317 : vector<16x64xf32>
    %c1_143 = arith.constant 1 : index
    %c0_144 = arith.constant 0 : index
    %c0_145 = arith.constant 0 : index
    %319 = vector.load %arg12[%c1_143, %c0_144, %c0_145] : memref<2x64x256xf32, #tpu.memory_space<vmem>>, vector<1x64x256xf32>
    %320 = vector.shape_cast %319 : vector<1x64x256xf32> to vector<64x256xf32>
    %cst_146 = arith.constant dense<0.000000e+00> : vector<16x256xf32>
    %321 = tpu.matmul %318, %320, %cst_146 {dimension_numbers = #tpu.dot_dimension_numbers<[1], [0], [0], [1], [0, 0, 1, 1], [], []>} : vector<16x64xf32>, vector<64x256xf32>, vector<16x256xf32> -> vector<16x256xf32>
    %322 = vector.broadcast %197 : vector<1x256xf32> to vector<16x256xf32>
    %323 = arith.addf %321, %322 : vector<16x256xf32>
    %324 = arith.mulf %323, %323 : vector<16x256xf32>
    %325 = arith.mulf %323, %324 : vector<16x256xf32>
    %cst_147 = arith.constant 4.471500e-02 : f32
    %326 = vector.broadcast %cst_147 : f32 to vector<16x256xf32>
    %327 = arith.mulf %326, %325 : vector<16x256xf32>
    %328 = arith.addf %323, %327 : vector<16x256xf32>
    %cst_148 = arith.constant 0.797884583 : f32
    %329 = vector.broadcast %cst_148 : f32 to vector<16x256xf32>
    %330 = arith.mulf %329, %328 : vector<16x256xf32>
    %331 = math.tanh %330 : vector<16x256xf32>
    %cst_149 = arith.constant 1.000000e+00 : f32
    %332 = vector.broadcast %cst_149 : f32 to vector<16x256xf32>
    %333 = arith.addf %332, %331 : vector<16x256xf32>
    %cst_150 = arith.constant 5.000000e-01 : f32
    %334 = vector.broadcast %cst_150 : f32 to vector<16x256xf32>
    %335 = arith.mulf %334, %333 : vector<16x256xf32>
    %336 = arith.mulf %323, %335 : vector<16x256xf32>
    %c1_151 = arith.constant 1 : index
    %c0_152 = arith.constant 0 : index
    %c0_153 = arith.constant 0 : index
    %337 = vector.load %arg13[%c1_151, %c0_152, %c0_153] : memref<2x256x64xf32, #tpu.memory_space<vmem>>, vector<1x256x64xf32>
    %338 = vector.shape_cast %337 : vector<1x256x64xf32> to vector<256x64xf32>
    %cst_154 = arith.constant dense<0.000000e+00> : vector<16x64xf32>
    %339 = tpu.matmul %336, %338, %cst_154 {dimension_numbers = #tpu.dot_dimension_numbers<[1], [0], [0], [1], [0, 0, 1, 1], [], []>} : vector<16x256xf32>, vector<256x64xf32>, vector<16x64xf32> -> vector<16x64xf32>
    %340 = arith.addf %296, %339 : vector<16x64xf32>
    %341 = vector.broadcast %199 : vector<1x64xf32> to vector<16x64xf32>
    %342 = arith.addf %340, %341 : vector<16x64xf32>
    %c0_155 = arith.constant 0 : index
    %c0_156 = arith.constant 0 : index
    %343 = vector.load %arg14[%c0_155, %c0_156] : memref<16x64xf32, #tpu.memory_space<vmem>>, vector<16x64xf32>
    tpu.vector_store %arg14[%c0_155, %c0_156], %342 {strides = array<i32>} : memref<16x64xf32, #tpu.memory_space<vmem>>, vector<16x64xf32>,
    return
  }
}

</mosaic_0001>

<bundles_post_ra>
// kernel: encoder_forward.1
= control target key start
LH: loop header
LB: loop body
LE: loop exit
PB: predicated region body
PF: predicated region fallthrough
CT: control target
= control target key end

     0   :  { %vm58_vm0 = vcmask 1046528   ;;  %vm51_vm1 = vcmask 56320   ;;  %s4385_s0 = inlined_call_operand.vmem [shape: f32[16,4], index: 0, kind: input, shape index: {}]   ;;  %s4386_s1 = inlined_call_operand.vmem [shape: f32[16,7], index: 1, kind: input, shape index: {}]   ;;  %s4387_s2 = inlined_call_operand.vmem [shape: f32[16,1], index: 2, kind: input, shape index: {}]   ;;  %s4388_s3 = inlined_call_operand.vmem [shape: f32[1,16], index: 3, kind: input, shape index: {}]   ;;  %s4389_s4 = inlined_call_operand.vmem [shape: f32[7,72], index: 4, kind: input, shape index: {}]   ;;  %s4390_s5 = inlined_call_operand.vmem [shape: f32[4,64], index: 5, kind: input, shape index: {}]   ;;  %s4391_s6 = inlined_call_operand.vmem [shape: f32[72,64], index: 6, kind: input, shape index: {}]   ;;  %s4392_s7 = inlined_call_operand.vmem [shape: f32[72,64], index: 7, kind: input, shape index: {}]   ;;  %s4393_s8 = inlined_call_operand.vmem [shape: f32[1,64], index: 8, kind: input, shape index: {}]   ;;  %s4394_s9 = inlined_call_operand.vmem [shape: f32[2,8,256], index: 9, kind: input, shape index: {}]   ;;  %s4395_s10 = inlined_call_operand.vmem [shape: f32[2,64,192], index: 10, kind: input, shape index: {}]   ;;  %s4396_s11 = inlined_call_operand.vmem [shape: f32[2,64,64], index: 11, kind: input, shape index: {}]   ;;  %s4397_s12 = inlined_call_operand.vmem [shape: f32[2,64,256], index: 12, kind: input, shape index: {}]   ;;  %s4398_s13 = inlined_call_operand.vmem [shape: f32[2,256,64], index: 13, kind: input, shape index: {}]   ;;  %s4399_s14 = inlined_call_operand.hbm [shape: f32[16,64], index: 14, kind: output, shape index: {}]  }
   0x1   :  { %v50_v0 = vld [vmem:[%s4389_s4] sm:$0x7f] }
   0x2   :  { %v48_v1 = vld [vmem:[%s4386_s1] sm:$0xff]  ;;  %2729 = vmatpush.msk.msra.mxu0 %vm58_vm0, %v50_v0 }
   0x3   :  { %19 = vsyncpa [#allocation3], 0  ;;  %2730 = vmatmul.msk.f32.vlgmr.msra.gmra.mxu0 %vm51_vm1, %v48_v1  ;;  %v49_v2 = vld [vmem:[%s4386_s1 + $0x8] sm:$0xff]  ;;  %v3079_v3 = vmov 0   ;;  %v3080_v23 = vmov 683565275  }
   0x4   :  { %2921 = vset.pattern.permute.xlu1 %v3079_v3  ;;  %2920 = vset.pattern.permute.xlu2 %v3079_v3  ;;  %v3081_v25 = vmov 2475754826   ;;  %v3082_v27 = vmov 2131351028   ;;  %v3083_v29 = vmov 2102212464  }
   0x5   :  { %2952 = vset.pattern.permute.xlu0 %v3079_v3  ;;  %v3084_v34 = vmov 920167782   ;;  %v3085_v37 = vmov 1326507024   ;;  %s3087_s18 = smov 48   ;;  %s3088_s1 = smov 32  }
   0x6   :  { %s3089_s4 = smov 64   ;;  %s3090_s19 = smov 96  }
   0x7   :  { %s3091_s20 = smov 16   ;;  %s3092_s21 = smov 112  }
   0x8   :  { %s2715_s26 = sshll.u32 %s4399_s14, 4  ;;  %s3097_s27 = smov 8   ;;  %s2716_s26 = int_to_ptr.hbm [resolvable:$true] %s2715_s26 }
   0xb   :  { %2731 = vmatmul.msk.f32.gmra.mxu0 %vm51_vm1, %v49_v2 }
  0x80   :  { %v3185_v4 = vpop.f32.mrf.mxu0 }
  0x81   :  { %v88_v5 = vand.u32 2147483647, %v3185_v4  ;;  %v91_v6 = vand.u32 2139095040, %v3185_v4 }
  0x83   :  { %v92_v7 = vshrl.u32 %v91_v6, 23  ;;  %v95_v8 = vand.u32 8388607, %v88_v5 }
  0x85   :  { %v2732_v9 = vadd.s32 4294967169, %v92_v7  ;;  %v96_v10 = vor.u32 8388608, %v95_v8 }
  0x87   :  { %v98_v11 = vadd.s32 1, %v2732_v9  ;;  %v3193_v13 = vshll.u32 %v96_v10, 8 }
  0x88   :  { %v3191_v12 = vpop.f32.mrf.mxu0 }
  0x89   :  { %vm99_vm2 = vcmp.gt.s32.totalorder %v98_v11, 0  ;;  %v243_v14 = vand.u32 2147483647, %v3191_v12  ;;  %v246_v16 = vand.u32 2139095040, %v3191_v12  ;;  %v137_v20 = vand.u32 65535, %v3193_v13 }
  0x8a   :  { %v100_v15 = vsel %vm99_vm2, %v98_v11, 0  ;;  %v138_v59 = vshrl.u32 %v3193_v13, 16 }
  0x8b   :  { %v102_v17 = vand.u32 31, %v100_v15  ;;  %v101_v18 = vshrl.u32 %v100_v15, 5  ;;  %v247_v21 = vshrl.u32 %v246_v16, 23  ;;  %v250_v22 = vand.u32 8388607, %v243_v14 }
  0x8d   :  { %v103_v19 = vsub.s32 32, %v102_v17  ;;  %v105_v24 = vshll.u32 %v3080_v23, %v102_v17  ;;  %v108_v26 = vshll.u32 %v3081_v25, %v102_v17  ;;  %v111_v28 = vshll.u32 %v3082_v27, %v102_v17 }
  0x8e   :  { %v114_v30 = vshll.u32 %v3083_v29, %v102_v17  ;;  %v117_v35 = vshll.u32 %v3084_v34, %v102_v17  ;;  %vm120_vm3 = vcmp.lt.s32.totalorder %v101_v18, 1  ;;  %vm121_vm4 = vcmp.lt.s32.totalorder %v101_v18, 2 }
  0x8f   :  { %v106_v31 = vshrl.u32 %v3081_v25, %v103_v19  ;;  %v109_v32 = vshrl.u32 %v3082_v27, %v103_v19  ;;  %v112_v33 = vshrl.u32 %v3083_v29, %v103_v19  ;;  %v115_v36 = vshrl.u32 %v3084_v34, %v103_v19 }
  0x90   :  { %v118_v38 = vshrl.u32 %v3085_v37, %v103_v19  ;;  %v2735_v42 = vadd.s32 4294967169, %v247_v21  ;;  %v104_v43 = vshrl.u32 %v3080_v23, %v103_v19  ;;  %vm123_vm5 = vcmp.lt.s32.totalorder %v101_v18, 4 }
  0x91   :  { %v107_v39 = vor.u32 %v106_v31, %v105_v24  ;;  %v110_v40 = vor.u32 %v109_v32, %v108_v26  ;;  %v113_v41 = vor.u32 %v112_v33, %v111_v28  ;;  %v116_v44 = vor.u32 %v115_v36, %v114_v30 }
  0x92   :  { %v119_v45 = vor.u32 %v118_v38, %v117_v35  ;;  %vm122_vm6 = vcmp.lt.s32.totalorder %v101_v18, 3  ;;  %v251_v51 = vor.u32 8388608, %v250_v22  ;;  %v253_v52 = vadd.s32 1, %v2735_v42 }
  0x93   :  { %v125_v46 = vsel %vm123_vm5, %v113_v41, 2102212464  ;;  %v128_v47 = vsel %vm120_vm3, %v107_v39, %v110_v40  ;;  %v132_v48 = vsel %vm120_vm3, %v110_v40, %v113_v41  ;;  %v129_v49 = vsel %vm123_vm5, %v116_v44, 920167782 }
  0x94   :  { %v133_v50 = vsel %vm123_vm5, %v119_v45, 1326507024  ;;  %v124_v53 = vsel %vm120_vm3, %v104_v43, %v107_v39  ;;  %v126_v54 = vsel %vm122_vm6, %v110_v40, %v125_v46  ;;  %v130_v55 = vsel %vm122_vm6, %v113_v41, %v129_v49 }
  0x95   :  { %v134_v56 = vsel %vm122_vm6, %v116_v44, %v133_v50  ;;  %v131_v57 = vsel %vm121_vm4, %v128_v47, %v130_v55  ;;  %vm254_vm7 = vcmp.gt.s32.totalorder %v253_v52, 0  ;;  %v3218_v0 = vsel %vm121_vm4, %v124_v53, %v126_v54 }
  0x96   :  { %v135_v58 = vsel %vm121_vm4, %v132_v48, %v134_v56  ;;  %v161_v62 = vand.u32 65535, %v131_v57  ;;  %v162_v63 = vshrl.u32 %v131_v57, 16  ;;  %v255_v6 = vsel %vm254_vm7, %v253_v52, 0 }
  0x97   :  { %v139_v60 = vand.u32 65535, %v135_v58  ;;  %v140_v61 = vshrl.u32 %v135_v58, 16  ;;  %v3220_v7 = vshll.u32 %v251_v51, 8  ;;  %v257_v30 = vand.u32 31, %v255_v6 }
  0x98   :  { %v164_v10 = vmul.u32 %v162_v63, %v137_v20  ;;  %v165_v11 = vmul.u32 %v161_v62, %v138_v59  ;;  %v163_v17 = vmul.u32 %v161_v62, %v137_v20  ;;  %v166_v19 = vmul.u32 %v162_v63, %v138_v59 }
  0x99   :  { %v142_v1 = vmul.u32 %v140_v61, %v137_v20  ;;  %v143_v2 = vmul.u32 %v139_v60, %v138_v59  ;;  %v141_v8 = vmul.u32 %v139_v60, %v137_v20  ;;  %v144_v9 = vmul.u32 %v140_v61, %v138_v59 }
  0x9a   :  { %v167_v24 = vshll.u32 %v164_v10, 16  ;;  %v168_v26 = vshrl.u32 %v164_v10, 16  ;;  %v169_v28 = vshll.u32 %v165_v11, 16  ;;  %v170_v32 = vshrl.u32 %v165_v11, 16 }
  0x9b   :  { %v145_v15 = vshll.u32 %v142_v1, 16  ;;  %v146_v16 = vshrl.u32 %v142_v1, 16  ;;  %v147_v21 = vshll.u32 %v143_v2, 16  ;;  %v148_v22 = vshrl.u32 %v143_v2, 16 }
  0x9c   :  { %vm171_vm9 = vc.u32 %v163_v17, %v167_v24  ;;  %v173_v33 = vadd.s32 %v167_v24, %v163_v17  ;;  %v3224_v38 = vsub.s32 32, %v257_v30  ;;  %v3227_v40 = vshrl.u32 %v255_v6, 5 }
  0x9d   :  { %vm149_vm8 = vc.u32 %v141_v8, %v145_v15  ;;  %v151_v18 = vadd.s32 %v145_v15, %v141_v8  ;;  %v172_v36 = vsel %vm171_vm9, 1, %v3079_v3  ;;  %v260_v44 = vshll.u32 %v3080_v23, %v257_v30 }
  0x9e   :  { %v150_v31 = vsel %vm149_vm8, 1, %v3079_v3  ;;  %v174_v39 = vadd.s32 %v172_v36, %v166_v19  ;;  %vm175_vm11 = vc.u32 %v173_v33, %v169_v28  ;;  %v3230_v43 = vadd.s32 %v173_v33, %v169_v28 }
  0x9f   :  { %v152_v35 = vadd.s32 %v150_v31, %v144_v9  ;;  %vm153_vm10 = vc.u32 %v151_v18, %v147_v21  ;;  %v176_v42 = vsel %vm175_vm11, 1, %v3079_v3  ;;  %v261_v46 = vshrl.u32 %v3081_v25, %v3224_v38 }
  0xa0   :  { %v154_v20 = vsel %vm153_vm10, 1, %v3079_v3  ;;  %v178_v45 = vadd.s32 %v176_v42, %v174_v39  ;;  %v263_v47 = vshll.u32 %v3081_v25, %v257_v30  ;;  %v264_v48 = vshrl.u32 %v3082_v27, %v3224_v38 }
  0xa1   :  { %v156_v41 = vadd.s32 %v154_v20, %v152_v35  ;;  %v266_v50 = vshll.u32 %v3082_v27, %v257_v30  ;;  %v267_v51 = vshrl.u32 %v3083_v29, %v3224_v38  ;;  %v269_v52 = vshll.u32 %v3083_v29, %v257_v30 }
  0xa2   :  { %v179_v53 = vadd.s32 %v178_v45, %v168_v26  ;;  %v3242_v54 = vor.u32 %v261_v46, %v260_v44  ;;  %v3244_v55 = vor.u32 %v264_v48, %v263_v47  ;;  %v270_v56 = vshrl.u32 %v3084_v34, %v3224_v38 }
  0xa3   :  { %v157_v49 = vadd.s32 %v156_v41, %v146_v16  ;;  %v268_v57 = vor.u32 %v267_v51, %v266_v50  ;;  %v272_v58 = vshll.u32 %v3084_v34, %v257_v30  ;;  %v273_v27 = vshrl.u32 %v3085_v37, %v3224_v38 }
  0xa4   :  { %v180_v59 = vadd.s32 %v179_v53, %v170_v32  ;;  %v271_v60 = vor.u32 %v270_v56, %v269_v52  ;;  %v181_v29 = vmul.u32 %v3193_v13, %v3218_v0  ;;  %vm275_vm13 = vcmp.lt.s32.totalorder %v3227_v40, 1 }
  0xa5   :  { %v3248_v25 = vadd.s32 %v157_v49, %v148_v22  ;;  %v274_v61 = vor.u32 %v273_v27, %v272_v58  ;;  %vm278_vm14 = vcmp.lt.s32.totalorder %v3227_v40, 4  ;;  %v283_v34 = vsel %vm275_vm13, %v3242_v54, %v3244_v55 }
  0xa6   :  { %v184_v62 = vadd.s32 1, %v180_v59  ;;  %v292_v37 = vand.u32 65535, %v3220_v7  ;;  %vm277_vm15 = vcmp.lt.s32.totalorder %v3227_v40, 3  ;;  %v284_v13 = vsel %vm278_vm14, %v271_v60, 920167782 }
  0xa7   :  { %vm183_vm12 = vc.u32 %v3248_v25, %v3230_v43  ;;  %v287_v63 = vsel %vm275_vm13, %v3244_v55, %v268_v57  ;;  %v288_v0 = vsel %vm278_vm14, %v274_v61, 1326507024  ;;  %vm276_vm0 = vcmp.lt.s32.totalorder %v3227_v40, 2 }
  0xa8   :  { %v185_v1 = vsel %vm183_vm12, %v184_v62, %v180_v59  ;;  %v285_v2 = vsel %vm277_vm15, %v268_v57, %v284_v13  ;;  %v289_v6 = vsel %vm277_vm15, %v271_v60, %v288_v0  ;;  %v293_v11 = vshrl.u32 %v3220_v7, 16 }
  0xa9   :  { %v186_v8 = vadd.s32 %v185_v1, %v181_v29  ;;  %v286_v9 = vsel %vm276_vm0, %v283_v34, %v285_v2  ;;  %v290_v10 = vsel %vm276_vm0, %v287_v63, %v289_v6  ;;  %v280_v33 = vsel %vm278_vm14, %v268_v57, 2102212464 }
  0xaa   :  { %v294_v15 = vand.u32 65535, %v290_v10  ;;  %v295_v16 = vshrl.u32 %v290_v10, 16  ;;  %v316_v17 = vand.u32 65535, %v286_v9  ;;  %v317_v19 = vshrl.u32 %v286_v9, 16 }
  0xab   :  { %v187_v21 = vadd.s32 536870912, %v186_v8  ;;  %v259_v58 = vshrl.u32 %v3080_v23, %v3224_v38  ;;  %vm444_vm8 = vcmask 1043456   ;;  %vm437_vm9 = vcmask 31744  }
  0xac   :  { %v297_v22 = vmul.u32 %v295_v16, %v292_v37  ;;  %v298_v24 = vmul.u32 %v294_v15, %v293_v11  ;;  %v319_v18 = vmul.u32 %v317_v19, %v292_v37  ;;  %v320_v28 = vmul.u32 %v316_v17, %v293_v11 }
  0xad   :  { %v3282_v26 = vshrl.u32 %v187_v21, 30  ;;  %v296_v30 = vmul.u32 %v294_v15, %v292_v37  ;;  %v299_v35 = vmul.u32 %v295_v16, %v293_v11  ;;  %v318_v41 = vmul.u32 %v316_v17, %v292_v37  ;;  %v406_v21 = vld [vmem:[%s4391_s6 + $0x40] sm:$0xff] }
  0xae   :  { %v300_v31 = vshll.u32 %v297_v22, 16  ;;  %v322_v36 = vshll.u32 %v319_v18, 16  ;;  %v302_v20 = vshll.u32 %v298_v24, 16  ;;  %v321_v45 = vmul.u32 %v317_v19, %v293_v11  ;;  %421 = vmatpush.msra.mxu1 %v406_v21 }
  0xaf   :  { %v189_v32 = vshll.u32 %v3282_v26, 30  ;;  %v324_v46 = vshll.u32 %v320_v28, 16  ;;  %v301_v52 = vshrl.u32 %v297_v22, 16  ;;  %v303_v27 = vshrl.u32 %v298_v24, 16  ;;  %v786_v24 = vld [vmem:[%s4392_s7 + $0x38] sm:$0xff] }
  0xb0   :  { %vm304_vm1 = vc.u32 %v296_v30, %v300_v31  ;;  %v306_v39 = vadd.s32 %v300_v31, %v296_v30  ;;  %vm326_vm3 = vc.u32 %v318_v41, %v322_v36  ;;  %v328_v48 = vadd.s32 %v322_v36, %v318_v41  ;;  %v785_v30 = vld [vmem:[%s4392_s7 + $0x30] sm:$0xff] }
  0xb1   :  { %v190_v42 = vsub.s32 %v186_v8, %v189_v32  ;;  %v305_v44 = vsel %vm304_vm1, 1, %v3079_v3  ;;  %v327_v51 = vsel %vm326_vm3, 1, %v3079_v3  ;;  %v323_v61 = vshrl.u32 %v319_v18, 16  ;;  %v404_v18 = vld [vmem:[%s4391_s6 + $0x30] sm:$0xff] }
  0xb2   :  { %v307_v47 = vadd.s32 %v305_v44, %v299_v35  ;;  %vm308_vm2 = vc.u32 %v306_v39, %v302_v20  ;;  %v329_v56 = vadd.s32 %v327_v51, %v321_v45  ;;  %vm330_vm5 = vc.u32 %v328_v48, %v324_v46  ;;  %v784_v35 = vld [vmem:[%s4392_s7 + $0x28] sm:$0xff]  ;;  %v87_v20 = vld [vmem:[%s4390_s5] sm:$0xf] }
  0xb3   :  { %vm191_vm4 = vcmp.lt.s32.totalorder %v190_v42, 0  ;;  %v192_v49 = vsub.s32 0, %v190_v42  ;;  %v309_v50 = vsel %vm308_vm2, 1, %v3079_v3  ;;  %v331_v59 = vsel %vm330_vm5, 1, %v3079_v3  ;;  %v85_v39 = vld [vmem:[%s4385_s0] sm:$0xff]  ;;  %2740 = vmatpush.msk.msra.mxu2 %vm444_vm8, %v87_v20 }
  0xb4   :  { %v311_v53 = vadd.s32 %v309_v50, %v307_v47  ;;  %v333_v62 = vadd.s32 %v331_v59, %v329_v56  ;;  %v279_v34 = vsel %vm275_vm13, %v259_v58, %v3242_v54  ;;  %v281_v37 = vsel %vm277_vm15, %v3244_v55, %v280_v33  ;;  %v403_v33 = vld [vmem:[%s4391_s6 + $0x28] sm:$0xff]  ;;  %v783_v44 = vld [vmem:[%s4392_s7 + $0x20] sm:$0xff]  ;;  %v401_v47 = vld [vmem:[%s4391_s6 + $0x18] sm:$0xff]  ;;  %2741 = vmatmul.msk.f32.vlgmr.msra.gmra.mxu2 %vm437_vm9, %v85_v39 }
  0xb5   :  { %v193_v57 = vsel %vm191_vm4, %v192_v49, %v190_v42  ;;  %v325_v0 = vshrl.u32 %v320_v28, 16  ;;  %v3301_v38 = vadd.s32 %v328_v48, %v324_v46  ;;  %v282_v3 = vsel %vm276_vm0, %v279_v34, %v281_v37  ;;  %v782_v48 = vld [vmem:[%s4392_s7 + $0x18] sm:$0xff]  ;;  %v781_v56 = vld [vmem:[%s4392_s7 + $0x10] sm:$0xff]  ;;  %v399_v59 = vld [vmem:[%s4391_s6 + $0x8] sm:$0xff] }
  0xb6   :  { %v194_v60 = vclz %v193_v57  ;;  %v312_v29 = vadd.s32 %v311_v53, %v301_v52  ;;  %v334_v23 = vadd.s32 %v333_v62, %v323_v61  ;;  %v182_v54 = vadd.s32 %v3230_v43, %v3248_v25  ;;  %v787_v43 = vld [vmem:[%s4392_s7 + $0x40] sm:$0xff]  ;;  %v400_v53 = vld [vmem:[%s4391_s6 + $0x10] sm:$0xff]  ;;  %v86_v61 = vld [vmem:[%s4385_s0 + $0x8] sm:$0xff]  ;;  %s3093_s0 = smov 80  }
  0xb7   :  { %v336_v9 = vmul.u32 %v3220_v7, %v282_v3  ;;  %801 = vmatpush.msra.mxu3 %v787_v43  ;;  %v405_v7 = vld [vmem:[%s4391_s6 + $0x38] sm:$0xff]  ;;  %vm90_vm10 = vcmp.lt.s32.totalorder %v3185_v4, 0  ;;  %vm3359_vm12 = vcmp.le.f32.partialorder %v88_v5, 0.7853982  ;;  %v212_v52 = vsub.s32 4, %v3282_v26  ;;  %v779_v37 = vld [vmem:[%s4392_s7] sm:$0xff] }
  0xb8   :  { %v2733_v13 = vadd.s32 4294967294, %v194_v60  ;;  %v3299_v63 = vadd.s32 %v312_v29, %v303_v27  ;;  %v335_v1 = vadd.s32 %v334_v23, %v325_v0  ;;  %422 = vmatpush.msra.mxu1 %v405_v7  ;;  %v780_v60 = vld [vmem:[%s4392_s7 + $0x8] sm:$0xff]  ;;  %v398_v29 = vld [vmem:[%s4391_s6] sm:$0xff]  ;;  %vm245_vm14 = vcmp.lt.s32.totalorder %v3191_v12, 0 }
  0xb9   :  { %802 = vmatpush.msra.mxu3 %v786_v24  ;;  %v213_v62 = vsel %vm90_vm10, %v212_v52, %v3282_v26  ;;  %vm231_vm15 = vweird.f32 %v3185_v4 }
  0xba   :  { %vm2734_vm6 = vcmp.lt.s32.totalorder %v2733_v13, 0  ;;  %vm338_vm7 = vc.u32 %v3299_v63, %v3301_v38  ;;  %v339_v8 = vadd.s32 1, %v335_v1  ;;  %423 = vmatpush.msra.mxu1 %v404_v18  ;;  %v215_v26 = vsel %vm3359_vm12, 0, %v213_v62 }
  0xbb   :  { %v197_v2 = vsel %vm2734_vm6, 0, %v2733_v13  ;;  %803 = vmatpush.msra.mxu3 %v785_v30  ;;  %v615_v7 = vand.u32 3, %v215_v26  ;;  %vm407_vm6 = vcmask 588800  }
  0xbc   :  { %v198_v55 = vsub.s32 32, %v197_v2  ;;  %v202_v6 = vsub.s32 4294967266, %v197_v2  ;;  %v199_v10 = vshll.u32 %v190_v42, %v197_v2  ;;  %v340_v16 = vsel %vm338_vm7, %v339_v8, %v335_v1  ;;  %v402_v42 = vld [vmem:[%s4391_s6 + $0x20] sm:$0xff]  ;;  %424 = vmatpush.msra.mxu1 %v403_v33  ;;  %2742 = vmatmul.msk.f32.gmra.mxu2 %vm437_vm9, %v86_v61 }
  0xbd   :  { %v341_v17 = vadd.s32 %v340_v16, %v336_v9  ;;  %804 = vmatpush.msra.mxu3 %v784_v35  ;;  %v337_v2 = vadd.s32 %v3301_v38, %v3299_v63  ;;  %vm616_vm0 = vcmp.lt.s32.totalorder %v615_v7, 2  ;;  %vm617_vm2 = vcmp.eq.s32.totalorder %v615_v7, 0 }
  0xbe   :  { %v200_v11 = vshrl.u32 %v182_v54, %v198_v55  ;;  %v203_v15 = vadd.s32 127, %v202_v6  ;;  %425 = vmatpush.msra.mxu1 %v402_v42  ;;  %vm620_vm3 = vcmp.eq.s32.totalorder %v615_v7, 2  ;;  %vm3402_vm7 = vcmp.le.f32.partialorder %v243_v14, 0.7853982 }
  0xbf   :  { %v342_v25 = vadd.s32 536870912, %v341_v17  ;;  %805 = vmatpush.msra.mxu3 %v783_v44 }
  0xc0   :  { %v201_v40 = vor.u32 %v200_v11, %v199_v10  ;;  %v204_v19 = vshll.u32 %v203_v15, 23  ;;  %426 = vmatpush.msra.mxu1 %v401_v47 }
  0xc1   :  { %v3325_v28 = vshrl.u32 %v342_v25, 30  ;;  %806 = vmatpush.msra.mxu3 %v782_v48 }
  0xc2   :  { %v205_v22 = vor.u32 4788187, %v204_v19  ;;  %v208_v32 = vcvt.s32.f32 %v201_v40  ;;  %427 = vmatpush.msra.mxu1 %v400_v53 }
  0xc3   :  { %v344_v36 = vshll.u32 %v3325_v28, 30  ;;  %807 = vmatpush.msra.mxu3 %v781_v56  ;;  %v367_v47 = vsub.s32 4, %v3325_v28 }
  0xc4   :  { %v206_v31 = vand.u32 2147483647, %v205_v22  ;;  %428 = vmatpush.msra.mxu1 %v399_v59 }
  0xc5   :  { %v345_v45 = vsub.s32 %v341_v17, %v344_v36  ;;  %808 = vmatpush.msra.mxu3 %v780_v60  ;;  %v232_v17 = vadd.s32 3, %v215_v26  ;;  %v368_v53 = vsel %vm245_vm14, %v367_v47, %v3325_v28 }
  0xc6   :  { %v209_v41 = vmul.f32 %v208_v32, %v206_v31  ;;  %429 = vmatpush.msra.mxu1 %v398_v29 }
  0xc7   :  { %vm346_vm11 = vcmp.lt.s32.totalorder %v345_v45, 0  ;;  %v347_v49 = vsub.s32 0, %v345_v45  ;;  %809 = vmatpush.msra.mxu3 %v779_v37  ;;  %v233_v18 = vand.u32 3, %v232_v17 }
  0xc8   :  { %v210_v46 = vxor.u32 2147483648, %v209_v41 }
  0xc9   :  { %v348_v57 = vsel %vm346_vm11, %v347_v49, %v345_v45  ;;  %vm234_vm1 = vcmp.lt.s32.totalorder %v233_v18, 2  ;;  %vm235_vm4 = vcmp.eq.s32.totalorder %v233_v18, 0  ;;  %vm238_vm5 = vcmp.eq.s32.totalorder %v233_v18, 2 }
  0xca   :  { %v211_v51 = vsel %vm90_vm10, %v210_v46, %v209_v41  ;;  %v349_v27 = vclz %v348_v57  ;;  %v370_v57 = vsel %vm3402_vm7, 0, %v368_v53  ;;  %v3086_v18 = vmov 64.0   ;;  %v919_v53 = vld [vmem:[%s4395_s10 + $0x40] sm:$0xff] }
  0xcb   :  { %v214_v5 = vsel %vm3359_vm12, %v3185_v4, %v211_v51  ;;  %v387_v60 = vadd.s32 3, %v370_v57  ;;  %v769_v37 = vand.u32 3, %v370_v57  ;;  %2955 = vrcp.f32 %v3086_v18  ;;  %v913_v57 = vld [vmem:[%s4395_s10 + $0x10] sm:$0xff] }
  0xcc   :  { %v216_v58 = vmul.f32 %v214_v5, %v214_v5  ;;  %v2736_v34 = vadd.s32 4294967294, %v349_v27 }
  0xcd   :  { %vm770_vm8 = vcmp.lt.s32.totalorder %v769_v37, 2  ;;  %vm771_vm9 = vcmp.eq.s32.totalorder %v769_v37, 0 }
  0xce   :  { %v217_v13 = vmul.f32 -0.001358992, %v216_v58  ;;  %v224_v0 = vmul.f32 -0.00019511016, %v216_v58  ;;  %vm2737_vm13 = vcmp.lt.s32.totalorder %v2736_v34, 0 }
  0xcf   :  { %v352_v1 = vsel %vm2737_vm13, 0, %v2736_v34  ;;  %vm774_vm13 = vcmp.eq.s32.totalorder %v769_v37, 2 }
  0xd0   :  { %v218_v23 = vadd.f32 0.041655596, %v217_v13  ;;  %v225_v3 = vadd.f32 0.008332121, %v224_v0  ;;  %v353_v54 = vsub.s32 32, %v352_v1  ;;  %v357_v55 = vsub.s32 4294967266, %v352_v1 }
  0xd1   :  { %v354_v9 = vshll.u32 %v345_v45, %v352_v1  ;;  %v388_v13 = vand.u32 3, %v387_v60  ;;  %v924_v60 = vld [vmem:[%s4395_s10 + $0x68] sm:$0xff] }
  0xd2   :  { %v219_v6 = vmul.f32 %v218_v23, %v216_v58  ;;  %v226_v8 = vmul.f32 %v225_v3, %v216_v58  ;;  %v355_v10 = vshrl.u32 %v337_v2, %v353_v54  ;;  %v358_v11 = vadd.s32 127, %v357_v55 }
  0xd3   :  { %vm389_vm10 = vcmp.lt.s32.totalorder %v388_v13, 2  ;;  %vm390_vm11 = vcmp.eq.s32.totalorder %v388_v13, 0  ;;  %vm393_vm12 = vcmp.eq.s32.totalorder %v388_v13, 2  ;;  %v918_v13 = vld [vmem:[%s4395_s10 + $0x38] sm:$0xff] }
  0xd4   :  { %v220_v15 = vadd.f32 -0.4999988, %v219_v6  ;;  %v227_v16 = vadd.f32 -0.16666654, %v226_v8  ;;  %v356_v40 = vor.u32 %v355_v10, %v354_v9  ;;  %v359_v19 = vshll.u32 %v358_v11, 23 }
  0xd6   :  { %v221_v21 = vmul.f32 %v220_v15, %v216_v58  ;;  %v228_v43 = vmul.f32 %v227_v16, %v216_v58  ;;  %v360_v25 = vor.u32 4788187, %v359_v19  ;;  %v363_v38 = vcvt.s32.f32 %v356_v40  ;;  %v2953_v15 = vld [vmem:[%s4393_s8] ss:$0 sm:$0xff] }
  0xd8   :  { %v222_v22 = vadd.f32 1.0, %v221_v21  ;;  %v229_v24 = vadd.f32 1.0, %v228_v43  ;;  %v361_v63 = vand.u32 2147483647, %v360_v25 }
  0xda   :  { %v230_v30 = vmul.f32 %v229_v24, %v214_v5  ;;  %v239_v31 = vxor.u32 2147483648, %v222_v22  ;;  %v364_v32 = vmul.f32 %v363_v38, %v361_v63  ;;  %v2956_v63 = vpop.eup %2955 }
  0xdb   :  { %v863_v38 = vmul.f32 64.0, %v2956_v63 }
  0xdc   :  { %v236_v33 = vxor.u32 2147483648, %v230_v30  ;;  %v365_v35 = vxor.u32 2147483648, %v364_v32  ;;  %v240_v20 = vsel %vm238_vm5, %v239_v31, %v230_v30  ;;  %v622_v41 = vsel %vm620_vm3, %v239_v31, %v230_v30 }
  0xdd   :  { %v864_v30 = vsub.f32 1.0, %v863_v38 }
  0xde   :  { %v237_v36 = vsel %vm235_vm4, %v222_v22, %v236_v33  ;;  %v619_v39 = vsel %vm617_vm2, %v222_v22, %v236_v33  ;;  %v366_v44 = vsel %vm245_vm14, %v365_v35, %v364_v32  ;;  %vm386_vm14 = vweird.f32 %v3191_v12 }
  0xdf   :  { %v241_v45 = vsel %vm234_vm1, %v237_v36, %v240_v20  ;;  %v623_v46 = vsel %vm616_vm0, %v619_v39, %v622_v41  ;;  %v369_v48 = vsel %vm3402_vm7, %v3191_v12, %v366_v44  ;;  %v865_v31 = vmul.f32 %v2956_v63, %v864_v30 }
  0xe0   :  { %v242_v49 = vsel %vm231_vm15, nan, %v241_v45  ;;  %v624_v14 = vsel %vm231_vm15, nan, %v623_v46  ;;  %v371_v50 = vmul.f32 %v369_v48, %v369_v48  ;;  %vm855_vm15 = vcmask 523264  }
  0xe1   :  { %2738 = vmatmul.msk.f32.vlgmr.msra.gmra.mxu1 %vm407_vm6, %v242_v49  ;;  %2749 = vmatmul.msk.f32.vlgmr.msra.gmra.mxu3 %vm407_vm6, %v624_v14  ;;  %v866_v32 = vadd.f32 %v2956_v63, %v865_v31  ;;  %vm867_vm0 = vweird.f32 %v2956_v63  ;;  %v923_v49 = vld [vmem:[%s4395_s10 + $0x60] sm:$0xff]  ;;  %vm990_vm7 = vcmask 130048  }
  0xe2   :  { %v372_v51 = vmul.f32 -0.001358992, %v371_v50  ;;  %v379_v52 = vmul.f32 -0.00019511016, %v371_v50 }
  0xe3   :  { %v3438_v33 = vsel %vm867_vm0, %v2956_v63, %v866_v32 }
  0xe4   :  { %v373_v56 = vadd.f32 0.041655596, %v372_v51  ;;  %v380_v5 = vadd.f32 0.008332121, %v379_v52  ;;  %v921_v51 = vld [vmem:[%s4395_s10 + $0x50] sm:$0xff] }
  0xe6   :  { %v374_v58 = vmul.f32 %v373_v56, %v371_v50  ;;  %v381_v27 = vmul.f32 %v380_v5, %v371_v50  ;;  %v917_v56 = vld [vmem:[%s4395_s10 + $0x30] sm:$0xff]  ;;  %v915_v5 = vld [vmem:[%s4395_s10 + $0x20] sm:$0xff] }
  0xe8   :  { %v375_v4 = vadd.f32 -0.4999988, %v374_v58  ;;  %v382_v59 = vadd.f32 -0.16666654, %v381_v27  ;;  %v911_v27 = vld [vmem:[%s4395_s10] sm:$0xff] }
  0xea   :  { %v376_v29 = vmul.f32 %v375_v4, %v371_v50  ;;  %v383_v61 = vmul.f32 %v382_v59, %v371_v50  ;;  %v926_v4 = vld [vmem:[%s4395_s10 + $0x78] sm:$0xff] }
  0xec   :  { %v377_v62 = vadd.f32 1.0, %v376_v29  ;;  %v384_v34 = vadd.f32 1.0, %v383_v61  ;;  %v922_v61 = vld [vmem:[%s4395_s10 + $0x58] sm:$0xff] }
  0xee   :  { %v385_v0 = vmul.f32 %v384_v34, %v369_v48  ;;  %v394_v23 = vxor.u32 2147483648, %v377_v62  ;;  %v925_v48 = vld [vmem:[%s4395_s10 + $0x70] sm:$0xff]  ;;  %v920_v34 = vld [vmem:[%s4395_s10 + $0x48] sm:$0xff] }
  0xef   :  { %946 = vmatpush.msrb.mxu2 %v925_v48 }
  0xf0   :  { %v391_v3 = vxor.u32 2147483648, %v385_v0  ;;  %v395_v1 = vsel %vm393_vm12, %v394_v23, %v385_v0  ;;  %v776_v2 = vsel %vm774_vm13, %v394_v23, %v385_v0  ;;  %v916_v23 = vld [vmem:[%s4395_s10 + $0x28] sm:$0xff] }
  0xf1   :  { %947 = vmatpush.msrb.mxu2 %v923_v49 }
  0xf2   :  { %v392_v28 = vsel %vm390_vm11, %v377_v62, %v391_v3  ;;  %v773_v26 = vsel %vm771_vm9, %v377_v62, %v391_v3 }
  0xf3   :  { %v396_v54 = vsel %vm389_vm10, %v392_v28, %v395_v1  ;;  %v777_v55 = vsel %vm770_vm8, %v773_v26, %v776_v2  ;;  %948 = vmatpush.msrb.mxu2 %v921_v51  ;;  %v845_v26 = vld [vmem:[%s4394_s9] ss:$0 sm:$0xff]  ;;  %v914_v2 = vld [vmem:[%s4395_s10 + $0x18] sm:$0xff] }
  0xf4   :  { %v397_v6 = vsel %vm386_vm14, nan, %v396_v54  ;;  %v778_v8 = vsel %vm386_vm14, nan, %v777_v55 }
  0xf5   :  { %2739 = vmatmul.msk.f32.gmra.mxu1 %vm407_vm6, %v397_v6  ;;  %2750 = vmatmul.msk.f32.gmra.mxu3 %vm407_vm6, %v778_v8  ;;  %v846_v6 = vld [vmem:[%s4394_s9 + $0x1] ss:$0 sm:$0xff]  ;;  %v912_v8 = vld [vmem:[%s4395_s10 + $0x8] sm:$0xff] }
  0xf6   :  { %949 = vmatpush.msrb.mxu2 %v919_v53 }
  0xf8   :  { %950 = vmatpush.msrb.mxu2 %v917_v56 }
  0xfa   :  { %951 = vmatpush.msrb.mxu2 %v915_v5 }
  0xfc   :  { %952 = vmatpush.msrb.mxu2 %v913_v57 }
  0xfe   :  { %953 = vmatpush.msrb.mxu2 %v911_v27  ;;  %v2954_v27 = vld [vmem:[%s4388_s3] ss:$0 sm:$0xff] }
 0x100   :  { %969 = vmatpush.msra.mxu2 %v926_v4 }
 0x102   :  { %970 = vmatpush.msra.mxu2 %v924_v60 }
 0x104   :  { %971 = vmatpush.msra.mxu2 %v922_v61 }
 0x106   :  { %972 = vmatpush.msra.mxu2 %v920_v34 }
 0x108   :  { %973 = vmatpush.msra.mxu2 %v918_v13 }
 0x10a   :  { %974 = vmatpush.msra.mxu2 %v916_v23 }
 0x10c   :  { %975 = vmatpush.msra.mxu2 %v914_v2 }
 0x10e   :  { %976 = vmatpush.msra.mxu2 %v912_v8 }
 0x137   :  { %v465_v10 = vpop.f32.mrf.mxu2 }
 0x13f   :  { %v468_v21 = vpop.f32.mrf.mxu2 }
 0x15e   :  { %v431_v9 = vpop.f32.mrf.mxu1 }
 0x15f   :  { %v466_v11 = vadd.f32 %v465_v10, %v431_v9 }
 0x164   :  { %v811_v16 = vpop.f32.mrf.mxu3 }
 0x165   :  { %v817_v17 = vadd.f32 %v811_v16, %v466_v11 }
 0x167   :  { %v3430_v40 = vadd.f32 %v2953_v15, %v817_v17 }
 0x169   :  { %v856_v12 = vsel %vm855_vm15, %v3430_v40, 0.0 }
 0x16a   :  { %857 = vadd.xlane.f32.xlu0 %v856_v12 }
 0x172   :  { %v434_v19 = vpop.f32.mrf.mxu1 }
 0x173   :  { %v469_v43 = vadd.f32 %v468_v21, %v434_v19 }
 0x178   :  { %v814_v25 = vpop.f32.mrf.mxu3 }
 0x179   :  { %v818_v22 = vadd.f32 %v814_v25, %v469_v43 }
 0x17b   :  { %v3434_v7 = vadd.f32 %v2953_v15, %v818_v22 }
 0x17d   :  { %v859_v24 = vsel %vm855_vm15, %v3434_v7, 0.0 }
 0x17e   :  { %860 = vadd.xlane.f32.xlu0 %v859_v24  ;;  %v2751_v24 = vld [vmem:[%s4394_s9 + $0x4] ss:$8 sm:$0x3] }
 0x17f   :  { %v928_v18 = vperm.slane %v2751_v24, 0 }
 0x1dd   :  { %v858_v35 = vpop.xlane.xlu0 %857 }
 0x1de   :  { %v869_v36 = vmul.f32 %v3438_v33, %v858_v35  ;;  %v929_v35 = vperm.slane %v2751_v24, 1 }
 0x1e0   :  { %v871_v20 = vsub.f32 %v3430_v40, %v869_v36 }
 0x1e2   :  { %v873_v39 = vmul.f32 %v871_v20, %v871_v20 }
 0x1e4   :  { %v875_v41 = vsel %vm855_vm15, %v873_v39, 0.0 }
 0x1e5   :  { %876 = vadd.xlane.f32.xlu1 %v875_v41 }
 0x1f1   :  { %v861_v42 = vpop.xlane.xlu0 %860 }
 0x1f2   :  { %v870_v44 = vmul.f32 %v3438_v33, %v861_v42  ;;  %v826_v42 = vld [vmem:[%s4387_s2 + $0x8] sm:$0xff] }
 0x1f4   :  { %v3445_v45 = vsub.f32 %v3434_v7, %v870_v44 }
 0x1f6   :  { %v874_v46 = vmul.f32 %v3445_v45, %v3445_v45 }
 0x1f8   :  { %v878_v47 = vsel %vm855_vm15, %v874_v46, 0.0  ;;  %v825_v46 = vld [vmem:[%s4387_s2] sm:$0xff] }
 0x1f9   :  { %879 = vadd.xlane.f32.xlu1 %v878_v47 }
 0x258   :  { %v877_v14 = vpop.xlane.xlu1 %876 }
 0x259   :  { %v881_v50 = vmul.f32 %v877_v14, %v3438_v33 }
 0x25b   :  { %v883_v52 = vadd.f32 1e-06, %v881_v50 }
 0x25d   :  { %2957 = vrsqrt.f32 %v883_v52  ;;  %vm891_vm2 = vweird.f32 %v883_v52 }
 0x263   :  { %v2958_v58 = vpop.eup %2957 }
 0x264   :  { %v886_v59 = vmul.f32 %v2958_v58, %v883_v52  ;;  %vm892_vm1 = vweird.f32 %v2958_v58 }
 0x265   :  { %vm893_vm3 = vmor %vm891_vm2, %vm892_vm1 }
 0x266   :  { %v887_v29 = vmul.f32 %v2958_v58, %v886_v59  ;;  %v3094_v59 = vmov -1e+30  }
 0x268   :  { %v888_v62 = vmul.f32 0.5, %v887_v29 }
 0x26a   :  { %v889_v37 = vsub.f32 1.5, %v888_v62 }
 0x26c   :  { %v890_v0 = vmul.f32 %v2958_v58, %v889_v37  ;;  %v880_v3 = vpop.xlane.xlu1 %879 }
 0x26d   :  { %v882_v1 = vmul.f32 %v880_v3, %v3438_v33 }
 0x26e   :  { %v894_v28 = vsel %vm893_vm3, %v2958_v58, %v890_v0 }
 0x26f   :  { %v905_v54 = vmul.f32 %v894_v28, %v871_v20  ;;  %v884_v55 = vadd.f32 1e-06, %v882_v1 }
 0x271   :  { %v907_v9 = vmul.f32 %v905_v54, %v845_v26  ;;  %2959 = vrsqrt.f32 %v884_v55  ;;  %vm901_vm5 = vweird.f32 %v884_v55 }
 0x273   :  { %v909_v10 = vadd.f32 %v907_v9, %v846_v6 }
 0x275   :  { %2753 = vmatmul.msk.f32.vlgmr.msrb.gmra.mxu2 %vm855_vm15, %v909_v10 }
 0x277   :  { %v2960_v11 = vpop.eup %2959 }
 0x278   :  { %v896_v15 = vmul.f32 %v2960_v11, %v884_v55  ;;  %vm902_vm4 = vweird.f32 %v2960_v11 }
 0x279   :  { %vm903_vm6 = vmor %vm901_vm5, %vm902_vm4 }
 0x27a   :  { %v897_v16 = vmul.f32 %v2960_v11, %v896_v15 }
 0x27c   :  { %v898_v17 = vmul.f32 0.5, %v897_v16 }
 0x27e   :  { %v899_v12 = vsub.f32 1.5, %v898_v17 }
 0x280   :  { %v900_v19 = vmul.f32 %v2960_v11, %v899_v12 }
 0x282   :  { %v904_v21 = vsel %vm903_vm6, %v2960_v11, %v900_v19 }
 0x283   :  { %v906_v43 = vmul.f32 %v904_v21, %v3445_v45 }
 0x285   :  { %v908_v25 = vmul.f32 %v906_v43, %v845_v26 }
 0x287   :  { %v910_v22 = vadd.f32 %v908_v25, %v846_v6 }
 0x289   :  { %2754 = vmatmul.msk.f32.gmra.mxu2 %vm855_vm15, %v910_v22 }
 0x291   :  { %2755 = vmatmul.msk.f32.vlgmr.msra.gmra.mxu2 %vm855_vm15, %v909_v10 }
 0x299   :  { %2756 = vmatmul.msk.f32.gmra.mxu2 %vm855_vm15, %v910_v22 }
 0x2f8   :  { %v955_v63 = vpop.f32.mrf.mxu2 }
 0x2f9   :  { %v956_v38 = vadd.f32 %v955_v63, %v928_v18 }
 0x2fb   :  { %1103 = vrot.lane.b32.xlu1 %v956_v38, %s3087_s18 }
 0x30c   :  { %v958_v30 = vpop.f32.mrf.mxu2 }
 0x30d   :  { %v959_v31 = vadd.f32 %v958_v30, %v928_v18 }
 0x30f   :  { %1229 = vrot.lane.b32.xlu1 %v959_v31, %s3088_s1  ;;  %1105 = vrot.lane.b32.xlu0 %v959_v31, %s3087_s18 }
 0x310   :  { %988 = vrot.lane.b32.xlu2 %v959_v31, %s3089_s4 }
 0x314   :  { %v978_v32 = vpop.f32.mrf.mxu2 }
 0x315   :  { %v979_v20 = vadd.f32 %v978_v32, %v929_v35 }
 0x317   :  { %1223 = vrot.lane.b32.xlu1 %v956_v38, %s3090_s19  ;;  %1349 = vrot.lane.b32.xlu0 %v956_v38, %s3091_s20 }
 0x318   :  { %986 = vrot.lane.b32.xlu2 %v956_v38, %s3089_s4 }
 0x31c   :  { %v981_v36 = vpop.f32.mrf.mxu2 }
 0x31d   :  { %v982_v39 = vadd.f32 %v981_v36, %v929_v35 }
 0x31f   :  { %1090 = vmatpush.msrb.mxu3 %v982_v39  ;;  %1227 = vrot.lane.b32.xlu0 %v956_v38, %s3088_s1  ;;  %v3522_v41 = vpack.i.bf16 %v979_v20, %v982_v39 }
 0x320   :  { %1099 = vrot.lane.b32.xlu2 %v956_v38, %s3092_s21  ;;  %835 = vperm.xlu1 %2921, %v826_v42  }
 0x321   :  { %1091 = vmatpush.msrb.mxu3 %v979_v20 }
 0x327   :  { %1225 = vrot.lane.b32.xlu0 %v959_v31, %s3090_s19 }
 0x328   :  { %1101 = vrot.lane.b32.xlu2 %v959_v31, %s3092_s21 }
 0x330   :  { %1351 = vrot.lane.b32.xlu2 %v959_v31, %s3091_s20 }
 0x338   :  { %1345 = vrot.lane.b32.xlu2 %v956_v38, %s3093_s0 }
 0x340   :  { %1347 = vrot.lane.b32.xlu2 %v959_v31, %s3093_s0 }
 0x348   :  { %830 = vperm.xlu2 %2920, %v825_v46  }
 0x36a   :  { %v989_v44 = vpop.permute.xlu2 %988 }
 0x36b   :  { %2757 = vmatpush.xpose.msk.msrb.mxu0 %vm990_vm7, %v989_v44 }
 0x36d   :  { %v1104_v47 = vpop.permute.xlu1 %1103 }
 0x372   :  { %v987_v45 = vpop.permute.xlu2 %986 }
 0x373   :  { %2758 = vmatpush.xpose.msk.msrb.mxu0 %vm990_vm7, %v987_v45 }
 0x376   :  { %2759 = vmatmul.msk.f32.vlgmr.msrb.gmra.mxu0 %vm990_vm7, %v956_v38 }
 0x37a   :  { %v1100_v48 = vpop.permute.xlu2 %1099 }
 0x37e   :  { %2760 = vmatmul.msk.f32.gmra.mxu0 %vm990_vm7, %v959_v31 }
 0x381   :  { %v1106_v49 = vpop.permute.xlu0 %1105  ;;  %v1230_v14 = vpop.permute.xlu1 %1229 }
 0x382   :  { %v1102_v50 = vpop.permute.xlu2 %1101  ;;  %2763 = vmatpush.xpose.msk.msrb.mxu2 %vm990_vm7, %v1106_v49  ;;  %2769 = vmatpush.xpose.msk.msra.mxu0 %vm990_vm7, %v1230_v14 }
 0x386   :  { %2764 = vmatpush.xpose.msk.msrb.mxu2 %vm990_vm7, %v1104_v47 }
 0x389   :  { %v1350_v51 = vpop.permute.xlu0 %1349  ;;  %2765 = vmatmul.msk.f32.vlgmr.msrb.gmra.mxu2 %vm990_vm7, %v1100_v48  ;;  %v1224_v56 = vpop.permute.xlu1 %1223 }
 0x38a   :  { %v1352_v52 = vpop.permute.xlu2 %1351 }
 0x38b   :  { %2775 = vmatpush.xpose.msk.msra.mxu2 %vm990_vm7, %v1352_v52 }
 0x38f   :  { %2776 = vmatpush.xpose.msk.msra.mxu2 %vm990_vm7, %v1350_v51 }
 0x391   :  { %v1228_v53 = vpop.permute.xlu0 %1227  ;;  %2766 = vmatmul.msk.f32.gmra.mxu2 %vm990_vm7, %v1102_v50 }
 0x392   :  { %2770 = vmatpush.xpose.msk.msra.mxu0 %vm990_vm7, %v1228_v53  ;;  %v1346_v5 = vpop.permute.xlu2 %1345  ;;  %v836_v61 = vpop.permute.xlu1 %835 }
 0x393   :  { %vm842_vm9 = vcmp.eq.f32.partialorder %v836_v61, %v2954_v27 }
 0x394   :  { %v3559_v37 = vsel %vm842_vm9, 0.0, %v3094_v59 }
 0x395   :  { %2771 = vmatmul.msk.f32.vlgmr.msra.gmra.mxu0 %vm990_vm7, %v1224_v56 }
 0x399   :  { %2777 = vmatmul.msk.f32.vlgmr.msra.gmra.mxu2 %vm990_vm7, %v1346_v5  ;;  %v1226_v57 = vpop.permute.xlu0 %1225 }
 0x39a   :  { %v1348_v58 = vpop.permute.xlu2 %1347 }
 0x39d   :  { %2772 = vmatmul.msk.f32.gmra.mxu0 %vm990_vm7, %v1226_v57 }
 0x3a1   :  { %2778 = vmatmul.msk.f32.gmra.mxu2 %vm990_vm7, %v1348_v58 }
 0x3a2   :  { %v831_v4 = vpop.permute.xlu2 %830 }
 0x3a3   :  { %vm841_vm8 = vcmp.eq.f32.partialorder %v831_v4, %v2954_v27 }
 0x3a4   :  { %v3555_v60 = vsel %vm841_vm8, 0.0, %v3094_v59 }
 0x3f3   :  { %v1016_v29 = vpop.f32.mrf.mxu0 }
 0x3f4   :  { %v1017_v62 = vadd.f32 %v1016_v29, %v3555_v60 }
 0x3f6   :  { %v1022_v34 = vsel %vm990_vm7, %v1017_v62, -inf }
 0x3f7   :  { %1023 = vmax.xlane.f32.xlu0 %v1022_v34 }
 0x3fb   :  { %v1019_v13 = vpop.f32.mrf.mxu0 }
 0x3fc   :  { %v1020_v0 = vadd.f32 %v1019_v13, %v3559_v37 }
 0x3fe   :  { %v1025_v23 = vsel %vm990_vm7, %v1020_v0, -inf }
 0x3ff   :  { %1026 = vmax.xlane.f32.xlu2 %v1025_v23 }
 0x40c   :  { %v1132_v3 = vpop.f32.mrf.mxu2 }
 0x40d   :  { %v1133_v28 = vadd.f32 %v1132_v3, %v3555_v60 }
 0x40f   :  { %v1138_v1 = vsel %vm990_vm7, %v1133_v28, -inf }
 0x410   :  { %1139 = vmax.xlane.f32.xlu1 %v1138_v1 }
 0x412   :  { %v1256_v26 = vpop.f32.mrf.mxu0 }
 0x413   :  { %v1257_v2 = vadd.f32 %v1256_v26, %v3555_v60 }
 0x414   :  { %v1135_v54 = vpop.f32.mrf.mxu2 }
 0x415   :  { %v1136_v55 = vadd.f32 %v1135_v54, %v3559_v37  ;;  %v1262_v6 = vsel %vm990_vm7, %v1257_v2, -inf }
 0x417   :  { %v1141_v8 = vsel %vm990_vm7, %v1136_v55, -inf }
 0x418   :  { %1263 = vmax.xlane.f32.xlu1 %v1262_v6  ;;  %1142 = vmax.xlane.f32.xlu0 %v1141_v8 }
 0x41a   :  { %v1259_v15 = vpop.f32.mrf.mxu0 }
 0x41b   :  { %v1260_v16 = vadd.f32 %v1259_v15, %v3559_v37 }
 0x41c   :  { %v1378_v9 = vpop.f32.mrf.mxu2 }
 0x41d   :  { %v1379_v10 = vadd.f32 %v1378_v9, %v3555_v60  ;;  %v1265_v21 = vsel %vm990_vm7, %v1260_v16, -inf }
 0x41f   :  { %v1384_v11 = vsel %vm990_vm7, %v1379_v10, -inf }
 0x420   :  { %1385 = vmax.xlane.f32.xlu2 %v1384_v11 }
 0x424   :  { %v1381_v17 = vpop.f32.mrf.mxu2 }
 0x425   :  { %v1382_v12 = vadd.f32 %v1381_v17, %v3559_v37 }
 0x427   :  { %v1387_v19 = vsel %vm990_vm7, %v1382_v12, -inf }
 0x428   :  { %1388 = vmax.xlane.f32.xlu0 %v1387_v19  ;;  %1266 = vmax.xlane.f32.xlu2 %v1265_v21 }
 0x46a   :  { %v1024_v43 = vpop.xlane.xlu0 %1023 }
 0x46b   :  { %v1028_v25 = vsub.f32 %v1017_v62, %v1024_v43 }
 0x46d   :  { %v1030_v22 = vmul.f32 1.442695, %v1028_v25 }
 0x46f   :  { %2961 = vpow2.f32 %v1030_v22 }
 0x472   :  { %v1027_v24 = vpop.xlane.xlu2 %1026 }
 0x473   :  { %v1029_v18 = vsub.f32 %v1020_v0, %v1027_v24 }
 0x475   :  { %v3575_v63 = vpop.eup %2961  ;;  %v1032_v38 = vmul.f32 1.442695, %v1029_v18 }
 0x476   :  { %v1034_v30 = vsel %vm990_vm7, %v3575_v63, 0.0 }
 0x477   :  { %2963 = vpow2.f32 %v1032_v38  ;;  %1035 = vadd.xlane.f32.xlu1 %v1034_v30 }
 0x47d   :  { %v3579_v31 = vpop.eup %2963 }
 0x47e   :  { %v1037_v32 = vsel %vm990_vm7, %v3579_v31, 0.0 }
 0x47f   :  { %1038 = vadd.xlane.f32.xlu0 %v1037_v32 }
 0x483   :  { %v1140_v35 = vpop.xlane.xlu1 %1139 }
 0x484   :  { %v1144_v36 = vsub.f32 %v1133_v28, %v1140_v35 }
 0x486   :  { %v1146_v20 = vmul.f32 1.442695, %v1144_v36 }
 0x488   :  { %2965 = vpow2.f32 %v1146_v20 }
 0x48b   :  { %v1143_v39 = vpop.xlane.xlu0 %1142  ;;  %v1264_v42 = vpop.xlane.xlu1 %1263 }
 0x48c   :  { %v1145_v44 = vsub.f32 %v1136_v55, %v1143_v39  ;;  %v1268_v47 = vsub.f32 %v1257_v2, %v1264_v42 }
 0x48e   :  { %v3583_v45 = vpop.eup %2965  ;;  %v1148_v46 = vmul.f32 1.442695, %v1145_v44  ;;  %v1270_v49 = vmul.f32 1.442695, %v1268_v47 }
 0x48f   :  { %v1150_v48 = vsel %vm990_vm7, %v3583_v45, 0.0 }
 0x490   :  { %2967 = vpow2.f32 %v1148_v46  ;;  %1151 = vadd.xlane.f32.xlu2 %v1150_v48 }
 0x491   :  { %2969 = vpow2.f32 %v1270_v49 }
 0x493   :  { %v1386_v14 = vpop.xlane.xlu2 %1385 }
 0x494   :  { %v1390_v50 = vsub.f32 %v1379_v10, %v1386_v14 }
 0x496   :  { %v3587_v51 = vpop.eup %2967  ;;  %v1392_v52 = vmul.f32 1.442695, %v1390_v50 }
 0x497   :  { %v1153_v53 = vsel %vm990_vm7, %v3587_v51, 0.0  ;;  %v3591_v57 = vpop.eup %2969 }
 0x498   :  { %2971 = vpow2.f32 %v1392_v52  ;;  %1154 = vadd.xlane.f32.xlu1 %v1153_v53  ;;  %v1274_v62 = vsel %vm990_vm7, %v3591_v57, 0.0 }
 0x49b   :  { %v1389_v56 = vpop.xlane.xlu0 %1388  ;;  %v1267_v5 = vpop.xlane.xlu2 %1266 }
 0x49c   :  { %v1391_v58 = vsub.f32 %v1382_v12, %v1389_v56  ;;  %v1269_v27 = vsub.f32 %v1260_v16, %v1267_v5 }
 0x49e   :  { %v3593_v4 = vpop.eup %2971  ;;  %v1394_v59 = vmul.f32 1.442695, %v1391_v58  ;;  %v1272_v29 = vmul.f32 1.442695, %v1269_v27 }
 0x49f   :  { %v1396_v61 = vsel %vm990_vm7, %v3593_v4, 0.0 }
 0x4a0   :  { %2973 = vpow2.f32 %v1394_v59  ;;  %1397 = vadd.xlane.f32.xlu0 %v1396_v61  ;;  %1275 = vadd.xlane.f32.xlu1 %v1274_v62 }
 0x4a1   :  { %2975 = vpow2.f32 %v1272_v29 }
 0x4a6   :  { %v3599_v34 = vpop.eup %2973 }
 0x4a7   :  { %v3601_v13 = vpop.eup %2975  ;;  %v1399_v0 = vsel %vm990_vm7, %v3599_v34, 0.0 }
 0x4a8   :  { %1400 = vadd.xlane.f32.xlu0 %v1399_v0  ;;  %2923 = vrot.lane.b32.xlu2 %v3522_v41, %s3092_s21  ;;  %v1277_v23 = vsel %vm990_vm7, %v3601_v13, 0.0 }
 0x4a9   :  { %1278 = vadd.xlane.f32.xlu1 %v1277_v23 }
 0x4bc   :  { %2928 = vrot.lane.b32.xlu0 %v3522_v41, %s3093_s0 }
 0x4c2   :  { %2933 = vrot.lane.b32.xlu1 %v3522_v41, %s3090_s19 }
 0x4ea   :  { %v1036_v3 = vpop.xlane.xlu1 %1035 }
 0x4eb   :  { %2977 = vrcp.f32 %v1036_v3  ;;  %v1051_v54 = vand.u32 2147483648, %v1036_v3  ;;  %v1049_v6 = vand.u32 2147483647, %v1036_v3  ;;  %vm1045_vm11 = vweird.f32 %v1036_v3 }
 0x4ed   :  { %v1052_v10 = vor.u32 1.1754944e-38, %v1051_v54  ;;  %vm1050_vm13 = vcmp.eq.f32.partialorder %v1049_v6, 8.507059e+37 }
 0x4f1   :  { %v2978_v28 = vpop.eup %2977 }
 0x4f2   :  { %v1041_v1 = vmul.f32 %v2978_v28, %v1036_v3  ;;  %v1039_v26 = vpop.xlane.xlu0 %1038  ;;  %vm1046_vm10 = vweird.f32 %v2978_v28 }
 0x4f3   :  { %2979 = vrcp.f32 %v1039_v26  ;;  %vm1047_vm12 = vmor %vm1045_vm11, %vm1046_vm10  ;;  %v1066_v12 = vand.u32 2147483648, %v1039_v26  ;;  %v1064_v21 = vand.u32 2147483647, %v1039_v26  ;;  %vm1060_vm0 = vweird.f32 %v1039_v26 }
 0x4f4   :  { %v1042_v2 = vsub.f32 1.0, %v1041_v1 }
 0x4f5   :  { %v1067_v25 = vor.u32 1.1754944e-38, %v1066_v12  ;;  %vm1065_vm2 = vcmp.eq.f32.partialorder %v1064_v21, 8.507059e+37 }
 0x4f6   :  { %v1043_v55 = vmul.f32 %v2978_v28, %v1042_v2 }
 0x4f8   :  { %v1044_v8 = vadd.f32 %v2978_v28, %v1043_v55 }
 0x4f9   :  { %v2980_v9 = vpop.eup %2979 }
 0x4fa   :  { %v1056_v11 = vmul.f32 %v2980_v9, %v1039_v26  ;;  %v1048_v15 = vsel %vm1047_vm12, %v2978_v28, %v1044_v8  ;;  %vm1061_vm14 = vweird.f32 %v2980_v9 }
 0x4fb   :  { %v1053_v41 = vsel %vm1050_vm13, %v1052_v10, %v1048_v15  ;;  %vm1062_vm1 = vmor %vm1060_vm0, %vm1061_vm14 }
 0x4fc   :  { %v1057_v16 = vsub.f32 1.0, %v1056_v11  ;;  %v1054_v17 = vmul.f32 %v3575_v63, %v1053_v41 }
 0x4fe   :  { %v1058_v19 = vmul.f32 %v2980_v9, %v1057_v16  ;;  %2761 = vmatmul.msk.f32.vlgmr.msrb.gmra.mxu3 %vm990_vm7, %v1054_v17 }
 0x500   :  { %v1059_v43 = vadd.f32 %v2980_v9, %v1058_v19 }
 0x502   :  { %v1063_v22 = vsel %vm1062_vm1, %v2980_v9, %v1059_v43 }
 0x503   :  { %v1152_v24 = vpop.xlane.xlu2 %1151  ;;  %v1068_v18 = vsel %vm1065_vm2, %v1067_v25, %v1063_v22 }
 0x504   :  { %2981 = vrcp.f32 %v1152_v24  ;;  %v1069_v38 = vmul.f32 %v3579_v31, %v1068_v18  ;;  %v1167_v39 = vand.u32 2147483648, %v1152_v24  ;;  %v1165_v46 = vand.u32 2147483647, %v1152_v24 }
 0x505   :  { %vm1161_vm4 = vweird.f32 %v1152_v24 }
 0x506   :  { %2762 = vmatmul.msk.f32.gmra.mxu3 %vm990_vm7, %v1069_v38  ;;  %v1168_v31 = vor.u32 1.1754944e-38, %v1167_v39  ;;  %vm1166_vm6 = vcmp.eq.f32.partialorder %v1165_v46, 8.507059e+37 }
 0x50a   :  { %v2982_v63 = vpop.eup %2981 }
 0x50b   :  { %v1157_v30 = vmul.f32 %v2982_v63, %v1152_v24  ;;  %v2924_v32 = vpop.permute.xlu2 %2923  ;;  %v1155_v35 = vpop.xlane.xlu1 %1154  ;;  %vm1162_vm3 = vweird.f32 %v2982_v63 }
 0x50c   :  { %v2925_v36 = vunpack.i.l.bf16 %v2924_v32  ;;  %2983 = vrcp.f32 %v1155_v35  ;;  %v2926_v42 = vunpack.i.h.bf16 %v2924_v32  ;;  %vm1163_vm5 = vmor %vm1161_vm4, %vm1162_vm3  ;;  %v1182_v27 = vand.u32 2147483648, %v1155_v35 }
 0x50d   :  { %v1158_v20 = vsub.f32 1.0, %v1157_v30  ;;  %vm1176_vm9 = vweird.f32 %v1155_v35  ;;  %v1180_v29 = vand.u32 2147483647, %v1155_v35 }
 0x50e   :  { %1214 = vmatpush.msra.mxu3 %v2925_v36  ;;  %v1183_v23 = vor.u32 1.1754944e-38, %v1182_v27 }
 0x50f   :  { %v1159_v44 = vmul.f32 %v2982_v63, %v1158_v20  ;;  %vm1181_vm11 = vcmp.eq.f32.partialorder %v1180_v29, 8.507059e+37 }
 0x510   :  { %1215 = vmatpush.msra.mxu3 %v2926_v42 }
 0x511   :  { %v1160_v47 = vadd.f32 %v2982_v63, %v1159_v44 }
 0x512   :  { %v2984_v48 = vpop.eup %2983 }
 0x513   :  { %v1164_v49 = vsel %vm1163_vm5, %v2982_v63, %v1160_v47  ;;  %v1172_v14 = vmul.f32 %v2984_v48, %v1155_v35  ;;  %v1398_v50 = vpop.xlane.xlu0 %1397  ;;  %v3617_v53 = vpop.xlane.xlu1 %1275  ;;  %vm1177_vm8 = vweird.f32 %v2984_v48 }
 0x514   :  { %v1169_v52 = vsel %vm1166_vm6, %v1168_v31, %v1164_v49  ;;  %2985 = vrcp.f32 %v1398_v50  ;;  %vm1178_vm10 = vmor %vm1176_vm9, %vm1177_vm8  ;;  %v1413_v41 = vand.u32 2147483648, %v1398_v50  ;;  %vm1407_vm13 = vweird.f32 %v1398_v50 }
 0x515   :  { %v1173_v56 = vsub.f32 1.0, %v1172_v14  ;;  %v1170_v5 = vmul.f32 %v3583_v45, %v1169_v52  ;;  %2987 = vrcp.f32 %v3617_v53  ;;  %v1291_v18 = vand.u32 2147483648, %v3617_v53 }
 0x516   :  { %v1414_v21 = vor.u32 1.1754944e-38, %v1413_v41  ;;  %vm1285_vm2 = vweird.f32 %v3617_v53  ;;  %v1289_v63 = vand.u32 2147483647, %v3617_v53 }
 0x517   :  { %v1174_v58 = vmul.f32 %v2984_v48, %v1173_v56  ;;  %2767 = vmatmul.msk.f32.vlgmr.msra.gmra.mxu3 %vm990_vm7, %v1170_v5  ;;  %v1292_v46 = vor.u32 1.1754944e-38, %v1291_v18 }
 0x518   :  { %vm1290_vm8 = vcmp.eq.f32.partialorder %v1289_v63, 8.507059e+37 }
 0x519   :  { %v1175_v59 = vadd.f32 %v2984_v48, %v1174_v58 }
 0x51a   :  { %v2986_v61 = vpop.eup %2985 }
 0x51b   :  { %v3622_v62 = vpop.xlane.xlu0 %1400  ;;  %v1179_v0 = vsel %vm1178_vm10, %v2984_v48, %v1175_v59  ;;  %v1403_v3 = vmul.f32 %v2986_v61, %v1398_v50  ;;  %v2988_v1 = vpop.eup %2987  ;;  %vm1408_vm12 = vweird.f32 %v2986_v61 }
 0x51c   :  { %2989 = vrcp.f32 %v3622_v62  ;;  %v3625_v45 = vpop.xlane.xlu1 %1278  ;;  %v1184_v28 = vsel %vm1181_vm11, %v1183_v23, %v1179_v0  ;;  %v1281_v55 = vmul.f32 %v2988_v1, %v3617_v53  ;;  %vm1409_vm14 = vmor %vm1407_vm13, %vm1408_vm12  ;;  %vm1286_vm1 = vweird.f32 %v2988_v1 }
 0x51d   :  { %v1185_v26 = vmul.f32 %v3587_v51, %v1184_v28  ;;  %v1404_v2 = vsub.f32 1.0, %v1403_v3  ;;  %2991 = vrcp.f32 %v3625_v45  ;;  %v1411_v51 = vand.u32 2147483647, %v1398_v50  ;;  %vm3639_vm4 = vmor %vm1285_vm2, %vm1286_vm1 }
 0x51e   :  { %v1282_v9 = vsub.f32 1.0, %v1281_v55  ;;  %vm1422_vm5 = vweird.f32 %v3622_v62  ;;  %v1428_v35 = vand.u32 2147483648, %v3622_v62  ;;  %v1426_v44 = vand.u32 2147483647, %v3622_v62  ;;  %v1501_v55 = vld [vmem:[%s4396_s11 + $0x10] sm:$0xff] }
 0x51f   :  { %2768 = vmatmul.msk.f32.gmra.mxu3 %vm990_vm7, %v1185_v26  ;;  %v1405_v6 = vmul.f32 %v2986_v61, %v1404_v2  ;;  %vm1412_vm0 = vcmp.eq.f32.partialorder %v1411_v51, 8.507059e+37  ;;  %vm1300_vm11 = vweird.f32 %v3625_v45  ;;  %v1304_v5 = vand.u32 2147483647, %v3625_v45  ;;  %v1504_v26 = vld [vmem:[%s4396_s11 + $0x28] sm:$0xff]  ;;  %v1503_v2 = vld [vmem:[%s4396_s11 + $0x20] sm:$0xff] }
 0x520   :  { %v1283_v16 = vmul.f32 %v2988_v1, %v1282_v9  ;;  %v1429_v31 = vor.u32 1.1754944e-38, %v1428_v35  ;;  %vm1427_vm9 = vcmp.eq.f32.partialorder %v1426_v44, 8.507059e+37 }
 0x521   :  { %v1406_v11 = vadd.f32 %v2986_v61, %v1405_v6  ;;  %vm1305_vm13 = vcmp.eq.f32.partialorder %v1304_v5, 8.507059e+37  ;;  %v1500_v6 = vld [vmem:[%s4396_s11 + $0x8] sm:$0xff]  ;;  %v1594_v5 = vld [vmem:[%s4397_s12 + $0x30] sm:$0xff] }
 0x522   :  { %v2990_v54 = vpop.eup %2989  ;;  %v1284_v43 = vadd.f32 %v2988_v1, %v1283_v16 }
 0x523   :  { %v1418_v8 = vmul.f32 %v2990_v54, %v3622_v62  ;;  %v3632_v10 = vpop.eup %2991  ;;  %v1410_v12 = vsel %vm1409_vm14, %v2986_v61, %v1406_v11  ;;  %vm1423_vm3 = vweird.f32 %v2990_v54  ;;  %vm1493_vm14 = vcmask 261120  }
 0x524   :  { %v1296_v17 = vmul.f32 %v3632_v10, %v3625_v45  ;;  %v1415_v24 = vsel %vm1412_vm0, %v1414_v21, %v1410_v12  ;;  %v1288_v42 = vsel %vm3639_vm4, %v2988_v1, %v1284_v43  ;;  %vm1424_vm6 = vmor %vm1422_vm5, %vm1423_vm3  ;;  %vm1301_vm10 = vweird.f32 %v3632_v10  ;;  %v1505_v1 = vld [vmem:[%s4396_s11 + $0x30] sm:$0xff] }
 0x525   :  { %v1419_v15 = vsub.f32 1.0, %v1418_v8  ;;  %v1416_v39 = vmul.f32 %v3593_v4, %v1415_v24  ;;  %v1293_v14 = vsel %vm1290_vm8, %v1292_v46, %v1288_v42  ;;  %v1306_v4 = vand.u32 2147483648, %v3625_v45  ;;  %vm1302_vm12 = vmor %vm1300_vm11, %vm1301_vm10  ;;  %v1499_v8 = vld [vmem:[%s4396_s11] sm:$0xff] }
 0x526   :  { %v1297_v25 = vsub.f32 1.0, %v1296_v17  ;;  %v1294_v56 = vmul.f32 %v3591_v57, %v1293_v14  ;;  %vm1496_vm0 = vcmask 392192   ;;  %v1600_v14 = vld [vmem:[%s4397_s12 + $0x60] sm:$0xff] }
 0x527   :  { %v1420_v19 = vmul.f32 %v2990_v54, %v1419_v15  ;;  %v1307_v59 = vor.u32 1.1754944e-38, %v1306_v4  ;;  %v1598_v4 = vld [vmem:[%s4397_s12 + $0x50] sm:$0xff] }
 0x528   :  { %v1298_v20 = vmul.f32 %v3632_v10, %v1297_v25  ;;  %v851_v25 = vld [vmem:[%s4394_s9 + $0x5] ss:$0 sm:$0xff] }
 0x529   :  { %v1421_v30 = vadd.f32 %v2990_v54, %v1420_v19 }
 0x52a   :  { %v1299_v50 = vadd.f32 %v3632_v10, %v1298_v20 }
 0x52b   :  { %v1425_v48 = vsel %vm1424_vm6, %v2990_v54, %v1421_v30  ;;  %v1502_v54 = vld [vmem:[%s4396_s11 + $0x18] sm:$0xff] }
 0x52c   :  { %v1430_v53 = vsel %vm1427_vm9, %v1429_v31, %v1425_v48  ;;  %v1303_v27 = vsel %vm1302_vm12, %v3632_v10, %v1299_v50  ;;  %v1602_v31 = vld [vmem:[%s4397_s12 + $0x70] sm:$0xff]  ;;  %v1601_v50 = vld [vmem:[%s4397_s12 + $0x68] sm:$0xff] }
 0x52d   :  { %v1431_v58 = vmul.f32 %v3599_v34, %v1430_v53  ;;  %v1308_v29 = vsel %vm1305_vm13, %v1307_v59, %v1303_v27  ;;  %v1596_v53 = vld [vmem:[%s4397_s12 + $0x40] sm:$0xff]  ;;  %v1593_v59 = vld [vmem:[%s4397_s12 + $0x28] sm:$0xff] }
 0x52e   :  { %v2929_v22 = vpop.permute.xlu0 %2928  ;;  %v1309_v61 = vmul.f32 %v3601_v13, %v1308_v29  ;;  %v1506_v13 = vld [vmem:[%s4396_s11 + $0x38] sm:$0xff]  ;;  %v1592_v27 = vld [vmem:[%s4397_s12 + $0x20] sm:$0xff]  ;;  %v1590_v29 = vld [vmem:[%s4397_s12 + $0x10] sm:$0xff] }
 0x52f   :  { %v2930_v38 = vunpack.i.l.bf16 %v2929_v22  ;;  %v2931_v36 = vunpack.i.h.bf16 %v2929_v22  ;;  %1521 = vmatpush.msrb.mxu0 %v1506_v13 }
 0x531   :  { %1458 = vmatpush.msrb.mxu3 %v2930_v38  ;;  %1522 = vmatpush.msrb.mxu0 %v1505_v1 }
 0x533   :  { %1459 = vmatpush.msrb.mxu3 %v2931_v36  ;;  %1523 = vmatpush.msrb.mxu0 %v1504_v26 }
 0x534   :  { %v2934_v47 = vpop.permute.xlu1 %2933  ;;  %2779 = vmatmul.msk.f32.vlgmr.msrb.gmra.mxu3 %vm990_vm7, %v1416_v39 }
 0x535   :  { %v2935_v49 = vunpack.i.l.bf16 %v2934_v47  ;;  %v2936_v52 = vunpack.i.h.bf16 %v2934_v47  ;;  %1524 = vmatpush.msrb.mxu0 %v1503_v2 }
 0x537   :  { %1336 = vmatpush.msrb.mxu1 %v2935_v49  ;;  %1525 = vmatpush.msrb.mxu0 %v1502_v54  ;;  %v1603_v49 = vld [vmem:[%s4397_s12 + $0x78] sm:$0xff] }
 0x538   :  { %1646 = vmatpush.msrb.mxu2 %v1603_v49  ;;  %v1722_v49 = vld [vmem:[%s4398_s13 + $0xc8] sm:$0xff] }
 0x539   :  { %1337 = vmatpush.msrb.mxu1 %v2936_v52  ;;  %1526 = vmatpush.msrb.mxu0 %v1501_v55  ;;  %v1599_v52 = vld [vmem:[%s4397_s12 + $0x58] sm:$0xff] }
 0x53a   :  { %2773 = vmatmul.msk.f32.vlgmr.msrb.gmra.mxu1 %vm990_vm7, %v1294_v56  ;;  %1647 = vmatpush.msrb.mxu2 %v1601_v50  ;;  %v1597_v56 = vld [vmem:[%s4397_s12 + $0x48] sm:$0xff]  ;;  %v1721_v50 = vld [vmem:[%s4398_s13 + $0xc0] sm:$0xff] }
 0x53b   :  { %1527 = vmatpush.msrb.mxu0 %v1500_v6  ;;  %1623 = vmatpush.msra.mxu1 %v1602_v31  ;;  %v1703_v31 = vld [vmem:[%s4398_s13 + $0x30] sm:$0xff] }
 0x53c   :  { %2780 = vmatmul.msk.f32.gmra.mxu3 %vm990_vm7, %v1431_v58  ;;  %1648 = vmatpush.msrb.mxu2 %v1599_v52  ;;  %v1595_v58 = vld [vmem:[%s4397_s12 + $0x38] sm:$0xff] }
 0x53d   :  { %1528 = vmatpush.msrb.mxu0 %v1499_v8  ;;  %1624 = vmatpush.msra.mxu1 %v1600_v14  ;;  %v1702_v14 = vld [vmem:[%s4398_s13 + $0x28] sm:$0xff]  ;;  %v1720_v52 = vld [vmem:[%s4398_s13 + $0xb8] sm:$0xff] }
 0x53e   :  { %1649 = vmatpush.msrb.mxu2 %v1597_v56  ;;  %v1719_v56 = vld [vmem:[%s4398_s13 + $0xb0] sm:$0xff] }
 0x53f   :  { %1625 = vmatpush.msra.mxu1 %v1598_v4  ;;  %v1701_v4 = vld [vmem:[%s4398_s13 + $0x20] sm:$0xff] }
 0x540   :  { %1650 = vmatpush.msrb.mxu2 %v1595_v58  ;;  %v1718_v58 = vld [vmem:[%s4398_s13 + $0xa8] sm:$0xff] }
 0x541   :  { %1626 = vmatpush.msra.mxu1 %v1596_v53  ;;  %v1700_v53 = vld [vmem:[%s4398_s13 + $0x18] sm:$0xff] }
 0x542   :  { %2774 = vmatmul.msk.f32.gmra.mxu1 %vm990_vm7, %v1309_v61  ;;  %1651 = vmatpush.msrb.mxu2 %v1593_v59  ;;  %v1591_v61 = vld [vmem:[%s4397_s12 + $0x18] sm:$0xff]  ;;  %v1717_v59 = vld [vmem:[%s4398_s13 + $0xa0] sm:$0xff] }
 0x543   :  { %1627 = vmatpush.msra.mxu1 %v1594_v5  ;;  %v1699_v5 = vld [vmem:[%s4398_s13 + $0x10] sm:$0xff] }
 0x544   :  { %1652 = vmatpush.msrb.mxu2 %v1591_v61  ;;  %v1716_v61 = vld [vmem:[%s4398_s13 + $0x98] sm:$0xff] }
 0x545   :  { %1628 = vmatpush.msra.mxu1 %v1592_v27  ;;  %v1698_v27 = vld [vmem:[%s4398_s13 + $0x8] sm:$0xff] }
 0x547   :  { %1629 = vmatpush.msra.mxu1 %v1590_v29  ;;  %v1697_v29 = vld [vmem:[%s4398_s13] sm:$0xff] }
 0x581   :  { %v1093_v57 = vpop.f32.mrf.mxu3 }
 0x589   :  { %v1096_v62 = vpop.f32.mrf.mxu3 }
 0x59a   :  { %v1217_v0 = vpop.f32.mrf.mxu3 }
 0x5a2   :  { %v1220_v23 = vpop.f32.mrf.mxu3 }
 0x5b7   :  { %v1339_v3 = vpop.f32.mrf.mxu1  ;;  %v1461_v45 = vpop.f32.mrf.mxu3 }
 0x5b8   :  { %1477 = vrot.lane.b32.xlu2 %v1339_v3, %s3088_s1  ;;  %1485 = vrot.lane.b32.xlu0 %v1461_v45, %s3087_s18  ;;  %v1712_v45 = vld [vmem:[%s4398_s13 + $0x78] sm:$0xff] }
 0x5b9   :  { %1729 = vmatpush.msra.mxu3 %v1712_v45 }
 0x5bf   :  { %v1342_v34 = vpop.f32.mrf.mxu1  ;;  %v1464_v28 = vpop.f32.mrf.mxu3 }
 0x5c0   :  { %1469 = vrot.lane.b32.xlu2 %v1217_v0, %s3091_s20  ;;  %1487 = vrot.lane.b32.xlu1 %v1464_v28, %s3087_s18  ;;  %v1710_v28 = vld [vmem:[%s4398_s13 + $0x68] sm:$0xff] }
 0x5c1   :  { %1479 = vrot.lane.b32.xlu0 %v1342_v34, %s3088_s1  ;;  %v1711_v34 = vld [vmem:[%s4398_s13 + $0x70] sm:$0xff] }
 0x5c2   :  { %1730 = vmatpush.msra.mxu3 %v1711_v34 }
 0x5c4   :  { %1731 = vmatpush.msra.mxu3 %v1710_v28 }
 0x5c8   :  { %1471 = vrot.lane.b32.xlu2 %v1220_v23, %s3091_s20 }
 0x612   :  { %v1478_v9 = vpop.permute.xlu2 %1477 }
 0x61a   :  { %v1470_v10 = vpop.permute.xlu2 %1469 }
 0x61b   :  { %v1491_v11 = vsel %vm990_vm7, %v1093_v57, %v1470_v10  ;;  %v1588_v57 = vld [vmem:[%s4397_s12] sm:$0xff] }
 0x61c   :  { %v1494_v41 = vsel %vm1493_vm14, %v1491_v11, %v1478_v9  ;;  %1630 = vmatpush.msra.mxu1 %v1588_v57  ;;  %v847_v11 = vld [vmem:[%s4394_s9 + $0x2] ss:$0 sm:$0xff]  ;;  %v2752_v57 = vld [vmem:[%s4394_s9 + $0x6] ss:$8 sm:$0x3] }
 0x622   :  { %v1472_v16 = vpop.permute.xlu2 %1471 }
 0x623   :  { %v1492_v12 = vsel %vm990_vm7, %v1096_v62, %v1472_v16  ;;  %v1589_v62 = vld [vmem:[%s4397_s12 + $0x8] sm:$0xff] }
 0x624   :  { %1653 = vmatpush.msrb.mxu2 %v1589_v62  ;;  %v1715_v62 = vld [vmem:[%s4398_s13 + $0x90] sm:$0xff] }
 0x62a   :  { %v1486_v15 = vpop.permute.xlu0 %1485 }
 0x62b   :  { %v1497_v51 = vsel %vm1496_vm0, %v1494_v41, %v1486_v15 }
 0x62c   :  { %2781 = vmatmul.msk.f32.vlgmr.msrb.gmra.mxu0 %vm855_vm15, %v1497_v51 }
 0x632   :  { %v1488_v17 = vpop.permute.xlu1 %1487 }
 0x633   :  { %v1480_v19 = vpop.permute.xlu0 %1479 }
 0x634   :  { %v1495_v21 = vsel %vm1493_vm14, %v1492_v12, %v1480_v19 }
 0x635   :  { %v1498_v43 = vsel %vm1496_vm0, %v1495_v21, %v1488_v17  ;;  %v848_v17 = vld [vmem:[%s4394_s9 + $0x3] ss:$0 sm:$0xff] }
 0x636   :  { %2782 = vmatmul.msk.f32.gmra.mxu0 %vm855_vm15, %v1498_v43 }
 0x6a9   :  { %v1530_v22 = vpop.f32.mrf.mxu0 }
 0x6aa   :  { %v1536_v24 = vadd.f32 %v1530_v22, %v3430_v40 }
 0x6ac   :  { %v3705_v18 = vadd.f32 %v1536_v24, %v851_v25 }
 0x6ae   :  { %v1540_v38 = vsel %vm855_vm15, %v3705_v18, 0.0 }
 0x6af   :  { %1541 = vadd.xlane.f32.xlu2 %v1540_v38 }
 0x6b3   :  { %v1533_v63 = vpop.f32.mrf.mxu0 }
 0x6b4   :  { %v1537_v30 = vadd.f32 %v1533_v63, %v3434_v7 }
 0x6b6   :  { %v3710_v32 = vadd.f32 %v1537_v30, %v851_v25  ;;  %v1709_v30 = vld [vmem:[%s4398_s13 + $0x60] sm:$0xff] }
 0x6b7   :  { %1732 = vmatpush.msra.mxu3 %v1709_v30 }
 0x6b8   :  { %v1543_v35 = vsel %vm855_vm15, %v3710_v32, 0.0 }
 0x6b9   :  { %1544 = vadd.xlane.f32.xlu0 %v1543_v35  ;;  %v1728_v35 = vld [vmem:[%s4398_s13 + $0xf8] sm:$0xff] }
 0x6ba   :  { %1752 = vmatpush.msra.mxu0 %v1728_v35 }
 0x722   :  { %v1542_v36 = vpop.xlane.xlu2 %1541 }
 0x723   :  { %v1546_v20 = vmul.f32 %v1542_v36, %v3438_v33  ;;  %v1708_v36 = vld [vmem:[%s4398_s13 + $0x58] sm:$0xff] }
 0x724   :  { %1733 = vmatpush.msra.mxu3 %v1708_v36 }
 0x725   :  { %v3716_v40 = vsub.f32 %v3705_v18, %v1546_v20  ;;  %v1727_v20 = vld [vmem:[%s4398_s13 + $0xf0] sm:$0xff] }
 0x726   :  { %1753 = vmatpush.msra.mxu0 %v1727_v20 }
 0x727   :  { %v1550_v39 = vmul.f32 %v3716_v40, %v3716_v40 }
 0x729   :  { %v1552_v42 = vsel %vm855_vm15, %v1550_v39, 0.0  ;;  %v1726_v39 = vld [vmem:[%s4398_s13 + $0xe8] sm:$0xff] }
 0x72a   :  { %1553 = vadd.xlane.f32.xlu1 %v1552_v42  ;;  %1754 = vmatpush.msra.mxu0 %v1726_v39  ;;  %v1706_v42 = vld [vmem:[%s4398_s13 + $0x48] sm:$0xff] }
 0x72c   :  { %v1545_v44 = vpop.xlane.xlu0 %1544 }
 0x72d   :  { %v1547_v7 = vmul.f32 %v1545_v44, %v3438_v33  ;;  %v1725_v44 = vld [vmem:[%s4398_s13 + $0xe0] sm:$0xff] }
 0x72e   :  { %1755 = vmatpush.msra.mxu0 %v1725_v44 }
 0x72f   :  { %v3723_v46 = vsub.f32 %v3710_v32, %v1547_v7  ;;  %v1705_v7 = vld [vmem:[%s4398_s13 + $0x40] sm:$0xff] }
 0x731   :  { %v1551_v47 = vmul.f32 %v3723_v46, %v3723_v46 }
 0x733   :  { %v1555_v48 = vsel %vm855_vm15, %v1551_v47, 0.0  ;;  %v1704_v47 = vld [vmem:[%s4398_s13 + $0x38] sm:$0xff] }
 0x734   :  { %1556 = vadd.xlane.f32.xlu2 %v1555_v48  ;;  %v1723_v48 = vld [vmem:[%s4398_s13 + $0xd0] sm:$0xff] }
 0x79d   :  { %v1554_v0 = vpop.xlane.xlu1 %1553 }
 0x79e   :  { %v1558_v23 = vmul.f32 %v1554_v0, %v3438_v33  ;;  %v1605_v0 = vperm.slane %v2752_v57, 0 }
 0x7a0   :  { %v1560_v3 = vadd.f32 1e-06, %v1558_v23  ;;  %v1714_v23 = vld [vmem:[%s4398_s13 + $0x88] sm:$0xff] }
 0x7a2   :  { %2993 = vrsqrt.f32 %v1560_v3  ;;  %vm1568_vm2 = vweird.f32 %v1560_v3 }
 0x7a7   :  { %v1557_v13 = vpop.xlane.xlu2 %1556 }
 0x7a8   :  { %v2994_v1 = vpop.eup %2993  ;;  %v1559_v26 = vmul.f32 %v1557_v13, %v3438_v33  ;;  %v1606_v13 = vperm.slane %v2752_v57, 1 }
 0x7a9   :  { %v1563_v2 = vmul.f32 %v2994_v1, %v1560_v3  ;;  %vm1569_vm1 = vweird.f32 %v2994_v1  ;;  %v1713_v3 = vld [vmem:[%s4398_s13 + $0x80] sm:$0xff] }
 0x7aa   :  { %v1561_v54 = vadd.f32 1e-06, %v1559_v26  ;;  %vm1570_vm3 = vmor %vm1568_vm2, %vm1569_vm1 }
 0x7ab   :  { %v1564_v55 = vmul.f32 %v2994_v1, %v1563_v2 }
 0x7ac   :  { %2995 = vrsqrt.f32 %v1561_v54  ;;  %vm1578_vm5 = vweird.f32 %v1561_v54 }
 0x7ad   :  { %v1565_v6 = vmul.f32 0.5, %v1564_v55 }
 0x7af   :  { %v1566_v8 = vsub.f32 1.5, %v1565_v6 }
 0x7b1   :  { %v1567_v9 = vmul.f32 %v2994_v1, %v1566_v8 }
 0x7b2   :  { %v2996_v10 = vpop.eup %2995 }
 0x7b3   :  { %v1571_v15 = vsel %vm1570_vm3, %v2994_v1, %v1567_v9  ;;  %v1573_v41 = vmul.f32 %v2996_v10, %v1561_v54  ;;  %vm1579_vm4 = vweird.f32 %v2996_v10 }
 0x7b4   :  { %v1582_v51 = vmul.f32 %v1571_v15, %v3716_v40  ;;  %vm1580_vm6 = vmor %vm1578_vm5, %vm1579_vm4  ;;  %v1707_v40 = vld [vmem:[%s4398_s13 + $0x50] sm:$0xff] }
 0x7b5   :  { %v1574_v16 = vmul.f32 %v2996_v10, %v1573_v41  ;;  %1734 = vmatpush.msra.mxu3 %v1707_v40 }
 0x7b6   :  { %v1584_v12 = vmul.f32 %v1582_v51, %v847_v11 }
 0x7b7   :  { %v1575_v19 = vmul.f32 0.5, %v1574_v16  ;;  %1735 = vmatpush.msra.mxu3 %v1706_v42 }
 0x7b8   :  { %v1586_v21 = vadd.f32 %v1584_v12, %v848_v17 }
 0x7b9   :  { %v1576_v43 = vsub.f32 1.5, %v1575_v19  ;;  %1736 = vmatpush.msra.mxu3 %v1705_v7 }
 0x7ba   :  { %2783 = vmatmul.msk.f32.vlgmr.msra.gmra.mxu1 %vm855_vm15, %v1586_v21  ;;  %2785 = vmatmul.msk.f32.vlgmr.msrb.gmra.mxu2 %vm855_vm15, %v1586_v21 }
 0x7bb   :  { %v1577_v25 = vmul.f32 %v2996_v10, %v1576_v43  ;;  %1737 = vmatpush.msra.mxu3 %v1704_v47 }
 0x7bd   :  { %v1581_v22 = vsel %vm1580_vm6, %v2996_v10, %v1577_v25  ;;  %1738 = vmatpush.msra.mxu3 %v1703_v31 }
 0x7be   :  { %v1583_v24 = vmul.f32 %v1581_v22, %v3723_v46  ;;  %v1724_v46 = vld [vmem:[%s4398_s13 + $0xd8] sm:$0xff] }
 0x7bf   :  { %1756 = vmatpush.msra.mxu0 %v1724_v46  ;;  %1739 = vmatpush.msra.mxu3 %v1702_v14 }
 0x7c0   :  { %v1585_v38 = vmul.f32 %v1583_v24, %v847_v11 }
 0x7c1   :  { %1757 = vmatpush.msra.mxu0 %v1723_v48  ;;  %1740 = vmatpush.msra.mxu3 %v1701_v4 }
 0x7c2   :  { %v1587_v63 = vadd.f32 %v1585_v38, %v848_v17 }
 0x7c3   :  { %1758 = vmatpush.msra.mxu0 %v1722_v49  ;;  %1741 = vmatpush.msra.mxu3 %v1700_v53 }
 0x7c4   :  { %2784 = vmatmul.msk.f32.gmra.mxu1 %vm855_vm15, %v1587_v63  ;;  %2786 = vmatmul.msk.f32.gmra.mxu2 %vm855_vm15, %v1587_v63 }
 0x7c5   :  { %1759 = vmatpush.msra.mxu0 %v1721_v50  ;;  %1742 = vmatpush.msra.mxu3 %v1699_v5  ;;  %v854_v5 = vld [vmem:[%s4394_s9 + $0x7] ss:$0 sm:$0xff] }
 0x7c7   :  { %1760 = vmatpush.msra.mxu0 %v1720_v52  ;;  %1743 = vmatpush.msra.mxu3 %v1698_v27 }
 0x7c9   :  { %1761 = vmatpush.msra.mxu0 %v1719_v56  ;;  %1744 = vmatpush.msra.mxu3 %v1697_v29 }
 0x7cb   :  { %1762 = vmatpush.msra.mxu0 %v1718_v58 }
 0x7cd   :  { %1763 = vmatpush.msra.mxu0 %v1717_v59 }
 0x7cf   :  { %1764 = vmatpush.msra.mxu0 %v1716_v61 }
 0x7d1   :  { %1765 = vmatpush.msra.mxu0 %v1715_v62 }
 0x7d3   :  { %1766 = vmatpush.msra.mxu0 %v1714_v23 }
 0x7d5   :  { %1767 = vmatpush.msra.mxu0 %v1713_v3 }
 0x837   :  { %v1632_v45 = vpop.f32.mrf.mxu1 }
 0x838   :  { %v1633_v34 = vadd.f32 %v1632_v45, %v1605_v0 }
 0x83a   :  { %v1661_v28 = vmul.f32 %v1633_v34, %v1633_v34 }
 0x83c   :  { %v1665_v1 = vmul.f32 %v1661_v28, %v1633_v34 }
 0x83d   :  { %v1655_v26 = vpop.f32.mrf.mxu2 }
 0x83e   :  { %v1669_v2 = vmul.f32 0.044715, %v1665_v1  ;;  %v1656_v54 = vadd.f32 %v1655_v26, %v1606_v13 }
 0x840   :  { %v1673_v55 = vadd.f32 %v1669_v2, %v1633_v34  ;;  %v1662_v6 = vmul.f32 %v1656_v54, %v1656_v54 }
 0x841   :  { %v1635_v8 = vpop.f32.mrf.mxu1 }
 0x842   :  { %v1677_v9 = vmul.f32 0.7978846, %v1673_v55  ;;  %v1666_v10 = vmul.f32 %v1662_v6, %v1656_v54  ;;  %v1636_v11 = vadd.f32 %v1635_v8, %v1605_v0  ;;  %v2810_v55 = vld [vmem:[%s4395_s10 + $0xf8] sm:$0xff]  ;;  %v2807_v6 = vld [vmem:[%s4395_s10 + $0xe0] sm:$0xff]  ;;  %v2808_v8 = vld [vmem:[%s4395_s10 + $0xe8] sm:$0xff] }
 0x843   :  { %1897 = vmatpush.msra.mxu2 %v2810_v55 }
 0x844   :  { %2997 = vtanh.f32 %v1677_v9  ;;  %v1670_v15 = vmul.f32 0.044715, %v1666_v10  ;;  %v1663_v41 = vmul.f32 %v1636_v11, %v1636_v11  ;;  %v2805_v9 = vld [vmem:[%s4395_s10 + $0xd0] sm:$0xff]  ;;  %v2806_v10 = vld [vmem:[%s4395_s10 + $0xd8] sm:$0xff] }
 0x845   :  { %1898 = vmatpush.msra.mxu2 %v2808_v8 }
 0x846   :  { %v1674_v51 = vadd.f32 %v1670_v15, %v1656_v54  ;;  %v1667_v16 = vmul.f32 %v1663_v41, %v1636_v11  ;;  %v2804_v15 = vld [vmem:[%s4395_s10 + $0xc8] sm:$0xff]  ;;  %v2801_v41 = vld [vmem:[%s4395_s10 + $0xb0] sm:$0xff] }
 0x847   :  { %v1658_v17 = vpop.f32.mrf.mxu2  ;;  %1899 = vmatpush.msra.mxu2 %v2806_v10 }
 0x848   :  { %v1678_v12 = vmul.f32 0.7978846, %v1674_v51  ;;  %v1659_v19 = vadd.f32 %v1658_v17, %v1606_v13  ;;  %v1671_v21 = vmul.f32 0.044715, %v1667_v16  ;;  %v2802_v51 = vld [vmem:[%s4395_s10 + $0xb8] sm:$0xff]  ;;  %v2799_v16 = vld [vmem:[%s4395_s10 + $0xa0] sm:$0xff] }
 0x849   :  { %1900 = vmatpush.msra.mxu2 %v2804_v15  ;;  %v2800_v17 = vld [vmem:[%s4395_s10 + $0xa8] sm:$0xff] }
 0x84a   :  { %v2998_v43 = vpop.eup %2997  ;;  %2999 = vtanh.f32 %v1678_v12  ;;  %v1664_v25 = vmul.f32 %v1659_v19, %v1659_v19  ;;  %v1675_v22 = vadd.f32 %v1671_v21, %v1636_v11  ;;  %v2797_v12 = vld [vmem:[%s4395_s10 + $0x90] sm:$0xff]  ;;  %v2795_v21 = vld [vmem:[%s4395_s10 + $0x80] sm:$0xff] }
 0x84b   :  { %v1685_v24 = vadd.f32 1.0, %v2998_v43  ;;  %1901 = vmatpush.msra.mxu2 %v2802_v51  ;;  %v2796_v43 = vld [vmem:[%s4395_s10 + $0x88] sm:$0xff] }
 0x84c   :  { %v1668_v38 = vmul.f32 %v1664_v25, %v1659_v19  ;;  %v1679_v63 = vmul.f32 0.7978846, %v1675_v22 }
 0x84d   :  { %v1689_v30 = vmul.f32 0.5, %v1685_v24  ;;  %1902 = vmatpush.msra.mxu2 %v2800_v17 }
 0x84e   :  { %3001 = vtanh.f32 %v1679_v63  ;;  %v1672_v35 = vmul.f32 0.044715, %v1668_v38 }
 0x84f   :  { %v1693_v36 = vmul.f32 %v1689_v30, %v1633_v34 }
 0x850   :  { %v3000_v20 = vpop.eup %2999  ;;  %v1676_v40 = vadd.f32 %v1672_v35, %v1659_v19 }
 0x851   :  { %1745 = vmatmul.f32.vlgmr.msra.gmra.mxu3 %v1693_v36  ;;  %v1686_v39 = vadd.f32 1.0, %v3000_v20 }
 0x852   :  { %v1680_v42 = vmul.f32 0.7978846, %v1676_v40 }
 0x853   :  { %v1690_v44 = vmul.f32 0.5, %v1686_v39 }
 0x854   :  { %v3002_v7 = vpop.eup %3001  ;;  %3003 = vtanh.f32 %v1680_v42 }
 0x855   :  { %v1694_v46 = vmul.f32 %v1690_v44, %v1656_v54  ;;  %v1687_v47 = vadd.f32 1.0, %v3002_v7  ;;  %v2809_v54 = vld [vmem:[%s4395_s10 + $0xf0] sm:$0xff] }
 0x856   :  { %1874 = vmatpush.msrb.mxu1 %v2809_v54  ;;  %v2787_v7 = vld [vmem:[%s4394_s9 + $0x10] ss:$0 sm:$0xff] }
 0x857   :  { %1768 = vmatmul.f32.vlgmr.msra.gmra.mxu0 %v1694_v46  ;;  %v1691_v48 = vmul.f32 0.5, %v1687_v47 }
 0x858   :  { %1875 = vmatpush.msrb.mxu1 %v2807_v6 }
 0x859   :  { %v1695_v31 = vmul.f32 %v1691_v48, %v1636_v11  ;;  %v2803_v11 = vld [vmem:[%s4395_s10 + $0xc0] sm:$0xff] }
 0x85a   :  { %v3004_v49 = vpop.eup %3003  ;;  %1876 = vmatpush.msrb.mxu1 %v2805_v9 }
 0x85b   :  { %1748 = vmatmul.f32.gmra.mxu3 %v1695_v31  ;;  %v1688_v14 = vadd.f32 1.0, %v3004_v49  ;;  %v2788_v49 = vld [vmem:[%s4394_s9 + $0x11] ss:$0 sm:$0xff] }
 0x85c   :  { %1877 = vmatpush.msrb.mxu1 %v2803_v11 }
 0x85d   :  { %v1692_v50 = vmul.f32 0.5, %v1688_v14 }
 0x85e   :  { %1878 = vmatpush.msrb.mxu1 %v2801_v41 }
 0x85f   :  { %v1696_v4 = vmul.f32 %v1692_v50, %v1659_v19  ;;  %v2798_v19 = vld [vmem:[%s4395_s10 + $0x98] sm:$0xff] }
 0x860   :  { %1879 = vmatpush.msrb.mxu1 %v2799_v16  ;;  %1903 = vmatpush.msra.mxu2 %v2798_v19 }
 0x861   :  { %1771 = vmatmul.f32.gmra.mxu0 %v1696_v4 }
 0x862   :  { %1880 = vmatpush.msrb.mxu1 %v2797_v12  ;;  %1904 = vmatpush.msra.mxu2 %v2796_v43 }
 0x864   :  { %1881 = vmatpush.msrb.mxu1 %v2795_v21 }
 0x8d4   :  { %v1746_v52 = vpop.f32.mrf.mxu3  ;;  %v1769_v53 = vpop.f32.mrf.mxu0 }
 0x8d5   :  { %v1770_v56 = vadd.f32 %v1769_v53, %v1746_v52 }
 0x8d7   :  { %v1775_v58 = vadd.f32 %v1770_v56, %v3705_v18 }
 0x8d9   :  { %v3893_v27 = vadd.f32 %v1775_v58, %v854_v5 }
 0x8db   :  { %v1790_v59 = vsel %vm855_vm15, %v3893_v27, 0.0 }
 0x8dc   :  { %1791 = vadd.xlane.f32.xlu0 %v1790_v59 }
 0x8de   :  { %v1749_v29 = vpop.f32.mrf.mxu3  ;;  %v1772_v61 = vpop.f32.mrf.mxu0 }
 0x8df   :  { %v1773_v57 = vadd.f32 %v1772_v61, %v1749_v29  ;;  %v2791_v29 = vld [vmem:[%s4394_s9 + $0x14] ss:$8 sm:$0x3] }
 0x8e0   :  { %v1856_v61 = vperm.slane %v2791_v29, 0 }
 0x8e1   :  { %v1776_v62 = vadd.f32 %v1773_v57, %v3710_v32 }
 0x8e3   :  { %v3898_v0 = vadd.f32 %v1776_v62, %v854_v5 }
 0x8e5   :  { %v1793_v23 = vsel %vm855_vm15, %v3898_v0, 0.0 }
 0x8e6   :  { %1794 = vadd.xlane.f32.xlu1 %v1793_v23 }
 0x94f   :  { %v1792_v3 = vpop.xlane.xlu0 %1791 }
 0x950   :  { %v1796_v18 = vmul.f32 %v1792_v3, %v3438_v33 }
 0x952   :  { %v3904_v45 = vsub.f32 %v3893_v27, %v1796_v18 }
 0x954   :  { %v1800_v34 = vmul.f32 %v3904_v45, %v3904_v45 }
 0x956   :  { %v1802_v28 = vsel %vm855_vm15, %v1800_v34, 0.0 }
 0x957   :  { %1803 = vadd.xlane.f32.xlu2 %v1802_v28 }
 0x959   :  { %v1795_v13 = vpop.xlane.xlu1 %1794 }
 0x95a   :  { %v1797_v32 = vmul.f32 %v1795_v13, %v3438_v33 }
 0x95c   :  { %v3911_v1 = vsub.f32 %v3898_v0, %v1797_v32 }
 0x95e   :  { %v1801_v26 = vmul.f32 %v3911_v1, %v3911_v1 }
 0x960   :  { %v1805_v2 = vsel %vm855_vm15, %v1801_v26, 0.0 }
 0x961   :  { %1806 = vadd.xlane.f32.xlu0 %v1805_v2 }
 0x9ca   :  { %v1804_v25 = vpop.xlane.xlu2 %1803 }
 0x9cb   :  { %v1808_v22 = vmul.f32 %v1804_v25, %v3438_v33 }
 0x9cd   :  { %v1810_v24 = vadd.f32 1e-06, %v1808_v22 }
 0x9cf   :  { %3005 = vrsqrt.f32 %v1810_v24  ;;  %vm1818_vm9 = vweird.f32 %v1810_v24 }
 0x9d4   :  { %v1807_v38 = vpop.xlane.xlu0 %1806 }
 0x9d5   :  { %v3006_v63 = vpop.eup %3005  ;;  %v1809_v30 = vmul.f32 %v1807_v38, %v3438_v33 }
 0x9d6   :  { %v1813_v35 = vmul.f32 %v3006_v63, %v1810_v24  ;;  %vm1819_vm8 = vweird.f32 %v3006_v63 }
 0x9d7   :  { %v1811_v36 = vadd.f32 1e-06, %v1809_v30  ;;  %vm1820_vm10 = vmor %vm1818_vm9, %vm1819_vm8 }
 0x9d8   :  { %v1814_v20 = vmul.f32 %v3006_v63, %v1813_v35 }
 0x9d9   :  { %3007 = vrsqrt.f32 %v1811_v36  ;;  %vm1828_vm12 = vweird.f32 %v1811_v36 }
 0x9da   :  { %v1815_v40 = vmul.f32 0.5, %v1814_v20 }
 0x9dc   :  { %v1816_v39 = vsub.f32 1.5, %v1815_v40 }
 0x9de   :  { %v1817_v42 = vmul.f32 %v3006_v63, %v1816_v39 }
 0x9df   :  { %v3008_v44 = vpop.eup %3007 }
 0x9e0   :  { %v1821_v46 = vsel %vm1820_vm10, %v3006_v63, %v1817_v42  ;;  %v1823_v47 = vmul.f32 %v3008_v44, %v1811_v36  ;;  %vm1829_vm11 = vweird.f32 %v3008_v44 }
 0x9e1   :  { %v1832_v48 = vmul.f32 %v1821_v46, %v3904_v45  ;;  %vm1830_vm13 = vmor %vm1828_vm12, %vm1829_vm11  ;;  %v1857_v45 = vperm.slane %v2791_v29, 1 }
 0x9e2   :  { %v1824_v31 = vmul.f32 %v3008_v44, %v1823_v47 }
 0x9e3   :  { %v1834_v14 = vmul.f32 %v2787_v7, %v1832_v48 }
 0x9e4   :  { %v1825_v50 = vmul.f32 0.5, %v1824_v31 }
 0x9e5   :  { %v1836_v4 = vadd.f32 %v2788_v49, %v1834_v14 }
 0x9e6   :  { %v1826_v52 = vsub.f32 1.5, %v1825_v50 }
 0x9e7   :  { %2811 = vmatmul.msk.f32.vlgmr.msrb.gmra.mxu1 %vm855_vm15, %v1836_v4  ;;  %2813 = vmatmul.msk.f32.vlgmr.msra.gmra.mxu2 %vm855_vm15, %v1836_v4 }
 0x9e8   :  { %v1827_v53 = vmul.f32 %v3008_v44, %v1826_v52 }
 0x9ea   :  { %v1831_v56 = vsel %vm1830_vm13, %v3008_v44, %v1827_v53 }
 0x9eb   :  { %v1833_v5 = vmul.f32 %v1831_v56, %v3911_v1 }
 0x9ed   :  { %v1835_v58 = vmul.f32 %v2787_v7, %v1833_v5 }
 0x9ef   :  { %v1837_v59 = vadd.f32 %v2788_v49, %v1835_v58 }
 0x9f1   :  { %2812 = vmatmul.msk.f32.gmra.mxu1 %vm855_vm15, %v1837_v59  ;;  %2814 = vmatmul.msk.f32.gmra.mxu2 %vm855_vm15, %v1837_v59 }
 0xa64   :  { %v1883_v57 = vpop.f32.mrf.mxu1 }
 0xa65   :  { %v1884_v62 = vadd.f32 %v1883_v57, %v1856_v61 }
 0xa67   :  { %1914 = vrot.lane.b32.xlu0 %v1884_v62, %s3089_s4 }
 0xa6a   :  { %v1906_v23 = vpop.f32.mrf.mxu2 }
 0xa6b   :  { %v1907_v28 = vadd.f32 %v1906_v23, %v1857_v45 }
 0xa6e   :  { %v1886_v3 = vpop.f32.mrf.mxu1 }
 0xa6f   :  { %v1887_v18 = vadd.f32 %v1886_v3, %v1856_v61  ;;  %2026 = vrot.lane.b32.xlu0 %v1884_v62, %s3092_s21 }
 0xa71   :  { %2032 = vrot.lane.b32.xlu2 %v1887_v18, %s3087_s18  ;;  %1916 = vrot.lane.b32.xlu1 %v1887_v18, %s3089_s4 }
 0xa74   :  { %v1909_v34 = vpop.f32.mrf.mxu2 }
 0xa75   :  { %v1910_v13 = vadd.f32 %v1909_v34, %v1857_v45 }
 0xa77   :  { %2017 = vmatpush.msrb.mxu2 %v1910_v13  ;;  %2278 = vrot.lane.b32.xlu0 %v1887_v18, %s3091_s20  ;;  %v3986_v32 = vpack.i.bf16 %v1907_v28, %v1910_v13 }
 0xa79   :  { %2018 = vmatpush.msrb.mxu2 %v1907_v28  ;;  %2154 = vrot.lane.b32.xlu2 %v1884_v62, %s3088_s1 }
 0xa7a   :  { %2030 = vrot.lane.b32.xlu1 %v1884_v62, %s3087_s18 }
 0xa7f   :  { %2150 = vrot.lane.b32.xlu0 %v1884_v62, %s3090_s19 }
 0xa81   :  { %2028 = vrot.lane.b32.xlu2 %v1887_v18, %s3092_s21 }
 0xa82   :  { %2156 = vrot.lane.b32.xlu1 %v1887_v18, %s3088_s1 }
 0xa87   :  { %2274 = vrot.lane.b32.xlu0 %v1887_v18, %s3093_s0 }
 0xa89   :  { %2272 = vrot.lane.b32.xlu2 %v1884_v62, %s3093_s0 }
 0xa8a   :  { %2276 = vrot.lane.b32.xlu1 %v1884_v62, %s3091_s20 }
 0xa92   :  { %2152 = vrot.lane.b32.xlu1 %v1887_v18, %s3090_s19 }
 0xacb   :  { %v2033_v1 = vpop.permute.xlu2 %2032 }
 0xacc   :  { %2821 = vmatpush.xpose.msk.msrb.mxu3 %vm990_vm7, %v2033_v1 }
 0xad3   :  { %v2155_v55 = vpop.permute.xlu2 %2154 }
 0xad9   :  { %v1915_v26 = vpop.permute.xlu0 %1914 }
 0xadb   :  { %v2029_v10 = vpop.permute.xlu2 %2028 }
 0xae1   :  { %v2027_v2 = vpop.permute.xlu0 %2026 }
 0xae3   :  { %v1917_v54 = vpop.permute.xlu1 %1916  ;;  %v2273_v41 = vpop.permute.xlu2 %2272 }
 0xae4   :  { %2815 = vmatpush.xpose.msk.msra.mxu1 %vm990_vm7, %v1917_v54 }
 0xae8   :  { %2816 = vmatpush.xpose.msk.msra.mxu1 %vm990_vm7, %v1915_v26 }
 0xae9   :  { %v2279_v8 = vpop.permute.xlu0 %2278 }
 0xaeb   :  { %2817 = vmatmul.msk.f32.vlgmr.msra.gmra.mxu1 %vm990_vm7, %v1884_v62 }
 0xaec   :  { %v2031_v6 = vpop.permute.xlu1 %2030 }
 0xaed   :  { %2822 = vmatpush.xpose.msk.msrb.mxu3 %vm990_vm7, %v2031_v6 }
 0xaf0   :  { %2823 = vmatmul.msk.f32.vlgmr.msrb.gmra.mxu3 %vm990_vm7, %v2027_v2 }
 0xaf1   :  { %2833 = vmatpush.xpose.msk.msra.mxu3 %vm990_vm7, %v2279_v8  ;;  %v2151_v11 = vpop.permute.xlu0 %2150 }
 0xaf3   :  { %2818 = vmatmul.msk.f32.gmra.mxu1 %vm990_vm7, %v1887_v18 }
 0xaf4   :  { %v2157_v9 = vpop.permute.xlu1 %2156 }
 0xaf5   :  { %2827 = vmatpush.xpose.msk.msrb.mxu1 %vm990_vm7, %v2157_v9 }
 0xaf8   :  { %2824 = vmatmul.msk.f32.gmra.mxu3 %vm990_vm7, %v2029_v10 }
 0xaf9   :  { %2828 = vmatpush.xpose.msk.msrb.mxu1 %vm990_vm7, %v2155_v55  ;;  %v2275_v16 = vpop.permute.xlu0 %2274 }
 0xafc   :  { %v2277_v15 = vpop.permute.xlu1 %2276  ;;  %2829 = vmatmul.msk.f32.vlgmr.msrb.gmra.mxu1 %vm990_vm7, %v2151_v11 }
 0xafd   :  { %2834 = vmatpush.xpose.msk.msra.mxu3 %vm990_vm7, %v2277_v15 }
 0xb00   :  { %2835 = vmatmul.msk.f32.vlgmr.msra.gmra.mxu3 %vm990_vm7, %v2273_v41 }
 0xb04   :  { %v2153_v51 = vpop.permute.xlu1 %2152 }
 0xb05   :  { %2830 = vmatmul.msk.f32.gmra.mxu1 %vm990_vm7, %v2153_v51 }
 0xb08   :  { %2836 = vmatmul.msk.f32.gmra.mxu3 %vm990_vm7, %v2275_v16 }
 0xb68   :  { %v1943_v17 = vpop.f32.mrf.mxu1 }
 0xb69   :  { %v1944_v12 = vadd.f32 %v1943_v17, %v3555_v60 }
 0xb6b   :  { %v1949_v19 = vsel %vm990_vm7, %v1944_v12, -inf }
 0xb6c   :  { %1950 = vmax.xlane.f32.xlu2 %v1949_v19 }
 0xb70   :  { %v1946_v21 = vpop.f32.mrf.mxu1 }
 0xb71   :  { %v1947_v43 = vadd.f32 %v1946_v21, %v3559_v37 }
 0xb73   :  { %v2059_v25 = vpop.f32.mrf.mxu3  ;;  %v1952_v22 = vsel %vm990_vm7, %v1947_v43, -inf }
 0xb74   :  { %v2060_v24 = vadd.f32 %v2059_v25, %v3555_v60  ;;  %1953 = vmax.xlane.f32.xlu0 %v1952_v22 }
 0xb76   :  { %v2065_v38 = vsel %vm990_vm7, %v2060_v24, -inf }
 0xb77   :  { %2066 = vmax.xlane.f32.xlu1 %v2065_v38 }
 0xb79   :  { %v2183_v63 = vpop.f32.mrf.mxu1 }
 0xb7a   :  { %v2184_v30 = vadd.f32 %v2183_v63, %v3555_v60 }
 0xb7b   :  { %v2062_v35 = vpop.f32.mrf.mxu3 }
 0xb7c   :  { %v2063_v36 = vadd.f32 %v2062_v35, %v3559_v37  ;;  %v2189_v40 = vsel %vm990_vm7, %v2184_v30, -inf }
 0xb7e   :  { %v2068_v20 = vsel %vm990_vm7, %v2063_v36, -inf }
 0xb7f   :  { %2069 = vmax.xlane.f32.xlu2 %v2068_v20  ;;  %2190 = vmax.xlane.f32.xlu1 %v2189_v40 }
 0xb82   :  { %v2186_v39 = vpop.f32.mrf.mxu1 }
 0xb83   :  { %v2187_v42 = vadd.f32 %v2186_v39, %v3559_v37  ;;  %v2305_v44 = vpop.f32.mrf.mxu3 }
 0xb84   :  { %v2306_v7 = vadd.f32 %v2305_v44, %v3555_v60 }
 0xb85   :  { %v2192_v46 = vsel %vm990_vm7, %v2187_v42, -inf }
 0xb86   :  { %v2311_v47 = vsel %vm990_vm7, %v2306_v7, -inf }
 0xb87   :  { %2312 = vmax.xlane.f32.xlu0 %v2311_v47  ;;  %2193 = vmax.xlane.f32.xlu2 %v2192_v46 }
 0xb8b   :  { %v2308_v48 = vpop.f32.mrf.mxu3 }
 0xb8c   :  { %v2309_v31 = vadd.f32 %v2308_v48, %v3559_v37 }
 0xb8e   :  { %v2314_v49 = vsel %vm990_vm7, %v2309_v31, -inf }
 0xb8f   :  { %2315 = vmax.xlane.f32.xlu1 %v2314_v49 }
 0xbdf   :  { %v1951_v14 = vpop.xlane.xlu2 %1950 }
 0xbe0   :  { %v1955_v50 = vsub.f32 %v1944_v12, %v1951_v14 }
 0xbe2   :  { %v1957_v4 = vmul.f32 1.442695, %v1955_v50 }
 0xbe4   :  { %3009 = vpow2.f32 %v1957_v4 }
 0xbe7   :  { %v1954_v52 = vpop.xlane.xlu0 %1953 }
 0xbe8   :  { %v1956_v53 = vsub.f32 %v1947_v43, %v1954_v52 }
 0xbea   :  { %v4029_v56 = vpop.eup %3009  ;;  %v1959_v60 = vmul.f32 1.442695, %v1956_v53  ;;  %v2067_v5 = vpop.xlane.xlu1 %2066 }
 0xbeb   :  { %v2071_v58 = vsub.f32 %v2060_v24, %v2067_v5  ;;  %v1961_v59 = vsel %vm990_vm7, %v4029_v56, 0.0 }
 0xbec   :  { %3011 = vpow2.f32 %v1959_v60  ;;  %1962 = vadd.xlane.f32.xlu0 %v1961_v59 }
 0xbed   :  { %v2073_v37 = vmul.f32 1.442695, %v2071_v58 }
 0xbef   :  { %3013 = vpow2.f32 %v2073_v37 }
 0xbf2   :  { %v4033_v29 = vpop.eup %3011  ;;  %v2070_v61 = vpop.xlane.xlu2 %2069 }
 0xbf3   :  { %v2191_v57 = vpop.xlane.xlu1 %2190  ;;  %v2072_v62 = vsub.f32 %v2063_v36, %v2070_v61  ;;  %v1964_v3 = vsel %vm990_vm7, %v4033_v29, 0.0 }
 0xbf4   :  { %v2195_v23 = vsub.f32 %v2184_v30, %v2191_v57  ;;  %1965 = vadd.xlane.f32.xlu1 %v1964_v3 }
 0xbf5   :  { %v4037_v18 = vpop.eup %3013  ;;  %v2075_v45 = vmul.f32 1.442695, %v2072_v62 }
 0xbf6   :  { %v2197_v34 = vmul.f32 1.442695, %v2195_v23  ;;  %v2077_v28 = vsel %vm990_vm7, %v4037_v18, 0.0 }
 0xbf7   :  { %3015 = vpow2.f32 %v2075_v45  ;;  %2078 = vadd.xlane.f32.xlu2 %v2077_v28 }
 0xbf8   :  { %3017 = vpow2.f32 %v2197_v34 }
 0xbfa   :  { %v2194_v13 = vpop.xlane.xlu2 %2193  ;;  %v2313_v1 = vpop.xlane.xlu0 %2312 }
 0xbfb   :  { %v2196_v26 = vsub.f32 %v2187_v42, %v2194_v13  ;;  %v2317_v2 = vsub.f32 %v2306_v7, %v2313_v1 }
 0xbfd   :  { %v4041_v54 = vpop.eup %3015  ;;  %v2199_v55 = vmul.f32 1.442695, %v2196_v26  ;;  %v2319_v6 = vmul.f32 1.442695, %v2317_v2 }
 0xbfe   :  { %v4043_v8 = vpop.eup %3017  ;;  %v2080_v9 = vsel %vm990_vm7, %v4041_v54, 0.0 }
 0xbff   :  { %3019 = vpow2.f32 %v2199_v55  ;;  %2081 = vadd.xlane.f32.xlu0 %v2080_v9  ;;  %v2201_v10 = vsel %vm990_vm7, %v4043_v8, 0.0 }
 0xc00   :  { %3021 = vpow2.f32 %v2319_v6  ;;  %2202 = vadd.xlane.f32.xlu2 %v2201_v10 }
 0xc02   :  { %v2316_v11 = vpop.xlane.xlu1 %2315 }
 0xc03   :  { %v2318_v15 = vsub.f32 %v2309_v31, %v2316_v11 }
 0xc05   :  { %v4049_v41 = vpop.eup %3019  ;;  %v2321_v51 = vmul.f32 1.442695, %v2318_v15 }
 0xc06   :  { %v4051_v16 = vpop.eup %3021  ;;  %v2204_v17 = vsel %vm990_vm7, %v4049_v41, 0.0 }
 0xc07   :  { %3023 = vpow2.f32 %v2321_v51  ;;  %v2323_v12 = vsel %vm990_vm7, %v4051_v16, 0.0 }
 0xc08   :  { %2205 = vadd.xlane.f32.xlu2 %v2204_v17  ;;  %2324 = vadd.xlane.f32.xlu1 %v2323_v12 }
 0xc0d   :  { %v4057_v19 = vpop.eup %3023 }
 0xc0e   :  { %v2326_v21 = vsel %vm990_vm7, %v4057_v19, 0.0 }
 0xc10   :  { %2327 = vadd.xlane.f32.xlu1 %v2326_v21 }
 0xc13   :  { %2938 = vrot.lane.b32.xlu0 %v3986_v32, %s3092_s21 }
 0xc20   :  { %2943 = vrot.lane.b32.xlu2 %v3986_v32, %s3090_s19 }
 0xc29   :  { %2948 = vrot.lane.b32.xlu1 %v3986_v32, %s3093_s0 }
 0xc5f   :  { %v1963_v43 = vpop.xlane.xlu0 %1962 }
 0xc60   :  { %3025 = vrcp.f32 %v1963_v43  ;;  %v1978_v63 = vand.u32 2147483648, %v1963_v43  ;;  %v1976_v36 = vand.u32 2147483647, %v1963_v43  ;;  %vm1972_vm2 = vweird.f32 %v1963_v43 }
 0xc62   :  { %v1979_v32 = vor.u32 1.1754944e-38, %v1978_v63  ;;  %vm1977_vm4 = vcmp.eq.f32.partialorder %v1976_v36, 8.507059e+37 }
 0xc66   :  { %v3026_v25 = vpop.eup %3025 }
 0xc67   :  { %v1968_v22 = vmul.f32 %v3026_v25, %v1963_v43  ;;  %v1966_v24 = vpop.xlane.xlu1 %1965  ;;  %vm1973_vm1 = vweird.f32 %v3026_v25 }
 0xc68   :  { %3027 = vrcp.f32 %v1966_v24  ;;  %vm1974_vm3 = vmor %vm1972_vm2, %vm1973_vm1  ;;  %v1993_v48 = vand.u32 2147483648, %v1966_v24  ;;  %v1991_v49 = vand.u32 2147483647, %v1966_v24  ;;  %vm1987_vm6 = vweird.f32 %v1966_v24 }
 0xc69   :  { %v1969_v38 = vsub.f32 1.0, %v1968_v22 }
 0xc6a   :  { %v4067_v30 = vpop.xlane.xlu2 %2078  ;;  %v1994_v53 = vor.u32 1.1754944e-38, %v1993_v48  ;;  %vm1992_vm9 = vcmp.eq.f32.partialorder %v1991_v49, 8.507059e+37 }
 0xc6b   :  { %v1970_v35 = vmul.f32 %v3026_v25, %v1969_v38  ;;  %3029 = vrcp.f32 %v4067_v30  ;;  %vm2088_vm12 = vweird.f32 %v4067_v30  ;;  %v2094_v26 = vand.u32 2147483648, %v4067_v30 }
 0xc6d   :  { %v1971_v20 = vadd.f32 %v3026_v25, %v1970_v35  ;;  %v2095_v43 = vor.u32 1.1754944e-38, %v2094_v26 }
 0xc6e   :  { %v3028_v40 = vpop.eup %3027 }
 0xc6f   :  { %v1975_v39 = vsel %vm1974_vm3, %v3026_v25, %v1971_v20  ;;  %v1983_v42 = vmul.f32 %v3028_v40, %v1966_v24  ;;  %vm1988_vm5 = vweird.f32 %v3028_v40 }
 0xc70   :  { %v1980_v44 = vsel %vm1977_vm4, %v1979_v32, %v1975_v39  ;;  %vm1989_vm8 = vmor %vm1987_vm6, %vm1988_vm5 }
 0xc71   :  { %v4070_v7 = vpop.eup %3029  ;;  %v1984_v46 = vsub.f32 1.0, %v1983_v42  ;;  %v1981_v47 = vmul.f32 %v4029_v56, %v1980_v44 }
 0xc72   :  { %v4073_v31 = vpop.xlane.xlu0 %2081  ;;  %v2084_v50 = vmul.f32 %v4070_v7, %v4067_v30  ;;  %vm2089_vm10 = vweird.f32 %v4070_v7 }
 0xc73   :  { %v1985_v14 = vmul.f32 %v3028_v40, %v1984_v46  ;;  %v2203_v4 = vpop.xlane.xlu2 %2202  ;;  %3031 = vrcp.f32 %v4073_v31  ;;  %2819 = vmatmul.msk.f32.vlgmr.msrb.gmra.mxu2 %vm990_vm7, %v1981_v47  ;;  %vm4097_vm13 = vmor %vm2088_vm12, %vm2089_vm10  ;;  %vm2103_vm5 = vweird.f32 %v4073_v31  ;;  %v2109_v25 = vand.u32 2147483648, %v4073_v31 }
 0xc74   :  { %3033 = vrcp.f32 %v2203_v4  ;;  %v2085_v56 = vsub.f32 1.0, %v2084_v50  ;;  %v2218_v34 = vand.u32 2147483648, %v2203_v4  ;;  %v2216_v2 = vand.u32 2147483647, %v2203_v4 }
 0xc75   :  { %v1986_v52 = vadd.f32 %v3028_v40, %v1985_v14  ;;  %vm2212_vm1 = vweird.f32 %v2203_v4  ;;  %v2107_v35 = vand.u32 2147483647, %v4073_v31 }
 0xc76   :  { %v2086_v61 = vmul.f32 %v4070_v7, %v2085_v56  ;;  %v2219_v11 = vor.u32 1.1754944e-38, %v2218_v34  ;;  %vm2217_vm4 = vcmp.eq.f32.partialorder %v2216_v2, 8.507059e+37 }
 0xc77   :  { %v1990_v60 = vsel %vm1989_vm8, %v3028_v40, %v1986_v52  ;;  %v2110_v52 = vor.u32 1.1754944e-38, %v2109_v25  ;;  %v2844_v25 = vld [vmem:[%s4396_s11 + $0x68] sm:$0xff] }
 0xc78   :  { %v1995_v5 = vsel %vm1992_vm9, %v1994_v53, %v1990_v60  ;;  %v2087_v28 = vadd.f32 %v4070_v7, %v2086_v61 }
 0xc79   :  { %v4079_v58 = vpop.eup %3031  ;;  %v1996_v59 = vmul.f32 %v4033_v29, %v1995_v5  ;;  %v2092_v29 = vand.u32 2147483647, %v4067_v30 }
 0xc7a   :  { %v3034_v37 = vpop.eup %3033  ;;  %v2099_v62 = vmul.f32 %v4079_v58, %v4073_v31  ;;  %v2091_v15 = vsel %vm4097_vm13, %v4070_v7, %v2087_v28  ;;  %vm2104_vm6 = vweird.f32 %v4079_v58  ;;  %vm2108_vm13 = vcmp.eq.f32.partialorder %v2107_v35, 8.507059e+37 }
 0xc7b   :  { %v2208_v57 = vmul.f32 %v3034_v37, %v2203_v4  ;;  %v4085_v23 = vpop.xlane.xlu2 %2205  ;;  %v4087_v3 = vpop.xlane.xlu1 %2324  ;;  %2820 = vmatmul.msk.f32.gmra.mxu2 %vm990_vm7, %v1996_v59  ;;  %vm2213_vm11 = vweird.f32 %v3034_v37  ;;  %vm4101_vm2 = vcmp.eq.f32.partialorder %v2092_v29, 8.507059e+37  ;;  %vm2105_vm10 = vmor %vm2103_vm5, %vm2104_vm6 }
 0xc7c   :  { %3035 = vrcp.f32 %v4085_v23  ;;  %v2100_v1 = vsub.f32 1.0, %v2099_v62  ;;  %vm2214_vm3 = vmor %vm2212_vm1, %vm2213_vm11  ;;  %v2096_v20 = vsel %vm4101_vm2, %v2095_v43, %v2091_v15  ;;  %v2233_v40 = vand.u32 2147483648, %v4085_v23  ;;  %v2845_v43 = vld [vmem:[%s4396_s11 + $0x70] sm:$0xff] }
 0xc7d   :  { %v2209_v45 = vsub.f32 1.0, %v2208_v57  ;;  %3037 = vrcp.f32 %v4087_v3  ;;  %v2231_v47 = vand.u32 2147483647, %v4085_v23  ;;  %vm2227_vm9 = vweird.f32 %v4085_v23 }
 0xc7e   :  { %v2101_v17 = vmul.f32 %v4079_v58, %v2100_v1  ;;  %v2097_v49 = vmul.f32 %v4037_v18, %v2096_v20  ;;  %v2340_v57 = vand.u32 2147483648, %v4087_v3  ;;  %vm2334_vm2 = vweird.f32 %v4087_v3 }
 0xc7f   :  { %v2210_v13 = vmul.f32 %v3034_v37, %v2209_v45  ;;  %vm2232_vm12 = vcmp.eq.f32.partialorder %v2231_v47, 8.507059e+37  ;;  %v2338_v62 = vand.u32 2147483647, %v4087_v3 }
 0xc80   :  { %v2102_v44 = vadd.f32 %v4079_v58, %v2101_v17  ;;  %v2341_v45 = vor.u32 1.1754944e-38, %v2340_v57 }
 0xc81   :  { %v2211_v6 = vadd.f32 %v3034_v37, %v2210_v13 }
 0xc82   :  { %v3036_v9 = vpop.eup %3035  ;;  %v2106_v4 = vsel %vm2105_vm10, %v4079_v58, %v2102_v44 }
 0xc83   :  { %v2215_v51 = vsel %vm2214_vm3, %v3034_v37, %v2211_v6  ;;  %v2223_v12 = vmul.f32 %v3036_v9, %v4085_v23  ;;  %v2944_v21 = vpop.permute.xlu2 %2943  ;;  %v4112_v63 = vpop.xlane.xlu1 %2327  ;;  %vm2228_vm8 = vweird.f32 %v3036_v9  ;;  %v2111_v60 = vsel %vm2108_vm13, %v2110_v52, %v2106_v4 }
 0xc84   :  { %v2220_v22 = vsel %vm2217_vm4, %v2219_v11, %v2215_v51  ;;  %v2945_v38 = vunpack.i.l.bf16 %v2944_v21  ;;  %v3038_v36 = vpop.eup %3037  ;;  %v2946_v42 = vunpack.i.h.bf16 %v2944_v21  ;;  %3039 = vrcp.f32 %v4112_v63  ;;  %vm2229_vm11 = vmor %vm2227_vm9, %vm2228_vm8 }
 0xc85   :  { %v2224_v24 = vsub.f32 1.0, %v2223_v12  ;;  %v2939_v30 = vpop.permute.xlu0 %2938  ;;  %v2221_v46 = vmul.f32 %v4043_v8, %v2220_v22  ;;  %v2330_v48 = vmul.f32 %v3038_v36, %v4087_v3  ;;  %v2234_v8 = vor.u32 1.1754944e-38, %v2233_v40  ;;  %v2843_v22 = vld [vmem:[%s4396_s11 + $0x60] sm:$0xff] }
 0xc86   :  { %v2940_v32 = vunpack.i.l.bf16 %v2939_v30  ;;  %2263 = vmatpush.msra.mxu2 %v2945_v38  ;;  %v2941_v7 = vunpack.i.h.bf16 %v2939_v30  ;;  %v2112_v37 = vmul.f32 %v4041_v54, %v2111_v60  ;;  %vm2335_vm1 = vweird.f32 %v3038_v36  ;;  %v2841_v38 = vld [vmem:[%s4396_s11 + $0x50] sm:$0xff]  ;;  %v2839_v30 = vld [vmem:[%s4396_s11 + $0x40] sm:$0xff] }
 0xc87   :  { %v2225_v39 = vmul.f32 %v3036_v9, %v2224_v24  ;;  %v2331_v18 = vsub.f32 1.0, %v2330_v48  ;;  %vm2336_vm3 = vmor %vm2334_vm2, %vm2335_vm1  ;;  %vm2339_vm4 = vcmp.eq.f32.partialorder %v2338_v62, 8.507059e+37  ;;  %v2355_v13 = vand.u32 2147483648, %v4112_v63  ;;  %v2842_v24 = vld [vmem:[%s4396_s11 + $0x58] sm:$0xff]  ;;  %v2863_v62 = vld [vmem:[%s4397_s12 + $0xf0] sm:$0xff] }
 0xc88   :  { %2141 = vmatpush.msrb.mxu0 %v2940_v32  ;;  %2264 = vmatpush.msra.mxu2 %v2946_v42  ;;  %vm2349_vm6 = vweird.f32 %v4112_v63  ;;  %v2353_v3 = vand.u32 2147483647, %v4112_v63 }
 0xc89   :  { %v2226_v14 = vadd.f32 %v3036_v9, %v2225_v39  ;;  %2831 = vmatmul.msk.f32.vlgmr.msra.gmra.mxu2 %vm990_vm7, %v2221_v46  ;;  %v2332_v5 = vmul.f32 %v3038_v36, %v2331_v18  ;;  %v2356_v55 = vor.u32 1.1754944e-38, %v2355_v13  ;;  %v2855_v13 = vld [vmem:[%s4397_s12 + $0xb0] sm:$0xff] }
 0xc8a   :  { %2142 = vmatpush.msrb.mxu0 %v2941_v7  ;;  %v3040_v56 = vpop.eup %3039  ;;  %vm2354_vm9 = vcmp.eq.f32.partialorder %v2353_v3, 8.507059e+37  ;;  %2550 = vmatpush.msrb.mxu2 %v2863_v62  ;;  %v2854_v3 = vld [vmem:[%s4397_s12 + $0xa8] sm:$0xff]  ;;  %v2875_v62 = vld [vmem:[%s4398_s13 + $0x130] sm:$0xff] }
 0xc8b   :  { %2825 = vmatmul.msk.f32.vlgmr.msrb.gmra.mxu0 %vm990_vm7, %v2097_v49  ;;  %v2230_v50 = vsel %vm2229_vm11, %v3036_v9, %v2226_v14  ;;  %v2345_v59 = vmul.f32 %v3040_v56, %v4112_v63  ;;  %v2333_v61 = vadd.f32 %v3038_v36, %v2332_v5  ;;  %vm2350_vm5 = vweird.f32 %v3040_v56  ;;  %v2840_v63 = vld [vmem:[%s4396_s11 + $0x48] sm:$0xff]  ;;  %v2792_v49 = vld [vmem:[%s4394_s9 + $0x15] ss:$0 sm:$0xff] }
 0xc8c   :  { %v2235_v53 = vsel %vm2232_vm12, %v2234_v8, %v2230_v50  ;;  %vm2351_vm8 = vmor %vm2349_vm6, %vm2350_vm5 }
 0xc8d   :  { %v2236_v31 = vmul.f32 %v4049_v41, %v2235_v53  ;;  %v2346_v58 = vsub.f32 1.0, %v2345_v59  ;;  %v2337_v41 = vsel %vm2336_vm3, %v3038_v36, %v2333_v61 }
 0xc8e   :  { %v2342_v54 = vsel %vm2339_vm4, %v2341_v45, %v2337_v41  ;;  %v2864_v41 = vld [vmem:[%s4397_s12 + $0xf8] sm:$0xff]  ;;  %v2862_v45 = vld [vmem:[%s4397_s12 + $0xe8] sm:$0xff] }
 0xc8f   :  { %v2347_v23 = vmul.f32 %v3040_v56, %v2346_v58  ;;  %v2343_v26 = vmul.f32 %v4051_v16, %v2342_v54  ;;  %v2846_v16 = vld [vmem:[%s4396_s11 + $0x78] sm:$0xff]  ;;  %2573 = vmatpush.msrb.mxu3 %v2864_v41  ;;  %v2891_v41 = vld [vmem:[%s4398_s13 + $0x1b0] sm:$0xff] }
 0xc90   :  { %2447 = vmatpush.msra.mxu1 %v2846_v16  ;;  %v2860_v54 = vld [vmem:[%s4397_s12 + $0xd8] sm:$0xff] }
 0xc91   :  { %2832 = vmatmul.msk.f32.gmra.mxu2 %vm990_vm7, %v2236_v31  ;;  %v2348_v28 = vadd.f32 %v3040_v56, %v2347_v23  ;;  %v2861_v23 = vld [vmem:[%s4397_s12 + $0xe0] sm:$0xff]  ;;  %2574 = vmatpush.msrb.mxu3 %v2862_v45  ;;  %v2890_v45 = vld [vmem:[%s4398_s13 + $0x1a8] sm:$0xff] }
 0xc92   :  { %2448 = vmatpush.msra.mxu1 %v2845_v43  ;;  %2551 = vmatpush.msrb.mxu2 %v2861_v23  ;;  %v2874_v23 = vld [vmem:[%s4398_s13 + $0x128] sm:$0xff] }
 0xc93   :  { %2826 = vmatmul.msk.f32.gmra.mxu0 %vm990_vm7, %v2112_v37  ;;  %v2352_v2 = vsel %vm2351_vm8, %v3040_v56, %v2348_v28  ;;  %2575 = vmatpush.msrb.mxu3 %v2860_v54  ;;  %v2858_v28 = vld [vmem:[%s4397_s12 + $0xc8] sm:$0xff]  ;;  %v2889_v54 = vld [vmem:[%s4398_s13 + $0x1a0] sm:$0xff] }
 0xc94   :  { %v2357_v6 = vsel %vm2354_vm9, %v2356_v55, %v2352_v2  ;;  %2449 = vmatpush.msra.mxu1 %v2844_v25  ;;  %v2851_v2 = vld [vmem:[%s4397_s12 + $0x90] sm:$0xff]  ;;  %v2852_v55 = vld [vmem:[%s4397_s12 + $0x98] sm:$0xff] }
 0xc95   :  { %v2358_v9 = vmul.f32 %v4057_v19, %v2357_v6  ;;  %2576 = vmatpush.msrb.mxu3 %v2858_v28  ;;  %v2849_v6 = vld [vmem:[%s4397_s12 + $0x80] sm:$0xff]  ;;  %v2888_v28 = vld [vmem:[%s4398_s13 + $0x198] sm:$0xff] }
 0xc96   :  { %2450 = vmatpush.msra.mxu1 %v2843_v22 }
 0xc98   :  { %2451 = vmatpush.msra.mxu1 %v2842_v24 }
 0xc9a   :  { %2452 = vmatpush.msra.mxu1 %v2841_v38 }
 0xc9b   :  { %v2949_v29 = vpop.permute.xlu1 %2948 }
 0xc9c   :  { %v2950_v34 = vunpack.i.l.bf16 %v2949_v29  ;;  %v2951_v1 = vunpack.i.h.bf16 %v2949_v29  ;;  %2453 = vmatpush.msra.mxu1 %v2840_v63  ;;  %v2859_v29 = vld [vmem:[%s4397_s12 + $0xd0] sm:$0xff] }
 0xc9d   :  { %2552 = vmatpush.msrb.mxu2 %v2859_v29  ;;  %v2873_v29 = vld [vmem:[%s4398_s13 + $0x120] sm:$0xff] }
 0xc9e   :  { %2385 = vmatpush.msra.mxu0 %v2950_v34  ;;  %2454 = vmatpush.msra.mxu1 %v2839_v30  ;;  %v2857_v34 = vld [vmem:[%s4397_s12 + $0xc0] sm:$0xff] }
 0xc9f   :  { %2553 = vmatpush.msrb.mxu2 %v2857_v34  ;;  %v2872_v34 = vld [vmem:[%s4398_s13 + $0x118] sm:$0xff] }
 0xca0   :  { %2386 = vmatpush.msra.mxu0 %v2951_v1  ;;  %v2856_v1 = vld [vmem:[%s4397_s12 + $0xb8] sm:$0xff] }
 0xca1   :  { %2837 = vmatmul.msk.f32.vlgmr.msra.gmra.mxu0 %vm990_vm7, %v2343_v26  ;;  %2554 = vmatpush.msrb.mxu2 %v2855_v13  ;;  %v2853_v26 = vld [vmem:[%s4397_s12 + $0xa0] sm:$0xff]  ;;  %v2871_v13 = vld [vmem:[%s4398_s13 + $0x110] sm:$0xff] }
 0xca2   :  { %2577 = vmatpush.msrb.mxu3 %v2856_v1  ;;  %v2887_v1 = vld [vmem:[%s4398_s13 + $0x190] sm:$0xff] }
 0xca3   :  { %2555 = vmatpush.msrb.mxu2 %v2853_v26  ;;  %v2870_v26 = vld [vmem:[%s4398_s13 + $0x108] sm:$0xff] }
 0xca4   :  { %2578 = vmatpush.msrb.mxu3 %v2854_v3  ;;  %v2886_v3 = vld [vmem:[%s4398_s13 + $0x188] sm:$0xff] }
 0xca5   :  { %2556 = vmatpush.msrb.mxu2 %v2851_v2  ;;  %v2793_v2 = vld [vmem:[%s4394_s9 + $0x16] ss:$8 sm:$0x3] }
 0xca6   :  { %2579 = vmatpush.msrb.mxu3 %v2852_v55  ;;  %v2869_v55 = vld [vmem:[%s4398_s13 + $0x100] sm:$0xff] }
 0xca7   :  { %2557 = vmatpush.msrb.mxu2 %v2849_v6  ;;  %v2885_v6 = vld [vmem:[%s4398_s13 + $0x180] sm:$0xff] }
 0xca9   :  { %2838 = vmatmul.msk.f32.gmra.mxu0 %vm990_vm7, %v2358_v9  ;;  %v2850_v9 = vld [vmem:[%s4397_s12 + $0x88] sm:$0xff] }
 0xcaa   :  { %2580 = vmatpush.msrb.mxu3 %v2850_v9  ;;  %v2532_v9 = vperm.slane %v2793_v2, 0 }
 0xcf6   :  { %v2020_v10 = vpop.f32.mrf.mxu2 }
 0xcfe   :  { %v2023_v11 = vpop.f32.mrf.mxu2 }
 0xd08   :  { %v2144_v15 = vpop.f32.mrf.mxu0 }
 0xd09   :  { %2396 = vrot.lane.b32.xlu0 %v2144_v15, %s3091_s20  ;;  %v2884_v15 = vld [vmem:[%s4398_s13 + $0x178] sm:$0xff] }
 0xd0a   :  { %2657 = vmatpush.msrb.mxu0 %v2884_v15 }
 0xd0c   :  { %v2266_v51 = vpop.f32.mrf.mxu2 }
 0xd10   :  { %v2147_v12 = vpop.f32.mrf.mxu0 }
 0xd11   :  { %2404 = vrot.lane.b32.xlu0 %v2266_v51, %s3088_s1  ;;  %v2900_v51 = vld [vmem:[%s4398_s13 + $0x1f8] sm:$0xff] }
 0xd12   :  { %2680 = vmatpush.msrb.mxu1 %v2900_v51 }
 0xd14   :  { %v2269_v17 = vpop.f32.mrf.mxu2 }
 0xd15   :  { %2406 = vrot.lane.b32.xlu1 %v2269_v17, %s3088_s1  ;;  %v2883_v17 = vld [vmem:[%s4398_s13 + $0x170] sm:$0xff] }
 0xd16   :  { %2658 = vmatpush.msrb.mxu0 %v2883_v17 }
 0xd19   :  { %2398 = vrot.lane.b32.xlu0 %v2147_v12, %s3091_s20  ;;  %v2899_v12 = vld [vmem:[%s4398_s13 + $0x1f0] sm:$0xff] }
 0xd1a   :  { %2681 = vmatpush.msrb.mxu1 %v2899_v12 }
 0xd1e   :  { %v2388_v19 = vpop.f32.mrf.mxu0 }
 0xd1f   :  { %2412 = vrot.lane.b32.xlu2 %v2388_v19, %s3087_s18  ;;  %v2882_v19 = vld [vmem:[%s4398_s13 + $0x168] sm:$0xff] }
 0xd20   :  { %2659 = vmatpush.msrb.mxu0 %v2882_v19 }
 0xd26   :  { %v2391_v21 = vpop.f32.mrf.mxu0 }
 0xd27   :  { %2414 = vrot.lane.b32.xlu2 %v2391_v21, %s3087_s18  ;;  %v2898_v21 = vld [vmem:[%s4398_s13 + $0x1e8] sm:$0xff]  ;;  %s3095_s18 = smov [#allocation2]  }
 0xd28   :  { %2682 = vmatpush.msrb.mxu1 %v2898_v21  ;;  %s2713_s23 = sshll.u32 %s3095_s18, 4  ;;  %s2714_s23 = int_to_ptr.vmem [resolvable:$true] %s2713_s23 }
 0xd79   :  { %v2413_v36 = vpop.permute.xlu2 %2412 }
 0xd7b   :  { %v2397_v35 = vpop.permute.xlu0 %2396 }
 0xd7c   :  { %v2418_v20 = vsel %vm990_vm7, %v2020_v10, %v2397_v35 }
 0xd81   :  { %v2415_v46 = vpop.permute.xlu2 %2414 }
 0xd83   :  { %v2405_v40 = vpop.permute.xlu0 %2404 }
 0xd84   :  { %v2420_v32 = vsel %vm1493_vm14, %v2418_v20, %v2405_v40 }
 0xd85   :  { %v2422_v39 = vsel %vm1496_vm0, %v2420_v32, %v2413_v36  ;;  %v2789_v32 = vld [vmem:[%s4394_s9 + $0x12] ss:$0 sm:$0xff] }
 0xd86   :  { %2847 = vmatmul.msk.f32.vlgmr.msra.gmra.mxu1 %vm855_vm15, %v2422_v39 }
 0xd87   :  { %v2407_v44 = vpop.permute.xlu1 %2406 }
 0xd8b   :  { %v2399_v42 = vpop.permute.xlu0 %2398 }
 0xd8c   :  { %v2419_v7 = vsel %vm990_vm7, %v2023_v11, %v2399_v42 }
 0xd8d   :  { %v2421_v47 = vsel %vm1493_vm14, %v2419_v7, %v2407_v44  ;;  %v2790_v44 = vld [vmem:[%s4394_s9 + $0x13] ss:$0 sm:$0xff] }
 0xd8e   :  { %v2423_v48 = vsel %vm1496_vm0, %v2421_v47, %v2415_v46 }
 0xd8f   :  { %2848 = vmatmul.msk.f32.gmra.mxu1 %vm855_vm15, %v2423_v48 }
 0xe03   :  { %v2456_v14 = vpop.f32.mrf.mxu1 }
 0xe04   :  { %v2462_v8 = vadd.f32 %v2456_v14, %v3893_v27 }
 0xe06   :  { %v4191_v50 = vadd.f32 %v2792_v49, %v2462_v8 }
 0xe08   :  { %v2466_v4 = vsel %vm855_vm15, %v4191_v50, 0.0 }
 0xe09   :  { %2467 = vadd.xlane.f32.xlu0 %v2466_v4 }
 0xe0c   :  { %v2459_v52 = vpop.f32.mrf.mxu1 }
 0xe0d   :  { %v2463_v18 = vadd.f32 %v2459_v52, %v3898_v0 }
 0xe0f   :  { %v4196_v53 = vadd.f32 %v2792_v49, %v2463_v18  ;;  %v2881_v18 = vld [vmem:[%s4398_s13 + $0x160] sm:$0xff] }
 0xe10   :  { %2660 = vmatpush.msrb.mxu0 %v2881_v18 }
 0xe11   :  { %v2469_v56 = vsel %vm855_vm15, %v4196_v53, 0.0 }
 0xe12   :  { %2470 = vadd.xlane.f32.xlu1 %v2469_v56  ;;  %v2897_v56 = vld [vmem:[%s4398_s13 + $0x1e0] sm:$0xff] }
 0xe13   :  { %2683 = vmatpush.msrb.mxu1 %v2897_v56 }
 0xe7c   :  { %v2468_v60 = vpop.xlane.xlu0 %2467 }
 0xe7d   :  { %v2472_v31 = vmul.f32 %v2468_v60, %v3438_v33  ;;  %v2880_v60 = vld [vmem:[%s4398_s13 + $0x158] sm:$0xff] }
 0xe7e   :  { %2661 = vmatpush.msrb.mxu0 %v2880_v60 }
 0xe7f   :  { %v4202_v27 = vsub.f32 %v4191_v50, %v2472_v31  ;;  %v2896_v31 = vld [vmem:[%s4398_s13 + $0x1d8] sm:$0xff] }
 0xe80   :  { %2684 = vmatpush.msrb.mxu1 %v2896_v31 }
 0xe81   :  { %v2476_v5 = vmul.f32 %v4202_v27, %v4202_v27 }
 0xe83   :  { %v2478_v59 = vsel %vm855_vm15, %v2476_v5, 0.0  ;;  %v2895_v5 = vld [vmem:[%s4398_s13 + $0x1d0] sm:$0xff] }
 0xe84   :  { %2479 = vadd.xlane.f32.xlu2 %v2478_v59  ;;  %2685 = vmatpush.msrb.mxu1 %v2895_v5  ;;  %v2878_v59 = vld [vmem:[%s4398_s13 + $0x148] sm:$0xff] }
 0xe85   :  { %v2471_v37 = vpop.xlane.xlu1 %2470 }
 0xe86   :  { %v2473_v0 = vmul.f32 %v2471_v37, %v3438_v33  ;;  %v2894_v37 = vld [vmem:[%s4398_s13 + $0x1c8] sm:$0xff] }
 0xe87   :  { %2686 = vmatpush.msrb.mxu1 %v2894_v37 }
 0xe88   :  { %v4209_v61 = vsub.f32 %v4196_v53, %v2473_v0  ;;  %v2877_v0 = vld [vmem:[%s4398_s13 + $0x140] sm:$0xff] }
 0xe8a   :  { %v2477_v58 = vmul.f32 %v4209_v61, %v4209_v61 }
 0xe8c   :  { %v2481_v57 = vsel %vm855_vm15, %v2477_v58, 0.0  ;;  %v2876_v58 = vld [vmem:[%s4398_s13 + $0x138] sm:$0xff] }
 0xe8d   :  { %2482 = vadd.xlane.f32.xlu0 %v2481_v57  ;;  %v2892_v57 = vld [vmem:[%s4398_s13 + $0x1b8] sm:$0xff] }
 0xef7   :  { %v2480_v10 = vpop.xlane.xlu2 %2479 }
 0xef8   :  { %v2484_v11 = vmul.f32 %v2480_v10, %v3438_v33  ;;  %v2533_v10 = vperm.slane %v2793_v2, 1 }
 0xefa   :  { %v2486_v16 = vadd.f32 1e-06, %v2484_v11 }
 0xefc   :  { %3041 = vrsqrt.f32 %v2486_v16  ;;  %vm2494_vm14 = vweird.f32 %v2486_v16 }
 0xf00   :  { %v2483_v43 = vpop.xlane.xlu0 %2482 }
 0xf01   :  { %v2485_v25 = vmul.f32 %v2483_v43, %v3438_v33 }
 0xf02   :  { %v3042_v22 = vpop.eup %3041 }
 0xf03   :  { %v2489_v24 = vmul.f32 %v3042_v22, %v2486_v16  ;;  %v2487_v38 = vadd.f32 1e-06, %v2485_v25  ;;  %vm2495_vm7 = vweird.f32 %v3042_v22 }
 0xf04   :  { %vm2496_vm0 = vmor %vm2494_vm14, %vm2495_vm7 }
 0xf05   :  { %v2490_v63 = vmul.f32 %v3042_v22, %v2489_v24  ;;  %3043 = vrsqrt.f32 %v2487_v38  ;;  %vm2504_vm11 = vweird.f32 %v2487_v38 }
 0xf07   :  { %v2491_v30 = vmul.f32 0.5, %v2490_v63 }
 0xf09   :  { %v2492_v35 = vsub.f32 1.5, %v2491_v30 }
 0xf0b   :  { %v3044_v36 = vpop.eup %3043  ;;  %v2493_v20 = vmul.f32 %v3042_v22, %v2492_v35 }
 0xf0c   :  { %v2499_v40 = vmul.f32 %v3044_v36, %v2487_v38  ;;  %vm2505_vm10 = vweird.f32 %v3044_v36 }
 0xf0d   :  { %v2497_v33 = vsel %vm2496_vm0, %v3042_v22, %v2493_v20  ;;  %vm2506_vm12 = vmor %vm2504_vm11, %vm2505_vm10 }
 0xf0e   :  { %v2508_v39 = vmul.f32 %v2497_v33, %v4202_v27  ;;  %v2500_v42 = vmul.f32 %v3044_v36, %v2499_v40  ;;  %v2879_v27 = vld [vmem:[%s4398_s13 + $0x150] sm:$0xff] }
 0xf0f   :  { %2662 = vmatpush.msrb.mxu0 %v2879_v27 }
 0xf10   :  { %v2510_v7 = vmul.f32 %v2789_v32, %v2508_v39  ;;  %v2501_v46 = vmul.f32 0.5, %v2500_v42 }
 0xf11   :  { %2663 = vmatpush.msrb.mxu0 %v2878_v59 }
 0xf12   :  { %v2502_v47 = vsub.f32 1.5, %v2501_v46  ;;  %v2512_v48 = vadd.f32 %v2790_v44, %v2510_v7 }
 0xf13   :  { %2664 = vmatpush.msrb.mxu0 %v2877_v0 }
 0xf14   :  { %v2503_v49 = vmul.f32 %v3044_v36, %v2502_v47  ;;  %2865 = vmatmul.msk.f32.vlgmr.msrb.gmra.mxu2 %vm855_vm15, %v2512_v48  ;;  %2867 = vmatmul.msk.f32.vlgmr.msrb.gmra.mxu3 %vm855_vm15, %v2512_v48 }
 0xf15   :  { %2665 = vmatpush.msrb.mxu0 %v2876_v58 }
 0xf16   :  { %v2507_v14 = vsel %vm2506_vm12, %v3044_v36, %v2503_v49 }
 0xf17   :  { %v2509_v8 = vmul.f32 %v2507_v14, %v4209_v61  ;;  %v2893_v61 = vld [vmem:[%s4398_s13 + $0x1c0] sm:$0xff]  ;;  %2666 = vmatpush.msrb.mxu0 %v2875_v62 }
 0xf18   :  { %2687 = vmatpush.msrb.mxu1 %v2893_v61 }
 0xf19   :  { %v2511_v4 = vmul.f32 %v2789_v32, %v2509_v8  ;;  %2667 = vmatpush.msrb.mxu0 %v2874_v23  ;;  %v2794_v23 = vld [vmem:[%s4394_s9 + $0x17] ss:$0 sm:$0xff]  ;;  %s3096_s9 = smov 128  }
 0xf1a   :  { %2688 = vmatpush.msrb.mxu1 %v2892_v57 }
 0xf1b   :  { %v2513_v52 = vadd.f32 %v2790_v44, %v2511_v4  ;;  %2668 = vmatpush.msrb.mxu0 %v2873_v29 }
 0xf1c   :  { %2689 = vmatpush.msrb.mxu1 %v2891_v41 }
 0xf1d   :  { %2866 = vmatmul.msk.f32.gmra.mxu2 %vm855_vm15, %v2513_v52  ;;  %2868 = vmatmul.msk.f32.gmra.mxu3 %vm855_vm15, %v2513_v52 }
 0xf1e   :  { %2690 = vmatpush.msrb.mxu1 %v2890_v45  ;;  %2669 = vmatpush.msrb.mxu0 %v2872_v34 }
 0xf20   :  { %2691 = vmatpush.msrb.mxu1 %v2889_v54  ;;  %2670 = vmatpush.msrb.mxu0 %v2871_v13 }
 0xf22   :  { %2692 = vmatpush.msrb.mxu1 %v2888_v28  ;;  %2671 = vmatpush.msrb.mxu0 %v2870_v26 }
 0xf24   :  { %2693 = vmatpush.msrb.mxu1 %v2887_v1  ;;  %2672 = vmatpush.msrb.mxu0 %v2869_v55 }
 0xf26   :  { %2694 = vmatpush.msrb.mxu1 %v2886_v3 }
 0xf28   :  { %2695 = vmatpush.msrb.mxu1 %v2885_v6 }
 0xf97   :  { %v2559_v11 = vpop.f32.mrf.mxu2  ;;  %v2582_v16 = vpop.f32.mrf.mxu3 }
 0xf98   :  { %v2560_v15 = vadd.f32 %v2559_v11, %v2532_v9  ;;  %v2583_v51 = vadd.f32 %v2582_v16, %v2533_v10 }
 0xf9a   :  { %v2588_v17 = vmul.f32 %v2560_v15, %v2560_v15  ;;  %v2589_v12 = vmul.f32 %v2583_v51, %v2583_v51 }
 0xf9c   :  { %v2592_v19 = vmul.f32 %v2588_v17, %v2560_v15  ;;  %v2593_v21 = vmul.f32 %v2589_v12, %v2583_v51 }
 0xf9e   :  { %v2596_v43 = vmul.f32 0.044715, %v2592_v19  ;;  %v2597_v25 = vmul.f32 0.044715, %v2593_v21 }
 0xfa0   :  { %v2600_v22 = vadd.f32 %v2596_v43, %v2560_v15  ;;  %v2601_v24 = vadd.f32 %v2597_v25, %v2583_v51  ;;  %v2562_v38 = vpop.f32.mrf.mxu2  ;;  %v2585_v63 = vpop.f32.mrf.mxu3 }
 0xfa1   :  { %v2563_v30 = vadd.f32 %v2562_v38, %v2532_v9  ;;  %v2586_v35 = vadd.f32 %v2585_v63, %v2533_v10 }
 0xfa2   :  { %v2604_v36 = vmul.f32 0.7978846, %v2600_v22  ;;  %v2605_v20 = vmul.f32 0.7978846, %v2601_v24 }
 0xfa3   :  { %v2590_v40 = vmul.f32 %v2563_v30, %v2563_v30  ;;  %v2591_v32 = vmul.f32 %v2586_v35, %v2586_v35 }
 0xfa4   :  { %3045 = vtanh.f32 %v2604_v36 }
 0xfa5   :  { %3047 = vtanh.f32 %v2605_v20  ;;  %v2594_v33 = vmul.f32 %v2590_v40, %v2563_v30  ;;  %v2595_v39 = vmul.f32 %v2591_v32, %v2586_v35 }
 0xfa7   :  { %v2598_v42 = vmul.f32 0.044715, %v2594_v33  ;;  %v2599_v44 = vmul.f32 0.044715, %v2595_v39 }
 0xfa9   :  { %v2602_v7 = vadd.f32 %v2598_v42, %v2563_v30  ;;  %v2603_v46 = vadd.f32 %v2599_v44, %v2586_v35 }
 0xfaa   :  { %v3046_v47 = vpop.eup %3045 }
 0xfab   :  { %v3048_v48 = vpop.eup %3047  ;;  %v2612_v49 = vadd.f32 1.0, %v3046_v47  ;;  %v2606_v14 = vmul.f32 0.7978846, %v2602_v7  ;;  %v2607_v8 = vmul.f32 0.7978846, %v2603_v46 }
 0xfac   :  { %v2613_v4 = vadd.f32 1.0, %v3048_v48 }
 0xfad   :  { %v2616_v52 = vmul.f32 0.5, %v2612_v49  ;;  %3049 = vtanh.f32 %v2606_v14 }
 0xfae   :  { %v2617_v18 = vmul.f32 0.5, %v2613_v4  ;;  %3051 = vtanh.f32 %v2607_v8 }
 0xfaf   :  { %v2620_v56 = vmul.f32 %v2616_v52, %v2560_v15 }
 0xfb0   :  { %v2621_v60 = vmul.f32 %v2617_v18, %v2583_v51 }
 0xfb1   :  { %2673 = vmatmul.f32.vlgmr.msrb.gmra.mxu0 %v2620_v56 }
 0xfb2   :  { %2696 = vmatmul.f32.vlgmr.msrb.gmra.mxu1 %v2621_v60 }
 0xfb3   :  { %v3050_v31 = vpop.eup %3049 }
 0xfb4   :  { %v3052_v27 = vpop.eup %3051  ;;  %v2614_v5 = vadd.f32 1.0, %v3050_v31 }
 0xfb5   :  { %v2615_v59 = vadd.f32 1.0, %v3052_v27 }
 0xfb6   :  { %v2618_v37 = vmul.f32 0.5, %v2614_v5 }
 0xfb7   :  { %v2619_v0 = vmul.f32 0.5, %v2615_v59 }
 0xfb8   :  { %v2622_v61 = vmul.f32 %v2618_v37, %v2563_v30 }
 0xfb9   :  { %v2623_v58 = vmul.f32 %v2619_v0, %v2586_v35 }
 0xfba   :  { %2676 = vmatmul.f32.gmra.mxu0 %v2622_v61 }
 0xfbb   :  { %2699 = vmatmul.f32.gmra.mxu1 %v2623_v58 }
0x102e   :  { %v2674_v57 = vpop.f32.mrf.mxu0 }
0x102f   :  { %v2697_v62 = vpop.f32.mrf.mxu1 }
0x1030   :  { %v2698_v41 = vadd.f32 %v2697_v62, %v2674_v57 }
0x1032   :  { %v2703_v45 = vadd.f32 %v2698_v41, %v4191_v50 }
0x1034   :  { %v2705_v29 = vadd.f32 %v2794_v23, %v2703_v45 }
0x1036   :  { %2707 = vst.msk [vmem:[#allocation2] sm:$0xff] %vm855_vm15, %v2705_v29 }
0x1037   :  { %v2677_v54 = vpop.f32.mrf.mxu0 }
0x1038   :  { %v2700_v34 = vpop.f32.mrf.mxu1 }
0x1039   :  { %v2701_v28 = vadd.f32 %v2700_v34, %v2677_v54 }
0x103b   :  { %v2704_v13 = vadd.f32 %v2701_v28, %v4196_v53 }
0x103d   :  { %v2706_v1 = vadd.f32 %v2794_v23, %v2704_v13 }
0x103f   :  { %2708 = vst.msk [vmem:[#allocation2 + $0x8] sm:$0xff] %vm855_vm15, %v2706_v1 }
0x1040   :  { %2721 = dma.vmem_to_hbm [thread:$0]  %s2714_s23, 256, %s2716_s26, [#allocation3], %s3096_s9, %s3096_s9, %s3097_s27  }
0x1041   :  { %3077 = dma.done.wait [#allocation3], 256  }
0x1042   :  { %3078 = vsyncadd [#allocation3], 4294967040 }
0x1043   :  { %2726 = vsyncpa [#allocation3], 1 }

</bundles_post_ra>
